<compile_context>
chip_gen: v6e
topology: v6e:2x2x1
jax: 0.10.0
libtpu: 0.0.40
codegen_flags: <defaults>
</compile_context>

<pallas_src>
import functools

import jax
import jax.numpy as jnp
from jax.experimental import pallas as pl
from jax.experimental.pallas import tpu as pltpu


# ------------------------------------------------------------------ kernel ---
def music_encoder_kernel(hidden_size, proj_size, seq_len, batch, latent_dim,
                         x_ref, eps_ref,
                         wih_ref, b_ref, wcomb_ref, whr_ref,
                         whead_ref, bhead_ref,
                         z_ref, mu_ref, lv_ref,
                         xg_ref):
    H, P, T, B, L = hidden_size, proj_size, seq_len, batch, latent_dim

    # Hoisted input projection (+ folded bias) for every timestep & direction:
    # one MXU push, result staged in VMEM scratch (not held live in vregs).
    xg_ref[...] = (jnp.dot(x_ref[...].astype(jnp.bfloat16), wih_ref[...],
                           preferred_element_type=jnp.float32) + b_ref[...])

    wcomb = wcomb_ref[...]                       # (2H, 8H) bf16, whr folded into whh

    c = jnp.zeros((B, 2 * H), jnp.float32)       # [c_fwd | c_bwd]
    m = jnp.zeros((B, 2 * H), jnp.float32)       # o * tanh(c): the recurrent carrier

    # T is small: static unroll of the (inherently serial) recurrence.
    # One matmul per step; all slice boundaries are multiples of 128 lanes.
    for s in range(T):
        gx = xg_ref[s * B:(s + 1) * B, :]                              # (B, 8H)
        gates = gx + jnp.dot(m.astype(jnp.bfloat16), wcomb,
                             preferred_element_type=jnp.float32)       # (B, 8H)
        sg = jax.nn.sigmoid(gates[:, 0:6 * H])     # [i_f|i_b|f_f|f_b|o_f|o_b]
        g = jnp.tanh(gates[:, 6 * H:8 * H])        # [g_f|g_b]
        i_all = sg[:, 0:2 * H]
        f_all = sg[:, 2 * H:4 * H]
        o_all = sg[:, 4 * H:6 * H]
        c = f_all * c + i_all * g
        m = o_all * jnp.tanh(c)

    # Apply the projection once: h == torch's h.transpose(0,1).reshape(-1, 2P).
    h = jnp.dot(m, whr_ref[...], preferred_element_type=jnp.float32)   # (B, 2P)

    # Fused mu / log_var heads: one (2P, 2L) matmul, then static slices.
    heads = jnp.dot(h, whead_ref[...],
                    preferred_element_type=jnp.float32) + bhead_ref[...]
    mu_pre = heads[:, 0:L]
    lv_pre = heads[:, L:2 * L]

    # LayerNorm (no affine, eps = 1e-5).
    mean = jnp.mean(mu_pre, axis=-1, keepdims=True)
    var = jnp.mean(jnp.square(mu_pre - mean), axis=-1, keepdims=True)
    mu = (mu_pre - mean) * jax.lax.rsqrt(var + 1e-5)

    # Softplus; sigma = exp(2*log_var); z = mu + eps*sigma.
    log_var = jnp.maximum(lv_pre, 0.0) + jnp.log(1.0 + jnp.exp(-jnp.abs(lv_pre)))
    sigma = jnp.exp(log_var * 2.0)
    z = mu + eps_ref[...] * sigma

    z_ref[...] = z
    mu_ref[...] = mu
    lv_ref[...] = log_var


# ----------------------------------------------------------------- wrapper ---
def music_encoder_forward(x, eps, params, *, hidden_size, proj_size, latent_dim):
    B, T, I = x.shape
    H, P, L = hidden_size, proj_size, latent_dim

    # Time-major (row = t*B + b) slab with the reversed sequence appended along
    # features: row s holds [x_s | x_{T-1-s}], so the kernel never reverses or
    # concatenates anything inside the recurrence.  Tiny one-off copy.
    x_tm = jnp.swapaxes(x, 0, 1)                                     # (T, B, I)
    x2 = jnp.concatenate([x_tm, x_tm[::-1]], axis=-1).reshape(T * B, 2 * I)

    kernel = functools.partial(music_encoder_kernel, H, P, T, B, L)
    vmem = pl.BlockSpec(memory_space=pltpu.MemorySpace.VMEM)

    flops = 2 * B * (T * 2 * I * 8 * H            # hoisted input projection
                     + T * 2 * H * 8 * H          # per-step recurrent matmul
                     + 2 * H * 2 * P              # final projection
                     + 2 * P * 2 * L)             # fused heads
    transc = B * (T * (6 * H + 2 * H + 2 * H) + 6 * L)
    nbytes = 4 * (int(x.size) + int(eps.size) + 3 * B * L) \
        + sum(int(v.size) * v.dtype.itemsize for v in params.values())

    z, mu, log_var = pl.pallas_call(
        kernel,
        out_shape=(jax.ShapeDtypeStruct((B, L), jnp.float32),
                   jax.ShapeDtypeStruct((B, L), jnp.float32),
                   jax.ShapeDtypeStruct((B, L), jnp.float32)),
        in_specs=[vmem] * 8,
        out_specs=(vmem, vmem, vmem),
        scratch_shapes=[pltpu.VMEM((T * B, 8 * H), jnp.float32)],
        cost_estimate=pl.CostEstimate(flops=int(flops),
                                      transcendentals=int(transc),
                                      bytes_accessed=int(nbytes)),
    )(x2, eps,
      params["wih"], params["b"], params["wcomb"], params["whr"],
      params["whead"], params["bhead"])
    return z, mu, log_var


# ------------------------------------------------------------- param setup ---
def init_raw_params(key, input_size, hidden_size, proj_size, latent_dim):
    """Torch-like init: LSTM params ~ U(-1/sqrt(H), ...), Linear ~ U(-1/sqrt(fan_in), ...)."""
    H, P, L = hidden_size, proj_size, latent_dim
    E = 2 * P
    kl = 1.0 / jnp.sqrt(jnp.float32(H))
    kh = 1.0 / jnp.sqrt(jnp.float32(E))
    keys = jax.random.split(key, 14)

    def u(kk, shape, k):
        return jax.random.uniform(kk, shape, jnp.float32, minval=-k, maxval=k)

    return {
        # forward direction (torch gate order i, f, g, o along the 4H axis)
        "wih_f": u(keys[0], (4 * H, input_size), kl),
        "whh_f": u(keys[1], (4 * H, P), kl),
        "bih_f": u(keys[2], (4 * H,), kl),
        "bhh_f": u(keys[3], (4 * H,), kl),
        "whr_f": u(keys[4], (P, H), kl),
        # backward direction
        "wih_b": u(keys[5], (4 * H, input_size), kl),
        "whh_b": u(keys[6], (4 * H, P), kl),
        "bih_b": u(keys[7], (4 * H,), kl),
        "bhh_b": u(keys[8], (4 * H,), kl),
        "whr_b": u(keys[9], (P, H), kl),
        # heads
        "wmu": u(keys[10], (L, E), kh),
        "bmu": u(keys[11], (L,), kh),
        "wlv": u(keys[12], (L, E), kh),
        "blv": u(keys[13], (L,), kh),
    }


def pack_params(raw, *, input_size, hidden_size, proj_size):
    """Pack raw torch-layout weights into the fused, gate-permuted kernel layout.

    Packed gate columns: [i_f | i_b | f_f | f_b | o_f | o_b | g_f | g_b] (each H wide).
    Recurrent weights are folded (W_comb = whr @ whh) and block-diagonal over the
    two directions; the input projection is a (2I, 8H) block matrix consuming the
    [x_t | x_{T-1-t}] slab built by the wrapper.
    """
    H, P, I = hidden_size, proj_size, input_size

    def gate_cols(w_t):
        # w_t: (K, 4H) in torch gate order (i, f, g, o) -> (i, f, o, g) column blocks
        return (w_t[:, 0:H], w_t[:, H:2 * H], w_t[:, 3 * H:4 * H], w_t[:, 2 * H:3 * H])

    # ---- input projection (2I, 8H): rows 0:I consume x_t, rows I:2I consume x_{T-1-t}
    i_f, f_f, o_f, g_f = gate_cols(raw["wih_f"].T)          # (I, H) each
    i_b, f_b, o_b, g_b = gate_cols(raw["wih_b"].T)
    zI = jnp.zeros((I, H), jnp.float32)
    wih2 = jnp.concatenate([
        jnp.concatenate([i_f, zI, f_f, zI, o_f, zI, g_f, zI], axis=1),
        jnp.concatenate([zI, i_b, zI, f_b, zI, o_b, zI, g_b], axis=1),
    ], axis=0)

    # ---- fused LSTM bias (1, 8H)
    bfull_f = (raw["bih_f"] + raw["bhh_f"]).reshape(1, 4 * H)
    bfull_b = (raw["bih_b"] + raw["bhh_b"]).reshape(1, 4 * H)
    bi_f, bf_f, bo_f, bg_f = gate_cols(bfull_f)
    bi_b, bf_b, bo_b, bg_b = gate_cols(bfull_b)
    b = jnp.concatenate([bi_f, bi_b, bf_f, bf_b, bo_f, bo_b, bg_f, bg_b], axis=1)

    # ---- folded recurrent weight: W_comb = whr @ whh per direction, (2H, 8H)
    comb_f = raw["whr_f"].T @ raw["whh_f"].T                 # (H, 4H)
    comb_b = raw["whr_b"].T @ raw["whh_b"].T
    ic_f, fc_f, oc_f, gc_f = gate_cols(comb_f)
    ic_b, fc_b, oc_b, gc_b = gate_cols(comb_b)
    zH = jnp.zeros((H, H), jnp.float32)
    wcomb = jnp.concatenate([
        jnp.concatenate([ic_f, zH, fc_f, zH, oc_f, zH, gc_f, zH], axis=1),  # rows: m_fwd
        jnp.concatenate([zH, ic_b, zH, fc_b, zH, oc_b, zH, gc_b], axis=1),  # rows: m_bwd
    ], axis=0)

    # ---- final projection (2H, 2P), block-diagonal over directions (epilogue only)
    zp = jnp.zeros((H, P), jnp.float32)
    whr = jnp.concatenate([
        jnp.concatenate([raw["whr_f"].T, zp], axis=1),
        jnp.concatenate([zp, raw["whr_b"].T], axis=1),
    ], axis=0)

    # ---- fused heads: (2P, 2L) weights, (1, 2L) bias
    whead = jnp.concatenate([raw["wmu"].T, raw["wlv"].T], axis=1)
    bhead = jnp.concatenate([raw["bmu"], raw["blv"]]).reshape(1, -1)

    return {
        # bf16 on the matmuls that matter (hoisted xg + per-step recurrence);
        # epilogue weights stay f32 (they run once, accuracy > speed there).
        "wih": wih2.astype(jnp.bfloat16),
        "b": b,
        "wcomb": wcomb.astype(jnp.bfloat16),
        "whr": whr,
        "whead": whead,
        "bhead": bhead,
    }


# ------------------------------------------------------- pure-JAX reference ---
def music_encoder_reference(x, eps, raw, *, hidden_size, proj_size):
    """Faithful (unfused, f32) mirror of the PyTorch forward, using the raw weights."""
    H, P = hidden_size, proj_size
    B, T, _ = x.shape

    def run_direction(xs, wih, whh, bih, bhh, whr):
        h = jnp.zeros((B, P), jnp.float32)
        c = jnp.zeros((B, H), jnp.float32)
        for t in range(T):
            gates = xs[:, t, :] @ wih.T + h @ whh.T + bih + bhh
            i = jax.nn.sigmoid(gates[:, 0:H])
            f = jax.nn.sigmoid(gates[:, H:2 * H])
            g = jnp.tanh(gates[:, 2 * H:3 * H])
            o = jax.nn.sigmoid(gates[:, 3 * H:4 * H])
            c = f * c + i * g
            h = (o * jnp.tanh(c)) @ whr.T
        return h

    h_f = run_direction(x, raw["wih_f"], raw["whh_f"], raw["bih_f"],
                        raw["bhh_f"], raw["whr_f"])
    h_b = run_direction(x[:, ::-1, :], raw["wih_b"], raw["whh_b"], raw["bih_b"],
                        raw["bhh_b"], raw["whr_b"])
    h = jnp.concatenate([h_f, h_b], axis=1)        # == h.transpose(0,1).reshape(-1, 2P)

    mu_pre = h @ raw["wmu"].T + raw["bmu"]
    mean = jnp.mean(mu_pre, axis=-1, keepdims=True)
    var = jnp.mean(jnp.square(mu_pre - mean), axis=-1, keepdims=True)
    mu = (mu_pre - mean) * jax.lax.rsqrt(var + 1e-5)

    lv_pre = h @ raw["wlv"].T + raw["blv"]
    log_var = jnp.maximum(lv_pre, 0.0) + jnp.log(1.0 + jnp.exp(-jnp.abs(lv_pre)))
    sigma = jnp.exp(log_var * 2.0)
    z = mu + eps * sigma
    return z, mu, log_var


# -------------------------------------------------------------------- main ---
if __name__ == "__main__":
    BATCH = 8
    SEQ = 8
    INPUT_SIZE = 32
    HIDDEN_SIZE = 128     # each gate slice is exactly one 128-lane tile
    PROJ_SIZE = 64        # 2*proj = 128 -> lane-dense hidden state / enc output
    LATENT_DIM = 32

    root = jax.random.PRNGKey(0)
    kx, ke, kp = jax.random.split(root, 3)
    x = jax.random.normal(kx, (BATCH, SEQ, INPUT_SIZE), jnp.float32)
    # TODO(synk): torch.randn_like noise is generated host-side and passed into
    # the kernel so kernel and reference share the exact same epsilon.
    eps = jax.random.normal(ke, (BATCH, LATENT_DIM), jnp.float32)

    raw = init_raw_params(kp, INPUT_SIZE, HIDDEN_SIZE, PROJ_SIZE, LATENT_DIM)
    packed = pack_params(raw, input_size=INPUT_SIZE,
                         hidden_size=HIDDEN_SIZE, proj_size=PROJ_SIZE)

    z, mu, log_var = music_encoder_forward(
        x, eps, packed, hidden_size=HIDDEN_SIZE, proj_size=PROJ_SIZE,
        latent_dim=LATENT_DIM)
    jax.block_until_ready((z, mu, log_var))

    z_r, mu_r, lv_r = music_encoder_reference(
        x, eps, raw, hidden_size=HIDDEN_SIZE, proj_size=PROJ_SIZE)

    assert z.shape == (BATCH, LATENT_DIM)
    assert mu.shape == (BATCH, LATENT_DIM)
    assert log_var.shape == (BATCH, LATENT_DIM)
    # Tolerance loosened vs. the pure-f32 version: the hoisted input projection
    # and the per-step recurrent matmul now run with bf16 operands (f32 accum).
    for name, got, ref in (("z", z, z_r), ("mu", mu, mu_r), ("log_var", log_var, lv_r)):
        err = float(jnp.max(jnp.abs(got - ref)))
        assert jnp.allclose(got, ref, atol=5e-2, rtol=5e-2), (name, err)

    print("KERNEL_OK")
</pallas_src>

<mosaic_0001>
module attributes {stable_mosaic.version = 11 : i64} {
  func.func @music_encoder_kernel(%arg0: memref<64x64xf32, #tpu.memory_space<vmem>>, %arg1: memref<8x32xf32, #tpu.memory_space<vmem>>, %arg2: memref<64x1024xbf16, #tpu.memory_space<vmem>>, %arg3: memref<1x1024xf32, #tpu.memory_space<vmem>>, %arg4: memref<256x1024xbf16, #tpu.memory_space<vmem>>, %arg5: memref<256x128xf32, #tpu.memory_space<vmem>>, %arg6: memref<128x64xf32, #tpu.memory_space<vmem>>, %arg7: memref<1x64xf32, #tpu.memory_space<vmem>>, %arg8: memref<8x32xf32, #tpu.memory_space<vmem>>, %arg9: memref<8x32xf32, #tpu.memory_space<vmem>>, %arg10: memref<8x32xf32, #tpu.memory_space<vmem>>, %arg11: memref<64x1024xf32, #tpu.memory_space<vmem>>) attributes {dimension_semantics = [], scalar_prefetch = 0 : i64, scratch_operands = 1 : i64, tpu.core_type = #tpu.core_type<tc>} {
    %c0 = arith.constant 0 : index
    %c0_0 = arith.constant 0 : index
    %0 = vector.load %arg0[%c0, %c0_0] : memref<64x64xf32, #tpu.memory_space<vmem>>, vector<64x64xf32>
    %1 = arith.truncf %0 : vector<64x64xf32> to vector<64x64xbf16>
    %c0_1 = arith.constant 0 : index
    %c0_2 = arith.constant 0 : index
    %2 = vector.load %arg2[%c0_1, %c0_2] : memref<64x1024xbf16, #tpu.memory_space<vmem>>, vector<64x1024xbf16>
    %cst = arith.constant dense<0.000000e+00> : vector<64x1024xf32>
    %3 = tpu.matmul %1, %2, %cst {dimension_numbers = #tpu.dot_dimension_numbers<[1], [0], [0], [1], [0, 0, 1, 1], [], []>} : vector<64x64xbf16>, vector<64x1024xbf16>, vector<64x1024xf32> -> vector<64x1024xf32>
    %c0_3 = arith.constant 0 : index
    %c0_4 = arith.constant 0 : index
    %4 = vector.load %arg3[%c0_3, %c0_4] : memref<1x1024xf32, #tpu.memory_space<vmem>>, vector<1x1024xf32>
    %5 = vector.broadcast %4 : vector<1x1024xf32> to vector<64x1024xf32>
    %6 = arith.addf %3, %5 : vector<64x1024xf32>
    %c0_5 = arith.constant 0 : index
    %c0_6 = arith.constant 0 : index
    %7 = vector.load %arg11[%c0_5, %c0_6] : memref<64x1024xf32, #tpu.memory_space<vmem>>, vector<64x1024xf32>
    tpu.vector_store %arg11[%c0_5, %c0_6], %6 {strides = array<i32>} : memref<64x1024xf32, #tpu.memory_space<vmem>>, vector<64x1024xf32>,
    %c0_7 = arith.constant 0 : index
    %c0_8 = arith.constant 0 : index
    %8 = vector.load %arg4[%c0_7, %c0_8] : memref<256x1024xbf16, #tpu.memory_space<vmem>>, vector<256x1024xbf16>
    %cst_9 = arith.constant 0.000000e+00 : f32
    %9 = vector.broadcast %cst_9 : f32 to vector<8x256xf32>
    %cst_10 = arith.constant 0.000000e+00 : f32
    %10 = vector.broadcast %cst_10 : f32 to vector<8x256xf32>
    %c0_11 = arith.constant 0 : index
    %c0_12 = arith.constant 0 : index
    %11 = vector.load %arg11[%c0_11, %c0_12] : memref<64x1024xf32, #tpu.memory_space<vmem>>, vector<8x1024xf32>
    %12 = arith.truncf %10 : vector<8x256xf32> to vector<8x256xbf16>
    %cst_13 = arith.constant dense<0.000000e+00> : vector<8x1024xf32>
    %13 = tpu.matmul %12, %8, %cst_13 {dimension_numbers = #tpu.dot_dimension_numbers<[1], [0], [0], [1], [0, 0, 1, 1], [], []>} : vector<8x256xbf16>, vector<256x1024xbf16>, vector<8x1024xf32> -> vector<8x1024xf32>
    %14 = arith.addf %11, %13 : vector<8x1024xf32>
    %15 = vector.extract_strided_slice %14 {offsets = [0, 0], sizes = [8, 768], strides = [1, 1]} : vector<8x1024xf32> to vector<8x768xf32>
    %16 = arith.negf %15 : vector<8x768xf32>
    %17 = math.exp %16 : vector<8x768xf32>
    %cst_14 = arith.constant 1.000000e+00 : f32
    %18 = vector.broadcast %cst_14 : f32 to vector<8x768xf32>
    %19 = arith.addf %18, %17 : vector<8x768xf32>
    %20 = arith.divf %18, %19 : vector<8x768xf32>
    %21 = vector.extract_strided_slice %14 {offsets = [0, 768], sizes = [8, 256], strides = [1, 1]} : vector<8x1024xf32> to vector<8x256xf32>
    %22 = math.tanh %21 : vector<8x256xf32>
    %23 = vector.extract_strided_slice %20 {offsets = [0, 0], sizes = [8, 256], strides = [1, 1]} : vector<8x768xf32> to vector<8x256xf32>
    %24 = vector.extract_strided_slice %20 {offsets = [0, 256], sizes = [8, 256], strides = [1, 1]} : vector<8x768xf32> to vector<8x256xf32>
    %25 = vector.extract_strided_slice %20 {offsets = [0, 512], sizes = [8, 256], strides = [1, 1]} : vector<8x768xf32> to vector<8x256xf32>
    %26 = arith.mulf %24, %9 : vector<8x256xf32>
    %27 = arith.mulf %23, %22 : vector<8x256xf32>
    %28 = arith.addf %26, %27 : vector<8x256xf32>
    %29 = math.tanh %28 : vector<8x256xf32>
    %30 = arith.mulf %25, %29 : vector<8x256xf32>
    %c8 = arith.constant 8 : index
    %c0_15 = arith.constant 0 : index
    %31 = vector.load %arg11[%c8, %c0_15] : memref<64x1024xf32, #tpu.memory_space<vmem>>, vector<8x1024xf32>
    %32 = arith.truncf %30 : vector<8x256xf32> to vector<8x256xbf16>
    %cst_16 = arith.constant dense<0.000000e+00> : vector<8x1024xf32>
    %33 = tpu.matmul %32, %8, %cst_16 {dimension_numbers = #tpu.dot_dimension_numbers<[1], [0], [0], [1], [0, 0, 1, 1], [], []>} : vector<8x256xbf16>, vector<256x1024xbf16>, vector<8x1024xf32> -> vector<8x1024xf32>
    %34 = arith.addf %31, %33 : vector<8x1024xf32>
    %35 = vector.extract_strided_slice %34 {offsets = [0, 0], sizes = [8, 768], strides = [1, 1]} : vector<8x1024xf32> to vector<8x768xf32>
    %36 = arith.negf %35 : vector<8x768xf32>
    %37 = math.exp %36 : vector<8x768xf32>
    %cst_17 = arith.constant 1.000000e+00 : f32
    %38 = vector.broadcast %cst_17 : f32 to vector<8x768xf32>
    %39 = arith.addf %38, %37 : vector<8x768xf32>
    %40 = arith.divf %38, %39 : vector<8x768xf32>
    %41 = vector.extract_strided_slice %34 {offsets = [0, 768], sizes = [8, 256], strides = [1, 1]} : vector<8x1024xf32> to vector<8x256xf32>
    %42 = math.tanh %41 : vector<8x256xf32>
    %43 = vector.extract_strided_slice %40 {offsets = [0, 0], sizes = [8, 256], strides = [1, 1]} : vector<8x768xf32> to vector<8x256xf32>
    %44 = vector.extract_strided_slice %40 {offsets = [0, 256], sizes = [8, 256], strides = [1, 1]} : vector<8x768xf32> to vector<8x256xf32>
    %45 = vector.extract_strided_slice %40 {offsets = [0, 512], sizes = [8, 256], strides = [1, 1]} : vector<8x768xf32> to vector<8x256xf32>
    %46 = arith.mulf %44, %28 : vector<8x256xf32>
    %47 = arith.mulf %43, %42 : vector<8x256xf32>
    %48 = arith.addf %46, %47 : vector<8x256xf32>
    %49 = math.tanh %48 : vector<8x256xf32>
    %50 = arith.mulf %45, %49 : vector<8x256xf32>
    %c16 = arith.constant 16 : index
    %c0_18 = arith.constant 0 : index
    %51 = vector.load %arg11[%c16, %c0_18] : memref<64x1024xf32, #tpu.memory_space<vmem>>, vector<8x1024xf32>
    %52 = arith.truncf %50 : vector<8x256xf32> to vector<8x256xbf16>
    %cst_19 = arith.constant dense<0.000000e+00> : vector<8x1024xf32>
    %53 = tpu.matmul %52, %8, %cst_19 {dimension_numbers = #tpu.dot_dimension_numbers<[1], [0], [0], [1], [0, 0, 1, 1], [], []>} : vector<8x256xbf16>, vector<256x1024xbf16>, vector<8x1024xf32> -> vector<8x1024xf32>
    %54 = arith.addf %51, %53 : vector<8x1024xf32>
    %55 = vector.extract_strided_slice %54 {offsets = [0, 0], sizes = [8, 768], strides = [1, 1]} : vector<8x1024xf32> to vector<8x768xf32>
    %56 = arith.negf %55 : vector<8x768xf32>
    %57 = math.exp %56 : vector<8x768xf32>
    %cst_20 = arith.constant 1.000000e+00 : f32
    %58 = vector.broadcast %cst_20 : f32 to vector<8x768xf32>
    %59 = arith.addf %58, %57 : vector<8x768xf32>
    %60 = arith.divf %58, %59 : vector<8x768xf32>
    %61 = vector.extract_strided_slice %54 {offsets = [0, 768], sizes = [8, 256], strides = [1, 1]} : vector<8x1024xf32> to vector<8x256xf32>
    %62 = math.tanh %61 : vector<8x256xf32>
    %63 = vector.extract_strided_slice %60 {offsets = [0, 0], sizes = [8, 256], strides = [1, 1]} : vector<8x768xf32> to vector<8x256xf32>
    %64 = vector.extract_strided_slice %60 {offsets = [0, 256], sizes = [8, 256], strides = [1, 1]} : vector<8x768xf32> to vector<8x256xf32>
    %65 = vector.extract_strided_slice %60 {offsets = [0, 512], sizes = [8, 256], strides = [1, 1]} : vector<8x768xf32> to vector<8x256xf32>
    %66 = arith.mulf %64, %48 : vector<8x256xf32>
    %67 = arith.mulf %63, %62 : vector<8x256xf32>
    %68 = arith.addf %66, %67 : vector<8x256xf32>
    %69 = math.tanh %68 : vector<8x256xf32>
    %70 = arith.mulf %65, %69 : vector<8x256xf32>
    %c24 = arith.constant 24 : index
    %c0_21 = arith.constant 0 : index
    %71 = vector.load %arg11[%c24, %c0_21] : memref<64x1024xf32, #tpu.memory_space<vmem>>, vector<8x1024xf32>
    %72 = arith.truncf %70 : vector<8x256xf32> to vector<8x256xbf16>
    %cst_22 = arith.constant dense<0.000000e+00> : vector<8x1024xf32>
    %73 = tpu.matmul %72, %8, %cst_22 {dimension_numbers = #tpu.dot_dimension_numbers<[1], [0], [0], [1], [0, 0, 1, 1], [], []>} : vector<8x256xbf16>, vector<256x1024xbf16>, vector<8x1024xf32> -> vector<8x1024xf32>
    %74 = arith.addf %71, %73 : vector<8x1024xf32>
    %75 = vector.extract_strided_slice %74 {offsets = [0, 0], sizes = [8, 768], strides = [1, 1]} : vector<8x1024xf32> to vector<8x768xf32>
    %76 = arith.negf %75 : vector<8x768xf32>
    %77 = math.exp %76 : vector<8x768xf32>
    %cst_23 = arith.constant 1.000000e+00 : f32
    %78 = vector.broadcast %cst_23 : f32 to vector<8x768xf32>
    %79 = arith.addf %78, %77 : vector<8x768xf32>
    %80 = arith.divf %78, %79 : vector<8x768xf32>
    %81 = vector.extract_strided_slice %74 {offsets = [0, 768], sizes = [8, 256], strides = [1, 1]} : vector<8x1024xf32> to vector<8x256xf32>
    %82 = math.tanh %81 : vector<8x256xf32>
    %83 = vector.extract_strided_slice %80 {offsets = [0, 0], sizes = [8, 256], strides = [1, 1]} : vector<8x768xf32> to vector<8x256xf32>
    %84 = vector.extract_strided_slice %80 {offsets = [0, 256], sizes = [8, 256], strides = [1, 1]} : vector<8x768xf32> to vector<8x256xf32>
    %85 = vector.extract_strided_slice %80 {offsets = [0, 512], sizes = [8, 256], strides = [1, 1]} : vector<8x768xf32> to vector<8x256xf32>
    %86 = arith.mulf %84, %68 : vector<8x256xf32>
    %87 = arith.mulf %83, %82 : vector<8x256xf32>
    %88 = arith.addf %86, %87 : vector<8x256xf32>
    %89 = math.tanh %88 : vector<8x256xf32>
    %90 = arith.mulf %85, %89 : vector<8x256xf32>
    %c32 = arith.constant 32 : index
    %c0_24 = arith.constant 0 : index
    %91 = vector.load %arg11[%c32, %c0_24] : memref<64x1024xf32, #tpu.memory_space<vmem>>, vector<8x1024xf32>
    %92 = arith.truncf %90 : vector<8x256xf32> to vector<8x256xbf16>
    %cst_25 = arith.constant dense<0.000000e+00> : vector<8x1024xf32>
    %93 = tpu.matmul %92, %8, %cst_25 {dimension_numbers = #tpu.dot_dimension_numbers<[1], [0], [0], [1], [0, 0, 1, 1], [], []>} : vector<8x256xbf16>, vector<256x1024xbf16>, vector<8x1024xf32> -> vector<8x1024xf32>
    %94 = arith.addf %91, %93 : vector<8x1024xf32>
    %95 = vector.extract_strided_slice %94 {offsets = [0, 0], sizes = [8, 768], strides = [1, 1]} : vector<8x1024xf32> to vector<8x768xf32>
    %96 = arith.negf %95 : vector<8x768xf32>
    %97 = math.exp %96 : vector<8x768xf32>
    %cst_26 = arith.constant 1.000000e+00 : f32
    %98 = vector.broadcast %cst_26 : f32 to vector<8x768xf32>
    %99 = arith.addf %98, %97 : vector<8x768xf32>
    %100 = arith.divf %98, %99 : vector<8x768xf32>
    %101 = vector.extract_strided_slice %94 {offsets = [0, 768], sizes = [8, 256], strides = [1, 1]} : vector<8x1024xf32> to vector<8x256xf32>
    %102 = math.tanh %101 : vector<8x256xf32>
    %103 = vector.extract_strided_slice %100 {offsets = [0, 0], sizes = [8, 256], strides = [1, 1]} : vector<8x768xf32> to vector<8x256xf32>
    %104 = vector.extract_strided_slice %100 {offsets = [0, 256], sizes = [8, 256], strides = [1, 1]} : vector<8x768xf32> to vector<8x256xf32>
    %105 = vector.extract_strided_slice %100 {offsets = [0, 512], sizes = [8, 256], strides = [1, 1]} : vector<8x768xf32> to vector<8x256xf32>
    %106 = arith.mulf %104, %88 : vector<8x256xf32>
    %107 = arith.mulf %103, %102 : vector<8x256xf32>
    %108 = arith.addf %106, %107 : vector<8x256xf32>
    %109 = math.tanh %108 : vector<8x256xf32>
    %110 = arith.mulf %105, %109 : vector<8x256xf32>
    %c40 = arith.constant 40 : index
    %c0_27 = arith.constant 0 : index
    %111 = vector.load %arg11[%c40, %c0_27] : memref<64x1024xf32, #tpu.memory_space<vmem>>, vector<8x1024xf32>
    %112 = arith.truncf %110 : vector<8x256xf32> to vector<8x256xbf16>
    %cst_28 = arith.constant dense<0.000000e+00> : vector<8x1024xf32>
    %113 = tpu.matmul %112, %8, %cst_28 {dimension_numbers = #tpu.dot_dimension_numbers<[1], [0], [0], [1], [0, 0, 1, 1], [], []>} : vector<8x256xbf16>, vector<256x1024xbf16>, vector<8x1024xf32> -> vector<8x1024xf32>
    %114 = arith.addf %111, %113 : vector<8x1024xf32>
    %115 = vector.extract_strided_slice %114 {offsets = [0, 0], sizes = [8, 768], strides = [1, 1]} : vector<8x1024xf32> to vector<8x768xf32>
    %116 = arith.negf %115 : vector<8x768xf32>
    %117 = math.exp %116 : vector<8x768xf32>
    %cst_29 = arith.constant 1.000000e+00 : f32
    %118 = vector.broadcast %cst_29 : f32 to vector<8x768xf32>
    %119 = arith.addf %118, %117 : vector<8x768xf32>
    %120 = arith.divf %118, %119 : vector<8x768xf32>
    %121 = vector.extract_strided_slice %114 {offsets = [0, 768], sizes = [8, 256], strides = [1, 1]} : vector<8x1024xf32> to vector<8x256xf32>
    %122 = math.tanh %121 : vector<8x256xf32>
    %123 = vector.extract_strided_slice %120 {offsets = [0, 0], sizes = [8, 256], strides = [1, 1]} : vector<8x768xf32> to vector<8x256xf32>
    %124 = vector.extract_strided_slice %120 {offsets = [0, 256], sizes = [8, 256], strides = [1, 1]} : vector<8x768xf32> to vector<8x256xf32>
    %125 = vector.extract_strided_slice %120 {offsets = [0, 512], sizes = [8, 256], strides = [1, 1]} : vector<8x768xf32> to vector<8x256xf32>
    %126 = arith.mulf %124, %108 : vector<8x256xf32>
    %127 = arith.mulf %123, %122 : vector<8x256xf32>
    %128 = arith.addf %126, %127 : vector<8x256xf32>
    %129 = math.tanh %128 : vector<8x256xf32>
    %130 = arith.mulf %125, %129 : vector<8x256xf32>
    %c48 = arith.constant 48 : index
    %c0_30 = arith.constant 0 : index
    %131 = vector.load %arg11[%c48, %c0_30] : memref<64x1024xf32, #tpu.memory_space<vmem>>, vector<8x1024xf32>
    %132 = arith.truncf %130 : vector<8x256xf32> to vector<8x256xbf16>
    %cst_31 = arith.constant dense<0.000000e+00> : vector<8x1024xf32>
    %133 = tpu.matmul %132, %8, %cst_31 {dimension_numbers = #tpu.dot_dimension_numbers<[1], [0], [0], [1], [0, 0, 1, 1], [], []>} : vector<8x256xbf16>, vector<256x1024xbf16>, vector<8x1024xf32> -> vector<8x1024xf32>
    %134 = arith.addf %131, %133 : vector<8x1024xf32>
    %135 = vector.extract_strided_slice %134 {offsets = [0, 0], sizes = [8, 768], strides = [1, 1]} : vector<8x1024xf32> to vector<8x768xf32>
    %136 = arith.negf %135 : vector<8x768xf32>
    %137 = math.exp %136 : vector<8x768xf32>
    %cst_32 = arith.constant 1.000000e+00 : f32
    %138 = vector.broadcast %cst_32 : f32 to vector<8x768xf32>
    %139 = arith.addf %138, %137 : vector<8x768xf32>
    %140 = arith.divf %138, %139 : vector<8x768xf32>
    %141 = vector.extract_strided_slice %134 {offsets = [0, 768], sizes = [8, 256], strides = [1, 1]} : vector<8x1024xf32> to vector<8x256xf32>
    %142 = math.tanh %141 : vector<8x256xf32>
    %143 = vector.extract_strided_slice %140 {offsets = [0, 0], sizes = [8, 256], strides = [1, 1]} : vector<8x768xf32> to vector<8x256xf32>
    %144 = vector.extract_strided_slice %140 {offsets = [0, 256], sizes = [8, 256], strides = [1, 1]} : vector<8x768xf32> to vector<8x256xf32>
    %145 = vector.extract_strided_slice %140 {offsets = [0, 512], sizes = [8, 256], strides = [1, 1]} : vector<8x768xf32> to vector<8x256xf32>
    %146 = arith.mulf %144, %128 : vector<8x256xf32>
    %147 = arith.mulf %143, %142 : vector<8x256xf32>
    %148 = arith.addf %146, %147 : vector<8x256xf32>
    %149 = math.tanh %148 : vector<8x256xf32>
    %150 = arith.mulf %145, %149 : vector<8x256xf32>
    %c56 = arith.constant 56 : index
    %c0_33 = arith.constant 0 : index
    %151 = vector.load %arg11[%c56, %c0_33] : memref<64x1024xf32, #tpu.memory_space<vmem>>, vector<8x1024xf32>
    %152 = arith.truncf %150 : vector<8x256xf32> to vector<8x256xbf16>
    %cst_34 = arith.constant dense<0.000000e+00> : vector<8x1024xf32>
    %153 = tpu.matmul %152, %8, %cst_34 {dimension_numbers = #tpu.dot_dimension_numbers<[1], [0], [0], [1], [0, 0, 1, 1], [], []>} : vector<8x256xbf16>, vector<256x1024xbf16>, vector<8x1024xf32> -> vector<8x1024xf32>
    %154 = arith.addf %151, %153 : vector<8x1024xf32>
    %155 = vector.extract_strided_slice %154 {offsets = [0, 0], sizes = [8, 768], strides = [1, 1]} : vector<8x1024xf32> to vector<8x768xf32>
    %156 = arith.negf %155 : vector<8x768xf32>
    %157 = math.exp %156 : vector<8x768xf32>
    %cst_35 = arith.constant 1.000000e+00 : f32
    %158 = vector.broadcast %cst_35 : f32 to vector<8x768xf32>
    %159 = arith.addf %158, %157 : vector<8x768xf32>
    %160 = arith.divf %158, %159 : vector<8x768xf32>
    %161 = vector.extract_strided_slice %154 {offsets = [0, 768], sizes = [8, 256], strides = [1, 1]} : vector<8x1024xf32> to vector<8x256xf32>
    %162 = math.tanh %161 : vector<8x256xf32>
    %163 = vector.extract_strided_slice %160 {offsets = [0, 0], sizes = [8, 256], strides = [1, 1]} : vector<8x768xf32> to vector<8x256xf32>
    %164 = vector.extract_strided_slice %160 {offsets = [0, 256], sizes = [8, 256], strides = [1, 1]} : vector<8x768xf32> to vector<8x256xf32>
    %165 = vector.extract_strided_slice %160 {offsets = [0, 512], sizes = [8, 256], strides = [1, 1]} : vector<8x768xf32> to vector<8x256xf32>
    %166 = arith.mulf %164, %148 : vector<8x256xf32>
    %167 = arith.mulf %163, %162 : vector<8x256xf32>
    %168 = arith.addf %166, %167 : vector<8x256xf32>
    %169 = math.tanh %168 : vector<8x256xf32>
    %170 = arith.mulf %165, %169 : vector<8x256xf32>
    %c0_36 = arith.constant 0 : index
    %c0_37 = arith.constant 0 : index
    %171 = vector.load %arg5[%c0_36, %c0_37] : memref<256x128xf32, #tpu.memory_space<vmem>>, vector<256x128xf32>
    %cst_38 = arith.constant dense<0.000000e+00> : vector<8x128xf32>
    %172 = tpu.matmul %170, %171, %cst_38 {dimension_numbers = #tpu.dot_dimension_numbers<[1], [0], [0], [1], [0, 0, 1, 1], [], []>} : vector<8x256xf32>, vector<256x128xf32>, vector<8x128xf32> -> vector<8x128xf32>
    %c0_39 = arith.constant 0 : index
    %c0_40 = arith.constant 0 : index
    %173 = vector.load %arg6[%c0_39, %c0_40] : memref<128x64xf32, #tpu.memory_space<vmem>>, vector<128x64xf32>
    %cst_41 = arith.constant dense<0.000000e+00> : vector<8x64xf32>
    %174 = tpu.matmul %172, %173, %cst_41 {dimension_numbers = #tpu.dot_dimension_numbers<[1], [0], [0], [1], [0, 0, 1, 1], [], []>} : vector<8x128xf32>, vector<128x64xf32>, vector<8x64xf32> -> vector<8x64xf32>
    %c0_42 = arith.constant 0 : index
    %c0_43 = arith.constant 0 : index
    %175 = vector.load %arg7[%c0_42, %c0_43] : memref<1x64xf32, #tpu.memory_space<vmem>>, vector<1x64xf32>
    %176 = vector.broadcast %175 : vector<1x64xf32> to vector<8x64xf32>
    %177 = arith.addf %174, %176 : vector<8x64xf32>
    %178 = vector.extract_strided_slice %177 {offsets = [0, 0], sizes = [8, 32], strides = [1, 1]} : vector<8x64xf32> to vector<8x32xf32>
    %179 = vector.extract_strided_slice %177 {offsets = [0, 32], sizes = [8, 32], strides = [1, 1]} : vector<8x64xf32> to vector<8x32xf32>
    %cst_44 = arith.constant dense<0.000000e+00> : vector<8xf32>
    %180 = vector.multi_reduction <add>, %178, %cst_44 [1] : vector<8x32xf32> to vector<8xf32>
    %181 = vector.shape_cast %180 : vector<8xf32> to vector<8x1xf32>
    %cst_45 = arith.constant 3.200000e+01 : f32
    %182 = vector.broadcast %cst_45 : f32 to vector<8x1xf32>
    %183 = arith.divf %181, %182 : vector<8x1xf32>
    %184 = vector.broadcast %183 : vector<8x1xf32> to vector<8x32xf32>
    %185 = arith.subf %178, %184 : vector<8x32xf32>
    %186 = arith.mulf %185, %185 : vector<8x32xf32>
    %cst_46 = arith.constant dense<0.000000e+00> : vector<8xf32>
    %187 = vector.multi_reduction <add>, %186, %cst_46 [1] : vector<8x32xf32> to vector<8xf32>
    %188 = vector.shape_cast %187 : vector<8xf32> to vector<8x1xf32>
    %cst_47 = arith.constant 3.200000e+01 : f32
    %189 = vector.broadcast %cst_47 : f32 to vector<8x1xf32>
    %190 = arith.divf %188, %189 : vector<8x1xf32>
    %191 = vector.broadcast %183 : vector<8x1xf32> to vector<8x32xf32>
    %192 = arith.subf %178, %191 : vector<8x32xf32>
    %cst_48 = arith.constant 9.99999974E-6 : f32
    %193 = vector.broadcast %cst_48 : f32 to vector<8x1xf32>
    %194 = arith.addf %190, %193 : vector<8x1xf32>
    %195 = math.rsqrt %194 : vector<8x1xf32>
    %196 = vector.broadcast %195 : vector<8x1xf32> to vector<8x32xf32>
    %197 = arith.mulf %192, %196 : vector<8x32xf32>
    %cst_49 = arith.constant 0.000000e+00 : f32
    %198 = vector.broadcast %cst_49 : f32 to vector<8x32xf32>
    %199 = arith.maximumf %179, %198 : vector<8x32xf32>
    %200 = math.absf %179 : vector<8x32xf32>
    %cst_50 = arith.constant 0.000000e+00 : f32
    %201 = vector.broadcast %cst_50 : f32 to vector<8x32xf32>
    %202 = arith.subf %201, %200 : vector<8x32xf32>
    %203 = math.exp %202 : vector<8x32xf32>
    %cst_51 = arith.constant 1.000000e+00 : f32
    %204 = vector.broadcast %cst_51 : f32 to vector<8x32xf32>
    %205 = arith.addf %204, %203 : vector<8x32xf32>
    %206 = math.log %205 : vector<8x32xf32>
    %207 = arith.addf %199, %206 : vector<8x32xf32>
    %cst_52 = arith.constant 2.000000e+00 : f32
    %208 = vector.broadcast %cst_52 : f32 to vector<8x32xf32>
    %209 = arith.mulf %207, %208 : vector<8x32xf32>
    %210 = math.exp %209 : vector<8x32xf32>
    %c0_53 = arith.constant 0 : index
    %c0_54 = arith.constant 0 : index
    %211 = vector.load %arg1[%c0_53, %c0_54] : memref<8x32xf32, #tpu.memory_space<vmem>>, vector<8x32xf32>
    %212 = arith.mulf %211, %210 : vector<8x32xf32>
    %213 = arith.addf %197, %212 : vector<8x32xf32>
    %c0_55 = arith.constant 0 : index
    %c0_56 = arith.constant 0 : index
    %214 = vector.load %arg8[%c0_55, %c0_56] : memref<8x32xf32, #tpu.memory_space<vmem>>, vector<8x32xf32>
    tpu.vector_store %arg8[%c0_55, %c0_56], %213 {strides = array<i32>} : memref<8x32xf32, #tpu.memory_space<vmem>>, vector<8x32xf32>,
    %c0_57 = arith.constant 0 : index
    %c0_58 = arith.constant 0 : index
    %215 = vector.load %arg9[%c0_57, %c0_58] : memref<8x32xf32, #tpu.memory_space<vmem>>, vector<8x32xf32>
    tpu.vector_store %arg9[%c0_57, %c0_58], %197 {strides = array<i32>} : memref<8x32xf32, #tpu.memory_space<vmem>>, vector<8x32xf32>,
    %c0_59 = arith.constant 0 : index
    %c0_60 = arith.constant 0 : index
    %216 = vector.load %arg10[%c0_59, %c0_60] : memref<8x32xf32, #tpu.memory_space<vmem>>, vector<8x32xf32>
    tpu.vector_store %arg10[%c0_59, %c0_60], %207 {strides = array<i32>} : memref<8x32xf32, #tpu.memory_space<vmem>>, vector<8x32xf32>,
    return
  }
}

</mosaic_0001>

<bundles_post_ra>
// kernel: tpu_custom_call.1
= control target key start
LH: loop header
LB: loop body
LE: loop exit
PB: predicated region body
PF: predicated region fallthrough
CT: control target
= control target key end

     0   :  { %16 = vsyncpa [#allocation4], 0  ;;  %s6218_s0 = inlined_call_operand.vmem [shape: f32[64,64], index: 0, kind: input, shape index: {}]   ;;  %s6219_s1 = inlined_call_operand.vmem [shape: f32[8,32], index: 1, kind: input, shape index: {}]   ;;  %s6220_s2 = inlined_call_operand.hbm [shape: bf16[64,1024], index: 2, kind: input, shape index: {}]   ;;  %s6221_s3 = inlined_call_operand.vmem [shape: f32[1,1024], index: 3, kind: input, shape index: {}]   ;;  %s6222_s4 = inlined_call_operand.hbm [shape: bf16[256,1024], index: 4, kind: input, shape index: {}]   ;;  %s6223_s5 = inlined_call_operand.hbm [shape: f32[256,128], index: 5, kind: input, shape index: {}]   ;;  %s6224_s6 = inlined_call_operand.vmem [shape: f32[128,64], index: 6, kind: input, shape index: {}]   ;;  %s6225_s7 = inlined_call_operand.vmem [shape: f32[1,64], index: 7, kind: input, shape index: {}]   ;;  %s6226_s8 = inlined_call_operand.hbm [shape: f32[8,32], index: 8, kind: output, shape index: {0}]   ;;  %s6227_s9 = inlined_call_operand.hbm [shape: f32[8,32], index: 9, kind: output, shape index: {1}]   ;;  %s6228_s10 = inlined_call_operand.hbm [shape: f32[8,32], index: 10, kind: output, shape index: {2}]  }
   0x1   :  { %17 = vsyncpa [#allocation7], 0 }
   0x2   :  { %18 = vsyncpa [#allocation5], 0 }
   0x3   :  { %19 = vsyncpa [#allocation11], 0  ;;  %s4294_s13 = smov [#allocation6]   ;;  %s4295_s15 = smov [#allocation3]  }
   0x4   :  { %s43_s14 = sshll.u32 %s4294_s13, 4  ;;  %s29_s16 = sshll.u32 %s4295_s15, 4  ;;  %s44_s14 = int_to_ptr.vmem [resolvable:$true] %s43_s14  ;;  %s30_s16 = int_to_ptr.vmem [resolvable:$true] %s29_s16 }
   0x5   :  { %s4174_s17 = scalar_lea.vmem %s44_s14, 16384  ;;  %p4179_p1 = scmp.lt.s32.totalorder %s44_s14, %s44_s14 }
   0x6   :  { %p4175_p0 = scmp.ne.s32.totalorder %s44_s14, %s4174_s17  ;;  %p4180_p2 = scmp.lt.s32.totalorder %s4174_s17, %s4174_s17 }
   0x8   :  { %p4181_p3 = por %p4180_p2, %p4179_p1 }
   0xa   :  { %p4182_p4 = pnand %p4181_p3, %p4175_p0 }
   0xc   :  { %4185 = shalt.err (!%p4182_p4)
}
   0xd   :  { %s4296_s18 = smov 512   ;;  %s4297_s19 = smov 32  }
   0xe   :  { %49 = dma.hbm_to_vmem [thread:$0]  %s6222_s4, 16384, %s44_s14, [#allocation7], %s4296_s18, %s4296_s18, %s4297_s19  }
   0xf   :  { %s4194_s22 = scalar_lea.vmem %s30_s16, 4096  ;;  %p4199_p6 = scmp.lt.s32.totalorder %s30_s16, %s30_s16 }
  0x10   :  { %p4195_p5 = scmp.ne.s32.totalorder %s30_s16, %s4194_s22  ;;  %p4200_p7 = scmp.lt.s32.totalorder %s4194_s22, %s4194_s22 }
  0x12   :  { %p4201_p8 = por %p4200_p7, %p4199_p6 }
  0x14   :  { %p4202_p9 = pnand %p4201_p8, %p4195_p5 }
  0x16   :  { %4205 = shalt.err (!%p4202_p9)
}
  0x17   :  { %35 = dma.hbm_to_vmem [thread:$0]  %s6220_s2, 4096, %s30_s16, [#allocation4], %s4296_s18, %s4296_s18, %s4297_s19  }
  0x18   :  { %s4298_s25 = smov [#allocation8]  }
  0x19   :  { %s55_s26 = sshll.u32 %s4298_s25, 4  ;;  %s56_s26 = int_to_ptr.vmem [resolvable:$true] %s55_s26 }
  0x1a   :  { %s4214_s27 = scalar_lea.vmem %s56_s26, 4096  ;;  %p4219_p11 = scmp.lt.s32.totalorder %s56_s26, %s56_s26 }
  0x1b   :  { %p4215_p10 = scmp.ne.s32.totalorder %s56_s26, %s4214_s27  ;;  %p4220_p12 = scmp.lt.s32.totalorder %s4214_s27, %s4214_s27 }
  0x1d   :  { %p4221_p13 = por %p4220_p12, %p4219_p11 }
  0x1f   :  { %p4222_p0 = pnand %p4221_p13, %p4215_p10 }
  0x21   :  { %4225 = shalt.err (!%p4222_p0)
}
  0x22   :  { %s4299_s4 = smov 128   ;;  %s4300_s28 = smov 8  }
  0x23   :  { %61 = dma.hbm_to_vmem [thread:$0]  %s6223_s5, 4096, %s56_s26, [#allocation7], %s4299_s4, %s4299_s4, %s4300_s28  }
  0x24   :  { %4286 = dma.done.wait [#allocation4], 4096  }
  0x25   :  { %4287 = vsyncadd [#allocation4], 4294963200 }
  0x26   :  { %4288 = dma.done.wait [#allocation7], 20480  }
  0x27   :  { %4289 = vsyncadd [#allocation7], 4294946816  ;;  %v6229_v0 = vmov 0   ;;  %v112_v1 = vld [vmem:[#allocation3 + $0xc0] sm:$0xff]  ;;  %v113_v3 = vld [vmem:[#allocation3 + $0xc8] sm:$0xff]  ;;  %vm322_vm0 = vcmask 523264  }
  0x28   :  { %367 = vmatprep.mubr.bf16.mxu0 %v6229_v0  ;;  %440 = vmatprep.mubr.bf16.mxu1 %v6229_v0  ;;  %v116_v2 = vld [vmem:[#allocation3 + $0xe0] sm:$0xff]  ;;  %v117_v5 = vld [vmem:[#allocation3 + $0xe8] sm:$0xff]  ;;  %v114_v31 = vld [vmem:[#allocation3 + $0xd0] sm:$0xff]  ;;  %vm4303_vm1 = vmmov 0   ;;  %vm3492_vm2 = vcmask 261120   ;;  %s4305_s12 = smov [#allocation10]  }
  0x29   :  { %v3601_v4 = vcombine.high %v112_v1, %v116_v2  ;;  %v3600_v6 = vcombine.low %v112_v1, %v116_v2  ;;  %v104_v7 = vld [vmem:[#allocation3 + $0x80] sm:$0xff]  ;;  %v3603_v9 = vcombine.high %v113_v3, %v117_v5  ;;  %v3602_v10 = vcombine.low %v113_v3, %v117_v5  ;;  %v105_v12 = vld [vmem:[#allocation3 + $0x88] sm:$0xff]  ;;  %v118_v32 = vld [vmem:[#allocation3 + $0xf0] sm:$0xff]  ;;  %s3549_s13 = sshll.u32 %s4305_s12, 4  ;;  %s4306_s14 = smov [#allocation12]   ;;  %s3550_s13 = int_to_ptr.vmem [resolvable:$true] %s3549_s13 }
  0x2a   :  { %v108_v8 = vld [vmem:[#allocation3 + $0xa0] sm:$0xff]  ;;  %v109_v13 = vld [vmem:[#allocation3 + $0xa8] sm:$0xff]  ;;  %v115_v33 = vld [vmem:[#allocation3 + $0xd8] sm:$0xff]  ;;  %v3605_v39 = vcombine.high %v114_v31, %v118_v32  ;;  %v3604_v44 = vcombine.low %v114_v31, %v118_v32  ;;  %s3559_s15 = sshll.u32 %s4306_s14, 4  ;;  %s4307_s16 = smov [#allocation9]   ;;  %s3560_s15 = int_to_ptr.vmem [resolvable:$true] %s3559_s15 }
  0x2b   :  { %v3593_v11 = vcombine.high %v104_v7, %v108_v8  ;;  %v96_v14 = vld [vmem:[#allocation3 + $0x40] sm:$0xff]  ;;  %343 = vmatprep.subr.bf16.mxu0 %v3601_v4  ;;  %v3595_v15 = vcombine.high %v105_v12, %v109_v13  ;;  %v97_v17 = vld [vmem:[#allocation3 + $0x48] sm:$0xff]  ;;  %416 = vmatprep.subr.bf16.mxu1 %v3603_v9  ;;  %v3592_v19 = vcombine.low %v104_v7, %v108_v8  ;;  %v119_v34 = vld [vmem:[#allocation3 + $0xf8] sm:$0xff]  ;;  %s3539_s17 = sshll.u32 %s4307_s16, 4  ;;  %s4226_s18 = scalar_lea.vmem %s3550_s13, 128  ;;  %s3540_s17 = int_to_ptr.vmem [resolvable:$true] %s3539_s17 }
  0x2c   :  { %v100_v16 = vld [vmem:[#allocation3 + $0x60] sm:$0xff]  ;;  %v101_v18 = vld [vmem:[#allocation3 + $0x68] sm:$0xff]  ;;  %344 = vmatpush1.bf16.msra.mxu0 %v3600_v6  ;;  %417 = vmatpush1.bf16.msra.mxu1 %v3602_v10  ;;  %v3594_v20 = vcombine.low %v105_v12, %v109_v13  ;;  %v3607_v40 = vcombine.high %v115_v33, %v119_v34  ;;  %v106_v42 = vld [vmem:[#allocation3 + $0x90] sm:$0xff]  ;;  %v3606_v47 = vcombine.low %v115_v33, %v119_v34  ;;  %p4227_p1 = scmp.ne.s32.totalorder %s3550_s13, %s4226_s18  ;;  %p4231_p2 = scmp.lt.s32.totalorder %s3550_s13, %s3550_s13 }
  0x2d   :  { %345 = vmatprep.subr.bf16.mxu0 %v3593_v11  ;;  %v3585_v21 = vcombine.high %v96_v14, %v100_v16  ;;  %418 = vmatprep.subr.bf16.mxu1 %v3595_v15  ;;  %v3587_v22 = vcombine.high %v97_v17, %v101_v18  ;;  %v88_v23 = vld [vmem:[#allocation3] sm:$0xff]  ;;  %v89_v25 = vld [vmem:[#allocation3 + $0x8] sm:$0xff]  ;;  %v3584_v27 = vcombine.low %v96_v14, %v100_v16  ;;  %v110_v43 = vld [vmem:[#allocation3 + $0xb0] sm:$0xff]  ;;  %p4232_p3 = scmp.lt.s32.totalorder %s4226_s18, %s4226_s18 }
  0x2e   :  { %v92_v24 = vld [vmem:[#allocation3 + $0x20] sm:$0xff]  ;;  %v93_v26 = vld [vmem:[#allocation3 + $0x28] sm:$0xff]  ;;  %v3586_v28 = vcombine.low %v97_v17, %v101_v18  ;;  %v107_v45 = vld [vmem:[#allocation3 + $0x98] sm:$0xff]  ;;  %v3597_v48 = vcombine.high %v106_v42, %v110_v43  ;;  %v3596_v56 = vcombine.low %v106_v42, %v110_v43 }
  0x2f   :  { %v3577_v29 = vcombine.high %v88_v23, %v92_v24  ;;  %v3579_v30 = vcombine.high %v89_v25, %v93_v26  ;;  %v3576_v35 = vcombine.low %v88_v23, %v92_v24  ;;  %v76_v36 = vld [vmem:[%s6218_s0] sm:$0xff]  ;;  %v77_v37 = vld [vmem:[%s6218_s0 + $0x8] sm:$0xff]  ;;  %v3578_v38 = vcombine.low %v89_v25, %v93_v26  ;;  %v111_v46 = vld [vmem:[#allocation3 + $0xb8] sm:$0xff]  ;;  %p4233_p4 = por %p4232_p3, %p4231_p2 }
  0x30   :  { %346 = vmatpush1.bf16.msra.mxu0 %v3592_v19  ;;  %419 = vmatpush1.bf16.msra.mxu1 %v3594_v20  ;;  %v4380_v41 = vpack.c.bf16 %v77_v37, %v76_v36  ;;  %v98_v49 = vld [vmem:[#allocation3 + $0x50] sm:$0xff]  ;;  %v3599_v51 = vcombine.high %v107_v45, %v111_v46  ;;  %v99_v52 = vld [vmem:[#allocation3 + $0x58] sm:$0xff]  ;;  %v3598_v57 = vcombine.low %v107_v45, %v111_v46  ;;  %v80_v5 = vld [vmem:[%s6218_s0 + $0x20] sm:$0xff] }
  0x31   :  { %347 = vmatprep.subr.bf16.mxu0 %v3585_v21  ;;  %420 = vmatprep.subr.bf16.mxu1 %v3587_v22  ;;  %v102_v50 = vld [vmem:[#allocation3 + $0x70] sm:$0xff]  ;;  %v103_v53 = vld [vmem:[#allocation3 + $0x78] sm:$0xff]  ;;  %v747_v7 = vld [vmem:[#allocation6 + $0x1c0] sm:$0xff]  ;;  %p4234_p5 = pnand %p4233_p4, %p4227_p1 }
  0x32   :  { %v78_v54 = vld [vmem:[%s6218_s0 + $0x10] sm:$0xff]  ;;  %v79_v55 = vld [vmem:[%s6218_s0 + $0x18] sm:$0xff]  ;;  %v3589_v58 = vcombine.high %v98_v49, %v102_v50  ;;  %v3591_v59 = vcombine.high %v99_v52, %v103_v53  ;;  %v3588_v2 = vcombine.low %v98_v49, %v102_v50  ;;  %v3590_v3 = vcombine.low %v99_v52, %v103_v53  ;;  %v751_v8 = vld [vmem:[#allocation6 + $0x1e0] sm:$0xff] }
  0x33   :  { %v4394_v60 = vpack.c.bf16 %v79_v55, %v78_v54  ;;  %v90_v61 = vld [vmem:[#allocation3 + $0x10] sm:$0xff]  ;;  %v91_v63 = vld [vmem:[#allocation3 + $0x18] sm:$0xff]  ;;  %v81_v9 = vld [vmem:[%s6218_s0 + $0x28] sm:$0xff]  ;;  %v4408_v14 = vcombine.high %v747_v7, %v751_v8  ;;  %v4436_v24 = vcombine.low %v747_v7, %v751_v8 }
  0x34   :  { %348 = vmatpush1.bf16.msra.mxu0 %v3584_v27  ;;  %421 = vmatpush1.bf16.msra.mxu1 %v3586_v28  ;;  %v94_v62 = vld [vmem:[#allocation3 + $0x30] sm:$0xff]  ;;  %v95_v1 = vld [vmem:[#allocation3 + $0x38] sm:$0xff]  ;;  %v748_v10 = vld [vmem:[#allocation6 + $0x1c8] sm:$0xff]  ;;  %v4410_v15 = vpack.c.bf16 %v81_v9, %v80_v5 }
  0x35   :  { %349 = vmatprep.subr.bf16.mxu0 %v3577_v29  ;;  %422 = vmatprep.subr.bf16.mxu1 %v3579_v30  ;;  %v3581_v4 = vcombine.high %v90_v61, %v94_v62  ;;  %v3583_v6 = vcombine.high %v91_v63, %v95_v1  ;;  %v752_v11 = vld [vmem:[#allocation6 + $0x1e8] sm:$0xff]  ;;  %v3580_v12 = vcombine.low %v90_v61, %v94_v62  ;;  %v82_v17 = vld [vmem:[%s6218_s0 + $0x30] sm:$0xff]  ;;  %v83_v18 = vld [vmem:[%s6218_s0 + $0x38] sm:$0xff] }
  0x36   :  { %v3582_v13 = vcombine.low %v91_v63, %v95_v1  ;;  %6495 = vst [vmem:[#allocation17_spill] sm:$0xff] %v4408_v14  ;;  %v4412_v16 = vcombine.high %v748_v10, %v752_v11  ;;  %v4428_v19 = vpack.c.bf16 %v83_v18, %v82_v17  ;;  %v739_v20 = vld [vmem:[#allocation6 + $0x180] sm:$0xff]  ;;  %v740_v22 = vld [vmem:[#allocation6 + $0x188] sm:$0xff]  ;;  %6497 = vst [vmem:[#allocation19_spill] sm:$0xff] %v4436_v24 }
  0x37   :  { %v743_v21 = vld [vmem:[#allocation6 + $0x1a0] sm:$0xff]  ;;  %v744_v23 = vld [vmem:[#allocation6 + $0x1a8] sm:$0xff]  ;;  %v4438_v25 = vcombine.low %v748_v10, %v752_v11 }
  0x38   :  { %350 = vmatpush1.bf16.msra.mxu0 %v3576_v35  ;;  %423 = vmatpush1.bf16.msra.mxu1 %v3578_v38  ;;  %6496 = vst [vmem:[#allocation18_spill] sm:$0xff] %v4412_v16  ;;  %v4440_v26 = vcombine.high %v739_v20, %v743_v21  ;;  %v4442_v27 = vcombine.high %v740_v22, %v744_v23  ;;  %v731_v28 = vld [vmem:[#allocation6 + $0x140] sm:$0xff]  ;;  %v732_v30 = vld [vmem:[#allocation6 + $0x148] sm:$0xff] }
  0x39   :  { %489 = vmatprep.subr.bf16.mxu0 %v3605_v39  ;;  %562 = vmatprep.subr.bf16.mxu1 %v3607_v40  ;;  %6498 = vst [vmem:[#allocation20_spill] sm:$0xff] %v4438_v25  ;;  %v735_v29 = vld [vmem:[#allocation6 + $0x160] sm:$0xff]  ;;  %v736_v31 = vld [vmem:[#allocation6 + $0x168] sm:$0xff]  ;;  %v4449_v32 = vcombine.low %v739_v20, %v743_v21  ;;  %v4453_v33 = vcombine.low %v740_v22, %v744_v23 }
  0x3a   :  { %6499 = vst [vmem:[#allocation21_spill] sm:$0xff] %v4440_v26  ;;  %6500 = vst [vmem:[#allocation22_spill] sm:$0xff] %v4442_v27  ;;  %v4455_v34 = vcombine.high %v731_v28, %v735_v29  ;;  %v4458_v35 = vcombine.high %v732_v30, %v736_v31  ;;  %v723_v36 = vld [vmem:[#allocation6 + $0x100] sm:$0xff]  ;;  %v724_v38 = vld [vmem:[#allocation6 + $0x108] sm:$0xff]  ;;  %v4463_v40 = vcombine.low %v731_v28, %v735_v29 }
  0x3b   :  { %3608 = vmatmul.mubr.msk.bf16.vlgmr.msra.gmra.mxu0 %vm322_vm0, %v4380_v41  ;;  %3612 = vmatmul.mubr.msk.bf16.vlgmr.msra.gmra.mxu1 %vm322_vm0, %v4380_v41  ;;  %6501 = vst [vmem:[#allocation23_spill] sm:$0xff] %v4449_v32  ;;  %6502 = vst [vmem:[#allocation24_spill] sm:$0xff] %v4453_v33  ;;  %v727_v37 = vld [vmem:[#allocation6 + $0x120] sm:$0xff]  ;;  %v728_v39 = vld [vmem:[#allocation6 + $0x128] sm:$0xff] }
  0x3c   :  { %490 = vmatpush1.bf16.msra.mxu0 %v3604_v44  ;;  %563 = vmatpush1.bf16.msra.mxu1 %v3606_v47  ;;  %6503 = vst [vmem:[#allocation25_spill] sm:$0xff] %v4455_v34  ;;  %6504 = vst [vmem:[#allocation26_spill] sm:$0xff] %v4458_v35  ;;  %v4469_v42 = vcombine.high %v723_v36, %v727_v37  ;;  %v4472_v43 = vcombine.high %v724_v38, %v728_v39  ;;  %v715_v44 = vld [vmem:[#allocation6 + $0xc0] sm:$0xff]  ;;  %v716_v46 = vld [vmem:[#allocation6 + $0xc8] sm:$0xff] }
  0x3d   :  { %377 = vmatprep.mubr.bf16.mxu0 %v6229_v0  ;;  %450 = vmatprep.mubr.bf16.mxu1 %v6229_v0  ;;  %6505 = vst [vmem:[#allocation27_spill] sm:$0xff] %v4463_v40  ;;  %v719_v45 = vld [vmem:[#allocation6 + $0xe0] sm:$0xff]  ;;  %v720_v47 = vld [vmem:[#allocation6 + $0xe8] sm:$0xff]  ;;  %v4483_v49 = vcombine.low %v724_v38, %v728_v39 }
  0x3e   :  { %491 = vmatprep.subr.bf16.mxu0 %v3597_v48  ;;  %564 = vmatprep.subr.bf16.mxu1 %v3599_v51  ;;  %6507 = vst [vmem:[#allocation29_spill] sm:$0xff] %v4469_v42  ;;  %6508 = vst [vmem:[#allocation30_spill] sm:$0xff] %v4472_v43  ;;  %v4477_v48 = vcombine.low %v723_v36, %v727_v37  ;;  %v4485_v50 = vcombine.high %v715_v44, %v719_v45  ;;  %v707_v52 = vld [vmem:[#allocation6 + $0x80] sm:$0xff]  ;;  %v708_v54 = vld [vmem:[#allocation6 + $0x88] sm:$0xff] }
  0x3f   :  { %6510 = vst [vmem:[#allocation32_spill] sm:$0xff] %v4483_v49  ;;  %v4488_v51 = vcombine.high %v716_v46, %v720_v47  ;;  %v711_v53 = vld [vmem:[#allocation6 + $0xa0] sm:$0xff]  ;;  %v712_v55 = vld [vmem:[#allocation6 + $0xa8] sm:$0xff] }
  0x40   :  { %492 = vmatpush1.bf16.msra.mxu0 %v3596_v56  ;;  %565 = vmatpush1.bf16.msra.mxu1 %v3598_v57  ;;  %6509 = vst [vmem:[#allocation31_spill] sm:$0xff] %v4477_v48  ;;  %6511 = vst [vmem:[#allocation33_spill] sm:$0xff] %v4485_v50  ;;  %v4493_v56 = vcombine.low %v715_v44, %v719_v45  ;;  %v4497_v57 = vcombine.low %v716_v46, %v720_v47  ;;  %v703_v61 = vld [vmem:[#allocation6 + $0x60] sm:$0xff]  ;;  %v700_v62 = vld [vmem:[#allocation6 + $0x48] sm:$0xff] }
  0x41   :  { %493 = vmatprep.subr.bf16.mxu0 %v3589_v58  ;;  %566 = vmatprep.subr.bf16.mxu1 %v3591_v59  ;;  %6512 = vst [vmem:[#allocation34_spill] sm:$0xff] %v4488_v51  ;;  %v4499_v58 = vcombine.high %v707_v52, %v711_v53  ;;  %v4502_v59 = vcombine.high %v708_v54, %v712_v55  ;;  %v704_v63 = vld [vmem:[#allocation6 + $0x68] sm:$0xff]  ;;  %v691_v5 = vld [vmem:[#allocation6] sm:$0xff] }
  0x42   :  { %6513 = vst [vmem:[#allocation35_spill] sm:$0xff] %v4493_v56  ;;  %6514 = vst [vmem:[#allocation36_spill] sm:$0xff] %v4497_v57  ;;  %v4507_v1 = vcombine.low %v707_v52, %v711_v53  ;;  %v692_v7 = vld [vmem:[#allocation6 + $0x8] sm:$0xff]  ;;  %v4527_v10 = vcombine.low %v700_v62, %v704_v63  ;;  %v803_v28 = vld [vmem:[#allocation6 + $0x380] sm:$0xff] }
  0x43   :  { %3609 = vmatmul.mubr.msk.bf16.gmra.mxu0 %vm322_vm0, %v4394_v60  ;;  %3613 = vmatmul.mubr.msk.bf16.gmra.mxu1 %vm322_vm0, %v4394_v60  ;;  %6515 = vst [vmem:[#allocation37_spill] sm:$0xff] %v4499_v58  ;;  %6516 = vst [vmem:[#allocation38_spill] sm:$0xff] %v4502_v59  ;;  %v696_v8 = vld [vmem:[#allocation6 + $0x28] sm:$0xff]  ;;  %v807_v29 = vld [vmem:[#allocation6 + $0x3a0] sm:$0xff] }
  0x44   :  { %387 = vmatprep.mubr.bf16.mxu0 %v6229_v0  ;;  %460 = vmatprep.mubr.bf16.mxu1 %v6229_v0  ;;  %6517 = vst [vmem:[#allocation39_spill] sm:$0xff] %v4507_v1  ;;  %6522 = vst [vmem:[#allocation44_spill] sm:$0xff] %v4527_v10  ;;  %v812_v17 = vld [vmem:[#allocation6 + $0x3c8] sm:$0xff]  ;;  %v4543_v21 = vcombine.low %v692_v7, %v696_v8  ;;  %v4559_v37 = vcombine.high %v803_v28, %v807_v29  ;;  %v795_v39 = vld [vmem:[#allocation6 + $0x340] sm:$0xff] }
  0x45   :  { %494 = vmatpush1.bf16.msra.mxu0 %v3588_v2  ;;  %567 = vmatpush1.bf16.msra.mxu1 %v3590_v3  ;;  %v4513_v2 = vcombine.low %v708_v54, %v712_v55  ;;  %v816_v18 = vld [vmem:[#allocation6 + $0x3e8] sm:$0xff]  ;;  %v799_v44 = vld [vmem:[#allocation6 + $0x360] sm:$0xff]  ;;  %v4565_v47 = vcombine.low %v803_v28, %v807_v29 }
  0x46   :  { %495 = vmatprep.subr.bf16.mxu0 %v3581_v4  ;;  %568 = vmatprep.subr.bf16.mxu1 %v3583_v6  ;;  %v4518_v4 = vcombine.high %v700_v62, %v704_v63  ;;  %v695_v6 = vld [vmem:[#allocation6 + $0x20] sm:$0xff]  ;;  %6526 = vst [vmem:[#allocation48_spill] sm:$0xff] %v4543_v21  ;;  %v4548_v23 = vcombine.high %v812_v17, %v816_v18  ;;  %6531 = vst [vmem:[#allocation53_spill] sm:$0xff] %v4559_v37  ;;  %v796_v45 = vld [vmem:[#allocation6 + $0x348] sm:$0xff] }
  0x47   :  { %6518 = vst [vmem:[#allocation40_spill] sm:$0xff] %v4513_v2  ;;  %v4529_v11 = vcombine.high %v691_v5, %v695_v6  ;;  %v4537_v20 = vcombine.low %v691_v5, %v695_v6  ;;  %v4557_v36 = vcombine.low %v812_v17, %v816_v18  ;;  %v800_v46 = vld [vmem:[#allocation6 + $0x368] sm:$0xff]  ;;  %6533 = vst [vmem:[#allocation55_spill] sm:$0xff] %v4565_v47  ;;  %v787_v55 = vld [vmem:[#allocation6 + $0x300] sm:$0xff] }
  0x48   :  { %6520 = vst [vmem:[#allocation42_spill] sm:$0xff] %v4518_v4  ;;  %6528 = vst [vmem:[#allocation50_spill] sm:$0xff] %v4548_v23  ;;  %v4571_v53 = vcombine.high %v795_v39, %v799_v44  ;;  %v4574_v54 = vcombine.high %v796_v45, %v800_v46  ;;  %v792_v62 = vld [vmem:[#allocation6 + $0x328] sm:$0xff]  ;;  %v4577_v63 = vcombine.low %v795_v39, %v799_v44  ;;  %v775_v39 = vld [vmem:[#allocation6 + $0x2a0] sm:$0xff] }
  0x49   :  { %496 = vmatpush1.bf16.msra.mxu0 %v3580_v12  ;;  %569 = vmatpush1.bf16.msra.mxu1 %v3582_v13  ;;  %6523 = vst [vmem:[#allocation45_spill] sm:$0xff] %v4529_v11  ;;  %v4532_v12 = vcombine.high %v692_v7, %v696_v8  ;;  %v811_v13 = vld [vmem:[#allocation6 + $0x3c0] sm:$0xff]  ;;  %6525 = vst [vmem:[#allocation47_spill] sm:$0xff] %v4537_v20  ;;  %v4581_v5 = vcombine.low %v796_v45, %v800_v46  ;;  %v784_v17 = vld [vmem:[#allocation6 + $0x2e8] sm:$0xff] }
  0x4a   :  { %1467 = vmatprep.subr.bf16.mxu0 %v4408_v14  ;;  %1508 = vmatprep.subr.bf16.mxu1 %v4412_v16  ;;  %6530 = vst [vmem:[#allocation52_spill] sm:$0xff] %v4557_v36  ;;  %6535 = vst [vmem:[#allocation57_spill] sm:$0xff] %v4571_v53  ;;  %v779_v8 = vld [vmem:[#allocation6 + $0x2c0] sm:$0xff]  ;;  %v772_v44 = vld [vmem:[#allocation6 + $0x288] sm:$0xff] }
  0x4b   :  { %3610 = vmatmul.mubr.msk.bf16.gmra.mxu0 %vm322_vm0, %v4410_v15  ;;  %3614 = vmatmul.mubr.msk.bf16.gmra.mxu1 %vm322_vm0, %v4410_v15  ;;  %6524 = vst [vmem:[#allocation46_spill] sm:$0xff] %v4532_v12  ;;  %6536 = vst [vmem:[#allocation58_spill] sm:$0xff] %v4574_v54  ;;  %v776_v45 = vld [vmem:[#allocation6 + $0x2a8] sm:$0xff] }
  0x4c   :  { %397 = vmatprep.mubr.bf16.mxu0 %v6229_v0  ;;  %470 = vmatprep.mubr.bf16.mxu1 %v6229_v0  ;;  %6537 = vst [vmem:[#allocation59_spill] sm:$0xff] %v4577_v63  ;;  %6538 = vst [vmem:[#allocation60_spill] sm:$0xff] %v4581_v5 }
  0x53   :  { %3611 = vmatmul.mubr.msk.bf16.gmra.mxu0 %vm322_vm0, %v4428_v19  ;;  %3615 = vmatmul.mubr.msk.bf16.gmra.mxu1 %vm322_vm0, %v4428_v19 }
  0x54   :  { %513 = vmatprep.mubr.bf16.mxu0 %v6229_v0  ;;  %586 = vmatprep.mubr.bf16.mxu1 %v6229_v0 }
  0x5b   :  { %3616 = vmatmul.mubr.msk.bf16.vlgmr.msra.gmra.mxu0 %vm322_vm0, %v4380_v41  ;;  %3620 = vmatmul.mubr.msk.bf16.vlgmr.msra.gmra.mxu1 %vm322_vm0, %v4380_v41  ;;  %v4467_v41 = vcombine.low %v732_v30, %v736_v31  ;;  %v804_v30 = vld [vmem:[#allocation6 + $0x388] sm:$0xff] }
  0x5c   :  { %1468 = vmatpush1.bf16.msra.mxu0 %v4436_v24  ;;  %1509 = vmatpush1.bf16.msra.mxu1 %v4438_v25  ;;  %v808_v31 = vld [vmem:[#allocation6 + $0x3a8] sm:$0xff] }
  0x5d   :  { %1469 = vmatprep.subr.bf16.mxu0 %v4440_v26  ;;  %1510 = vmatprep.subr.bf16.mxu1 %v4442_v27  ;;  %6506 = vst [vmem:[#allocation28_spill] sm:$0xff] %v4467_v41  ;;  %v4562_v38 = vcombine.high %v804_v30, %v808_v31  ;;  %v4569_v52 = vcombine.low %v804_v30, %v808_v31  ;;  %v771_v31 = vld [vmem:[#allocation6 + $0x280] sm:$0xff] }
  0x5e   :  { %523 = vmatprep.mubr.bf16.mxu0 %v6229_v0  ;;  %596 = vmatprep.mubr.bf16.mxu1 %v6229_v0 }
  0x5f   :  { %6532 = vst [vmem:[#allocation54_spill] sm:$0xff] %v4562_v38  ;;  %6534 = vst [vmem:[#allocation56_spill] sm:$0xff] %v4569_v52 }
  0x60   :  { %1470 = vmatpush1.bf16.msra.mxu0 %v4449_v32  ;;  %1511 = vmatpush1.bf16.msra.mxu1 %v4453_v33 }
  0x61   :  { %1471 = vmatprep.subr.bf16.mxu0 %v4455_v34  ;;  %1512 = vmatprep.subr.bf16.mxu1 %v4458_v35 }
  0x63   :  { %3617 = vmatmul.mubr.msk.bf16.gmra.mxu0 %vm322_vm0, %v4394_v60  ;;  %3621 = vmatmul.mubr.msk.bf16.gmra.mxu1 %vm322_vm0, %v4394_v60  ;;  %v699_v60 = vld [vmem:[#allocation6 + $0x40] sm:$0xff] }
  0x64   :  { %1472 = vmatpush1.bf16.msra.mxu0 %v4463_v40  ;;  %1513 = vmatpush1.bf16.msra.mxu1 %v4467_v41  ;;  %v4515_v3 = vcombine.high %v699_v60, %v703_v61  ;;  %v4523_v9 = vcombine.low %v699_v60, %v703_v61  ;;  %v791_v60 = vld [vmem:[#allocation6 + $0x320] sm:$0xff]  ;;  %v788_v61 = vld [vmem:[#allocation6 + $0x308] sm:$0xff] }
  0x65   :  { %1473 = vmatprep.subr.bf16.mxu0 %v4469_v42  ;;  %1514 = vmatprep.subr.bf16.mxu1 %v4472_v43  ;;  %v4583_v6 = vcombine.high %v787_v55, %v791_v60  ;;  %v4586_v7 = vcombine.high %v788_v61, %v792_v62  ;;  %v4589_v18 = vcombine.low %v787_v55, %v791_v60 }
  0x66   :  { %533 = vmatprep.mubr.bf16.mxu0 %v6229_v0  ;;  %606 = vmatprep.mubr.bf16.mxu1 %v6229_v0  ;;  %6519 = vst [vmem:[#allocation41_spill] sm:$0xff] %v4515_v3  ;;  %6521 = vst [vmem:[#allocation43_spill] sm:$0xff] %v4523_v9  ;;  %v4593_v28 = vcombine.low %v788_v61, %v792_v62  ;;  %v4607_v60 = vcombine.high %v771_v31, %v775_v39  ;;  %v763_v62 = vld [vmem:[#allocation6 + $0x240] sm:$0xff] }
  0x67   :  { %6539 = vst [vmem:[#allocation61_spill] sm:$0xff] %v4583_v6  ;;  %6540 = vst [vmem:[#allocation62_spill] sm:$0xff] %v4586_v7  ;;  %v4610_v61 = vcombine.high %v772_v44, %v776_v45 }
  0x68   :  { %1474 = vmatpush1.bf16.msra.mxu0 %v4477_v48  ;;  %1515 = vmatpush1.bf16.msra.mxu1 %v4483_v49  ;;  %6541 = vst [vmem:[#allocation63_spill] sm:$0xff] %v4589_v18  ;;  %6542 = vst [vmem:[#allocation64_spill] sm:$0xff] %v4593_v28 }
  0x69   :  { %1475 = vmatprep.subr.bf16.mxu0 %v4485_v50  ;;  %1516 = vmatprep.subr.bf16.mxu1 %v4488_v51  ;;  %6547 = vst [vmem:[#allocation69_spill] sm:$0xff] %v4607_v60  ;;  %6548 = vst [vmem:[#allocation70_spill] sm:$0xff] %v4610_v61 }
  0x6b   :  { %3618 = vmatmul.mubr.msk.bf16.gmra.mxu0 %vm322_vm0, %v4410_v15  ;;  %3622 = vmatmul.mubr.msk.bf16.gmra.mxu1 %vm322_vm0, %v4410_v15  ;;  %v815_v15 = vld [vmem:[#allocation6 + $0x3e0] sm:$0xff] }
  0x6c   :  { %1476 = vmatpush1.bf16.msra.mxu0 %v4493_v56  ;;  %1517 = vmatpush1.bf16.msra.mxu1 %v4497_v57  ;;  %v4545_v22 = vcombine.high %v811_v13, %v815_v15 }
  0x6d   :  { %1477 = vmatprep.subr.bf16.mxu0 %v4499_v58  ;;  %1518 = vmatprep.subr.bf16.mxu1 %v4502_v59 }
  0x6e   :  { %543 = vmatprep.mubr.bf16.mxu0 %v6229_v0  ;;  %616 = vmatprep.mubr.bf16.mxu1 %v6229_v0  ;;  %6527 = vst [vmem:[#allocation49_spill] sm:$0xff] %v4545_v22 }
  0x70   :  { %1478 = vmatpush1.bf16.msra.mxu0 %v4507_v1  ;;  %1519 = vmatpush1.bf16.msra.mxu1 %v4513_v2 }
  0x71   :  { %1479 = vmatprep.subr.bf16.mxu0 %v4515_v3  ;;  %1520 = vmatprep.subr.bf16.mxu1 %v4518_v4 }
  0x73   :  { %3619 = vmatmul.mubr.msk.bf16.gmra.mxu0 %vm322_vm0, %v4428_v19  ;;  %3623 = vmatmul.mubr.msk.bf16.gmra.mxu1 %vm322_vm0, %v4428_v19  ;;  %v4553_v19 = vcombine.low %v811_v13, %v815_v15  ;;  %v783_v13 = vld [vmem:[#allocation6 + $0x2e0] sm:$0xff]  ;;  %v780_v15 = vld [vmem:[#allocation6 + $0x2c8] sm:$0xff] }
  0x74   :  { %1480 = vmatpush1.bf16.msra.mxu0 %v4523_v9  ;;  %1521 = vmatpush1.bf16.msra.mxu1 %v4527_v10  ;;  %v4595_v29 = vcombine.high %v779_v8, %v783_v13  ;;  %v4598_v30 = vcombine.high %v780_v15, %v784_v17  ;;  %v4601_v46 = vcombine.low %v779_v8, %v783_v13 }
  0x75   :  { %1481 = vmatprep.subr.bf16.mxu0 %v4529_v11  ;;  %1522 = vmatprep.subr.bf16.mxu1 %v4532_v12  ;;  %6529 = vst [vmem:[#allocation51_spill] sm:$0xff] %v4553_v19  ;;  %v4605_v55 = vcombine.low %v780_v15, %v784_v17  ;;  %v4613_v8 = vcombine.low %v771_v31, %v775_v39 }
  0x76   :  { %1499 = vmatprep.mubr.bf16.mxu0 %v6229_v0  ;;  %1540 = vmatprep.mubr.bf16.mxu1 %v6229_v0  ;;  %6543 = vst [vmem:[#allocation65_spill] sm:$0xff] %v4595_v29  ;;  %6544 = vst [vmem:[#allocation66_spill] sm:$0xff] %v4598_v30  ;;  %v767_v0 = vld [vmem:[#allocation6 + $0x260] sm:$0xff]  ;;  %v4617_v13 = vcombine.low %v772_v44, %v776_v45 }
  0x77   :  { %6545 = vst [vmem:[#allocation67_spill] sm:$0xff] %v4601_v46  ;;  %6546 = vst [vmem:[#allocation68_spill] sm:$0xff] %v4605_v55  ;;  %v4619_v15 = vcombine.high %v763_v62, %v767_v0  ;;  %v4625_v31 = vcombine.low %v763_v62, %v767_v0 }
  0x78   :  { %1482 = vmatpush1.bf16.msra.mxu0 %v4537_v20  ;;  %1523 = vmatpush1.bf16.msra.mxu1 %v4543_v21  ;;  %6549 = vst [vmem:[#allocation71_spill] sm:$0xff] %v4613_v8  ;;  %6550 = vst [vmem:[#allocation72_spill] sm:$0xff] %v4617_v13 }
  0x79   :  { %1483 = vmatprep.subr.bf16.mxu0 %v4545_v22  ;;  %1524 = vmatprep.subr.bf16.mxu1 %v4548_v23  ;;  %6551 = vst [vmem:[#allocation73_spill] sm:$0xff] %v4619_v15  ;;  %6553 = vst [vmem:[#allocation75_spill] sm:$0xff] %v4625_v31 }
  0x7c   :  { %1484 = vmatpush2.bf16.msra.mxu0 %v4553_v19  ;;  %1525 = vmatpush2.bf16.msra.mxu1 %v4557_v36 }
  0x7d   :  { %1485 = vmatprep.subr.bf16.mxu0 %v4559_v37  ;;  %1526 = vmatprep.subr.bf16.mxu1 %v4562_v38 }
  0x80   :  { %1486 = vmatpush2.bf16.msra.mxu0 %v4565_v47  ;;  %1527 = vmatpush2.bf16.msra.mxu1 %v4569_v52 }
  0x81   :  { %1487 = vmatprep.subr.bf16.mxu0 %v4571_v53  ;;  %1528 = vmatprep.subr.bf16.mxu1 %v4574_v54 }
  0x84   :  { %1488 = vmatpush2.bf16.msra.mxu0 %v4577_v63  ;;  %1529 = vmatpush2.bf16.msra.mxu1 %v4581_v5  ;;  %v722_v5 = vld [vmem:[#allocation6 + $0xf8] sm:$0xff] }
  0x85   :  { %1489 = vmatprep.subr.bf16.mxu0 %v4583_v6  ;;  %1530 = vmatprep.subr.bf16.mxu1 %v4586_v7  ;;  %v764_v7 = vld [vmem:[#allocation6 + $0x248] sm:$0xff] }
  0x86   :  { %v768_v6 = vld [vmem:[#allocation6 + $0x268] sm:$0xff] }
  0x87   :  { %v4622_v17 = vcombine.high %v764_v7, %v768_v6  ;;  %v4629_v39 = vcombine.low %v764_v7, %v768_v6 }
  0x88   :  { %1490 = vmatpush2.bf16.msra.mxu0 %v4589_v18  ;;  %1531 = vmatpush2.bf16.msra.mxu1 %v4593_v28  ;;  %v756_v28 = vld [vmem:[#allocation6 + $0x208] sm:$0xff] }
  0x89   :  { %1491 = vmatprep.subr.bf16.mxu0 %v4595_v29  ;;  %1532 = vmatprep.subr.bf16.mxu1 %v4598_v30  ;;  %6552 = vst [vmem:[#allocation74_spill] sm:$0xff] %v4622_v17  ;;  %v755_v30 = vld [vmem:[#allocation6 + $0x200] sm:$0xff]  ;;  %v760_v18 = vld [vmem:[#allocation6 + $0x228] sm:$0xff]  ;;  %6554 = vst [vmem:[#allocation76_spill] sm:$0xff] %v4629_v39 }
  0x8a   :  { %v759_v29 = vld [vmem:[#allocation6 + $0x220] sm:$0xff]  ;;  %v4634_v45 = vcombine.high %v756_v28, %v760_v18  ;;  %v4641_v6 = vcombine.low %v756_v28, %v760_v18 }
  0x8b   :  { %v4631_v44 = vcombine.high %v755_v30, %v759_v29  ;;  %v4637_v0 = vcombine.low %v755_v30, %v759_v29 }
  0x8c   :  { %1492 = vmatpush2.bf16.msra.mxu0 %v4601_v46  ;;  %1533 = vmatpush2.bf16.msra.mxu1 %v4605_v55  ;;  %6556 = vst [vmem:[#allocation78_spill] sm:$0xff] %v4634_v45  ;;  %v750_v55 = vld [vmem:[#allocation6 + $0x1d8] sm:$0xff]  ;;  %6558 = vst [vmem:[#allocation80_spill] sm:$0xff] %v4641_v6 }
  0x8d   :  { %1493 = vmatprep.subr.bf16.mxu0 %v4607_v60  ;;  %1534 = vmatprep.subr.bf16.mxu1 %v4610_v61  ;;  %6555 = vst [vmem:[#allocation77_spill] sm:$0xff] %v4631_v44  ;;  %v749_v61 = vld [vmem:[#allocation6 + $0x1d0] sm:$0xff]  ;;  %v754_v46 = vld [vmem:[#allocation6 + $0x1f8] sm:$0xff]  ;;  %6557 = vst [vmem:[#allocation79_spill] sm:$0xff] %v4637_v0 }
  0x8e   :  { %v753_v60 = vld [vmem:[#allocation6 + $0x1f0] sm:$0xff]  ;;  %v4646_v62 = vcombine.high %v750_v55, %v754_v46  ;;  %v4653_v18 = vcombine.low %v750_v55, %v754_v46 }
  0x8f   :  { %v4643_v7 = vcombine.high %v749_v61, %v753_v60  ;;  %v4649_v29 = vcombine.low %v749_v61, %v753_v60 }
  0x90   :  { %1494 = vmatpush2.bf16.msra.mxu0 %v4613_v8  ;;  %1535 = vmatpush2.bf16.msra.mxu1 %v4617_v13  ;;  %6560 = vst [vmem:[#allocation82_spill] sm:$0xff] %v4646_v62  ;;  %v742_v13 = vld [vmem:[#allocation6 + $0x198] sm:$0xff]  ;;  %6562 = vst [vmem:[#allocation84_spill] sm:$0xff] %v4653_v18 }
  0x91   :  { %1495 = vmatprep.subr.bf16.mxu0 %v4619_v15  ;;  %1536 = vmatprep.subr.bf16.mxu1 %v4622_v17  ;;  %6559 = vst [vmem:[#allocation81_spill] sm:$0xff] %v4643_v7  ;;  %v741_v17 = vld [vmem:[#allocation6 + $0x190] sm:$0xff]  ;;  %v746_v8 = vld [vmem:[#allocation6 + $0x1b8] sm:$0xff]  ;;  %6561 = vst [vmem:[#allocation83_spill] sm:$0xff] %v4649_v29 }
  0x92   :  { %v745_v15 = vld [vmem:[#allocation6 + $0x1b0] sm:$0xff]  ;;  %v4658_v30 = vcombine.high %v742_v13, %v746_v8  ;;  %v4667_v46 = vcombine.low %v742_v13, %v746_v8 }
  0x93   :  { %v4655_v28 = vcombine.high %v741_v17, %v745_v15  ;;  %v4663_v60 = vcombine.low %v741_v17, %v745_v15 }
  0x94   :  { %1496 = vmatpush2.bf16.msra.mxu0 %v4625_v31  ;;  %1537 = vmatpush2.bf16.msra.mxu1 %v4629_v39  ;;  %6564 = vst [vmem:[#allocation86_spill] sm:$0xff] %v4658_v30  ;;  %v6565_v39 = vmov 0   ;;  %v734_v31 = vld [vmem:[#allocation6 + $0x158] sm:$0xff]  ;;  %6567 = vst [vmem:[#allocation88_spill] sm:$0xff] %v4667_v46 }
  0x95   :  { %1497 = vmatprep.subr.bf16.mxu0 %v4631_v44  ;;  %1538 = vmatprep.subr.bf16.mxu1 %v4634_v45  ;;  %6563 = vst [vmem:[#allocation85_spill] sm:$0xff] %v4655_v28  ;;  %v733_v45 = vld [vmem:[#allocation6 + $0x150] sm:$0xff]  ;;  %6566 = vst [vmem:[#allocation87_spill] sm:$0xff] %v4663_v60 }
  0x96   :  { %v737_v44 = vld [vmem:[#allocation6 + $0x170] sm:$0xff] }
  0x97   :  { %v4669_v55 = vcombine.high %v733_v45, %v737_v44  ;;  %v4677_v15 = vcombine.low %v733_v45, %v737_v44 }
  0x98   :  { %1498 = vmatpush2.bf16.msra.mxu0 %v4637_v0  ;;  %1539 = vmatpush2.bf16.msra.mxu1 %v4641_v6  ;;  %v738_v0 = vld [vmem:[#allocation6 + $0x178] sm:$0xff] }
  0x99   :  { %1549 = vmatprep.subr.bf16.mxu0 %v4643_v7  ;;  %1590 = vmatprep.subr.bf16.mxu1 %v4646_v62  ;;  %6568 = vst [vmem:[#allocation89_spill] sm:$0xff] %v4669_v55  ;;  %v4672_v61 = vcombine.high %v734_v31, %v738_v0  ;;  %v725_v62 = vld [vmem:[#allocation6 + $0x110] sm:$0xff]  ;;  %v726_v6 = vld [vmem:[#allocation6 + $0x118] sm:$0xff]  ;;  %6570 = vst [vmem:[#allocation91_spill] sm:$0xff] %v4677_v15  ;;  %v4681_v8 = vcombine.low %v734_v31, %v738_v0 }
  0x9a   :  { %v729_v7 = vld [vmem:[#allocation6 + $0x130] sm:$0xff] }
  0x9b   :  { %1500 = vmatmul.mubr.bf16.vlgmr.msra.gmra.mxu0 %v6565_v39  ;;  %1541 = vmatmul.mubr.bf16.vlgmr.msra.gmra.mxu1 %v6565_v39  ;;  %6569 = vst [vmem:[#allocation90_spill] sm:$0xff] %v4672_v61  ;;  %6571 = vst [vmem:[#allocation92_spill] sm:$0xff] %v4681_v8  ;;  %v4683_v13 = vcombine.high %v725_v62, %v729_v7  ;;  %v4689_v44 = vcombine.low %v725_v62, %v729_v7 }
  0x9c   :  { %1550 = vmatpush1.bf16.msra.mxu0 %v4649_v29  ;;  %1591 = vmatpush1.bf16.msra.mxu1 %v4653_v18  ;;  %v730_v29 = vld [vmem:[#allocation6 + $0x138] sm:$0xff] }
  0x9d   :  { %1551 = vmatprep.subr.bf16.mxu0 %v4655_v28  ;;  %1592 = vmatprep.subr.bf16.mxu1 %v4658_v30  ;;  %6572 = vst [vmem:[#allocation93_spill] sm:$0xff] %v4683_v13  ;;  %v4686_v17 = vcombine.high %v726_v6, %v730_v29  ;;  %v717_v30 = vld [vmem:[#allocation6 + $0xd0] sm:$0xff]  ;;  %v718_v18 = vld [vmem:[#allocation6 + $0xd8] sm:$0xff]  ;;  %6574 = vst [vmem:[#allocation95_spill] sm:$0xff] %v4689_v44  ;;  %v4693_v31 = vcombine.low %v726_v6, %v730_v29 }
  0x9e   :  { %1581 = vmatprep.mubr.bf16.mxu0 %v6565_v39  ;;  %1622 = vmatprep.mubr.bf16.mxu1 %v6565_v39  ;;  %v721_v28 = vld [vmem:[#allocation6 + $0xf0] sm:$0xff]  ;;  %v4698_v0 = vcombine.high %v718_v18, %v722_v5  ;;  %v4705_v6 = vcombine.low %v718_v18, %v722_v5 }
  0x9f   :  { %6573 = vst [vmem:[#allocation94_spill] sm:$0xff] %v4686_v17  ;;  %6575 = vst [vmem:[#allocation96_spill] sm:$0xff] %v4693_v31  ;;  %v4695_v45 = vcombine.high %v717_v30, %v721_v28  ;;  %v4701_v7 = vcombine.low %v717_v30, %v721_v28 }
  0xa0   :  { %1552 = vmatpush1.bf16.msra.mxu0 %v4663_v60  ;;  %1593 = vmatpush1.bf16.msra.mxu1 %v4667_v46  ;;  %6577 = vst [vmem:[#allocation98_spill] sm:$0xff] %v4698_v0  ;;  %v710_v46 = vld [vmem:[#allocation6 + $0x98] sm:$0xff]  ;;  %6579 = vst [vmem:[#allocation100_spill] sm:$0xff] %v4705_v6 }
  0xa1   :  { %1553 = vmatprep.subr.bf16.mxu0 %v4669_v55  ;;  %1594 = vmatprep.subr.bf16.mxu1 %v4672_v61  ;;  %6576 = vst [vmem:[#allocation97_spill] sm:$0xff] %v4695_v45  ;;  %v709_v61 = vld [vmem:[#allocation6 + $0x90] sm:$0xff]  ;;  %v714_v60 = vld [vmem:[#allocation6 + $0xb8] sm:$0xff]  ;;  %6578 = vst [vmem:[#allocation99_spill] sm:$0xff] %v4701_v7 }
  0xa2   :  { %v713_v55 = vld [vmem:[#allocation6 + $0xb0] sm:$0xff]  ;;  %v4710_v29 = vcombine.high %v710_v46, %v714_v60  ;;  %v4717_v5 = vcombine.low %v710_v46, %v714_v60 }
  0xa3   :  { %v4707_v62 = vcombine.high %v709_v61, %v713_v55  ;;  %v4713_v28 = vcombine.low %v709_v61, %v713_v55 }
  0xa4   :  { %1554 = vmatpush1.bf16.msra.mxu0 %v4677_v15  ;;  %1595 = vmatpush1.bf16.msra.mxu1 %v4681_v8  ;;  %6581 = vst [vmem:[#allocation102_spill] sm:$0xff] %v4710_v29  ;;  %v702_v8 = vld [vmem:[#allocation6 + $0x58] sm:$0xff]  ;;  %6583 = vst [vmem:[#allocation104_spill] sm:$0xff] %v4717_v5 }
  0xa5   :  { %1555 = vmatprep.subr.bf16.mxu0 %v4683_v13  ;;  %1596 = vmatprep.subr.bf16.mxu1 %v4686_v17  ;;  %6580 = vst [vmem:[#allocation101_spill] sm:$0xff] %v4707_v62  ;;  %v701_v17 = vld [vmem:[#allocation6 + $0x50] sm:$0xff]  ;;  %v706_v15 = vld [vmem:[#allocation6 + $0x78] sm:$0xff]  ;;  %6582 = vst [vmem:[#allocation103_spill] sm:$0xff] %v4713_v28 }
  0xa6   :  { %v705_v13 = vld [vmem:[#allocation6 + $0x70] sm:$0xff]  ;;  %v4722_v30 = vcombine.high %v702_v8, %v706_v15  ;;  %v4729_v60 = vcombine.low %v702_v8, %v706_v15 }
  0xa7   :  { %v4719_v18 = vcombine.high %v701_v17, %v705_v13  ;;  %v4725_v55 = vcombine.low %v701_v17, %v705_v13 }
  0xa8   :  { %1556 = vmatpush1.bf16.msra.mxu0 %v4689_v44  ;;  %1597 = vmatpush1.bf16.msra.mxu1 %v4693_v31  ;;  %6585 = vst [vmem:[#allocation106_spill] sm:$0xff] %v4722_v30  ;;  %v694_v31 = vld [vmem:[#allocation6 + $0x18] sm:$0xff]  ;;  %6587 = vst [vmem:[#allocation108_spill] sm:$0xff] %v4729_v60 }
  0xa9   :  { %1557 = vmatprep.subr.bf16.mxu0 %v4695_v45  ;;  %1598 = vmatprep.subr.bf16.mxu1 %v4698_v0  ;;  %6584 = vst [vmem:[#allocation105_spill] sm:$0xff] %v4719_v18  ;;  %v693_v0 = vld [vmem:[#allocation6 + $0x10] sm:$0xff]  ;;  %v698_v44 = vld [vmem:[#allocation6 + $0x38] sm:$0xff]  ;;  %6586 = vst [vmem:[#allocation107_spill] sm:$0xff] %v4725_v55 }
  0xaa   :  { %v697_v45 = vld [vmem:[#allocation6 + $0x30] sm:$0xff]  ;;  %v4734_v61 = vcombine.high %v694_v31, %v698_v44  ;;  %v4741_v15 = vcombine.low %v694_v31, %v698_v44 }
  0xab   :  { %v4731_v46 = vcombine.high %v693_v0, %v697_v45  ;;  %v4737_v13 = vcombine.low %v693_v0, %v697_v45 }
  0xac   :  { %1558 = vmatpush1.bf16.msra.mxu0 %v4701_v7  ;;  %1599 = vmatpush1.bf16.msra.mxu1 %v4705_v6  ;;  %6589 = vst [vmem:[#allocation110_spill] sm:$0xff] %v4734_v61  ;;  %v814_v6 = vld [vmem:[#allocation6 + $0x3d8] sm:$0xff]  ;;  %6591 = vst [vmem:[#allocation112_spill] sm:$0xff] %v4741_v15 }
  0xad   :  { %1559 = vmatprep.subr.bf16.mxu0 %v4707_v62  ;;  %1600 = vmatprep.subr.bf16.mxu1 %v4710_v29  ;;  %6588 = vst [vmem:[#allocation109_spill] sm:$0xff] %v4731_v46  ;;  %v813_v29 = vld [vmem:[#allocation6 + $0x3d0] sm:$0xff]  ;;  %v818_v7 = vld [vmem:[#allocation6 + $0x3f8] sm:$0xff]  ;;  %6590 = vst [vmem:[#allocation111_spill] sm:$0xff] %v4737_v13 }
  0xae   :  { %v817_v62 = vld [vmem:[#allocation6 + $0x3f0] sm:$0xff]  ;;  %v4746_v17 = vcombine.high %v814_v6, %v818_v7  ;;  %v4753_v44 = vcombine.low %v814_v6, %v818_v7 }
  0xaf   :  { %v4743_v8 = vcombine.high %v813_v29, %v817_v62  ;;  %v4749_v45 = vcombine.low %v813_v29, %v817_v62 }
  0xb0   :  { %1560 = vmatpush1.bf16.msra.mxu0 %v4713_v28  ;;  %1601 = vmatpush1.bf16.msra.mxu1 %v4717_v5  ;;  %6593 = vst [vmem:[#allocation114_spill] sm:$0xff] %v4746_v17  ;;  %v806_v5 = vld [vmem:[#allocation6 + $0x398] sm:$0xff]  ;;  %6595 = vst [vmem:[#allocation116_spill] sm:$0xff] %v4753_v44 }
  0xb1   :  { %1561 = vmatprep.subr.bf16.mxu0 %v4719_v18  ;;  %1602 = vmatprep.subr.bf16.mxu1 %v4722_v30  ;;  %6592 = vst [vmem:[#allocation113_spill] sm:$0xff] %v4743_v8  ;;  %v805_v30 = vld [vmem:[#allocation6 + $0x390] sm:$0xff]  ;;  %v810_v28 = vld [vmem:[#allocation6 + $0x3b8] sm:$0xff]  ;;  %6594 = vst [vmem:[#allocation115_spill] sm:$0xff] %v4749_v45 }
  0xb2   :  { %v809_v18 = vld [vmem:[#allocation6 + $0x3b0] sm:$0xff]  ;;  %v4758_v0 = vcombine.high %v806_v5, %v810_v28  ;;  %v4765_v7 = vcombine.low %v806_v5, %v810_v28 }
  0xb3   :  { %v4755_v31 = vcombine.high %v805_v30, %v809_v18  ;;  %v4761_v62 = vcombine.low %v805_v30, %v809_v18 }
  0xb4   :  { %1562 = vmatpush1.bf16.msra.mxu0 %v4725_v55  ;;  %1603 = vmatpush1.bf16.msra.mxu1 %v4729_v60  ;;  %6597 = vst [vmem:[#allocation118_spill] sm:$0xff] %v4758_v0  ;;  %v798_v60 = vld [vmem:[#allocation6 + $0x358] sm:$0xff]  ;;  %6599 = vst [vmem:[#allocation120_spill] sm:$0xff] %v4765_v7 }
  0xb5   :  { %1563 = vmatprep.subr.bf16.mxu0 %v4731_v46  ;;  %1604 = vmatprep.subr.bf16.mxu1 %v4734_v61  ;;  %6596 = vst [vmem:[#allocation117_spill] sm:$0xff] %v4755_v31  ;;  %v797_v61 = vld [vmem:[#allocation6 + $0x350] sm:$0xff]  ;;  %v802_v55 = vld [vmem:[#allocation6 + $0x378] sm:$0xff]  ;;  %6598 = vst [vmem:[#allocation119_spill] sm:$0xff] %v4761_v62 }
  0xb6   :  { %v801_v46 = vld [vmem:[#allocation6 + $0x370] sm:$0xff]  ;;  %v4770_v29 = vcombine.high %v798_v60, %v802_v55  ;;  %v4777_v28 = vcombine.low %v798_v60, %v802_v55 }
  0xb7   :  { %v4767_v6 = vcombine.high %v797_v61, %v801_v46  ;;  %v4773_v18 = vcombine.low %v797_v61, %v801_v46 }
  0xb8   :  { %1564 = vmatpush1.bf16.msra.mxu0 %v4737_v13  ;;  %1605 = vmatpush1.bf16.msra.mxu1 %v4741_v15  ;;  %6601 = vst [vmem:[#allocation122_spill] sm:$0xff] %v4770_v29  ;;  %v790_v15 = vld [vmem:[#allocation6 + $0x318] sm:$0xff]  ;;  %6603 = vst [vmem:[#allocation124_spill] sm:$0xff] %v4777_v28 }
  0xb9   :  { %1565 = vmatprep.subr.bf16.mxu0 %v4743_v8  ;;  %1606 = vmatprep.subr.bf16.mxu1 %v4746_v17  ;;  %6600 = vst [vmem:[#allocation121_spill] sm:$0xff] %v4767_v6  ;;  %v789_v17 = vld [vmem:[#allocation6 + $0x310] sm:$0xff]  ;;  %v794_v13 = vld [vmem:[#allocation6 + $0x338] sm:$0xff]  ;;  %6602 = vst [vmem:[#allocation123_spill] sm:$0xff] %v4773_v18 }
  0xba   :  { %v793_v8 = vld [vmem:[#allocation6 + $0x330] sm:$0xff]  ;;  %v4782_v30 = vcombine.high %v790_v15, %v794_v13  ;;  %v4789_v55 = vcombine.low %v790_v15, %v794_v13 }
  0xbb   :  { %v4779_v5 = vcombine.high %v789_v17, %v793_v8  ;;  %v4785_v46 = vcombine.low %v789_v17, %v793_v8 }
  0xbc   :  { %1566 = vmatpush2.bf16.msra.mxu0 %v4749_v45  ;;  %1607 = vmatpush2.bf16.msra.mxu1 %v4753_v44  ;;  %6605 = vst [vmem:[#allocation126_spill] sm:$0xff] %v4782_v30  ;;  %v782_v44 = vld [vmem:[#allocation6 + $0x2d8] sm:$0xff]  ;;  %6607 = vst [vmem:[#allocation128_spill] sm:$0xff] %v4789_v55 }
  0xbd   :  { %1567 = vmatprep.subr.bf16.mxu0 %v4755_v31  ;;  %1608 = vmatprep.subr.bf16.mxu1 %v4758_v0  ;;  %6604 = vst [vmem:[#allocation125_spill] sm:$0xff] %v4779_v5  ;;  %v781_v0 = vld [vmem:[#allocation6 + $0x2d0] sm:$0xff]  ;;  %v786_v45 = vld [vmem:[#allocation6 + $0x2f8] sm:$0xff]  ;;  %6606 = vst [vmem:[#allocation127_spill] sm:$0xff] %v4785_v46 }
  0xbe   :  { %v785_v31 = vld [vmem:[#allocation6 + $0x2f0] sm:$0xff]  ;;  %v4794_v61 = vcombine.high %v782_v44, %v786_v45  ;;  %v4801_v13 = vcombine.low %v782_v44, %v786_v45 }
  0xbf   :  { %v4791_v60 = vcombine.high %v781_v0, %v785_v31  ;;  %v4797_v8 = vcombine.low %v781_v0, %v785_v31 }
  0xc0   :  { %1568 = vmatpush2.bf16.msra.mxu0 %v4761_v62  ;;  %1609 = vmatpush2.bf16.msra.mxu1 %v4765_v7  ;;  %6609 = vst [vmem:[#allocation130_spill] sm:$0xff] %v4794_v61  ;;  %v774_v7 = vld [vmem:[#allocation6 + $0x298] sm:$0xff]  ;;  %6611 = vst [vmem:[#allocation132_spill] sm:$0xff] %v4801_v13 }
  0xc1   :  { %1569 = vmatprep.subr.bf16.mxu0 %v4767_v6  ;;  %1610 = vmatprep.subr.bf16.mxu1 %v4770_v29  ;;  %6608 = vst [vmem:[#allocation129_spill] sm:$0xff] %v4791_v60  ;;  %v773_v29 = vld [vmem:[#allocation6 + $0x290] sm:$0xff]  ;;  %v778_v62 = vld [vmem:[#allocation6 + $0x2b8] sm:$0xff]  ;;  %6610 = vst [vmem:[#allocation131_spill] sm:$0xff] %v4797_v8 }
  0xc2   :  { %v777_v6 = vld [vmem:[#allocation6 + $0x2b0] sm:$0xff]  ;;  %v4806_v17 = vcombine.high %v774_v7, %v778_v62  ;;  %v4813_v45 = vcombine.low %v774_v7, %v778_v62 }
  0xc3   :  { %v4803_v15 = vcombine.high %v773_v29, %v777_v6  ;;  %v4809_v31 = vcombine.low %v773_v29, %v777_v6 }
  0xc4   :  { %1570 = vmatpush2.bf16.msra.mxu0 %v4773_v18  ;;  %1611 = vmatpush2.bf16.msra.mxu1 %v4777_v28  ;;  %6613 = vst [vmem:[#allocation134_spill] sm:$0xff] %v4806_v17  ;;  %v766_v28 = vld [vmem:[#allocation6 + $0x258] sm:$0xff]  ;;  %6615 = vst [vmem:[#allocation136_spill] sm:$0xff] %v4813_v45 }
  0xc5   :  { %1571 = vmatprep.subr.bf16.mxu0 %v4779_v5  ;;  %1612 = vmatprep.subr.bf16.mxu1 %v4782_v30  ;;  %6612 = vst [vmem:[#allocation133_spill] sm:$0xff] %v4803_v15  ;;  %v765_v30 = vld [vmem:[#allocation6 + $0x250] sm:$0xff]  ;;  %v770_v18 = vld [vmem:[#allocation6 + $0x278] sm:$0xff]  ;;  %6614 = vst [vmem:[#allocation135_spill] sm:$0xff] %v4809_v31 }
  0xc6   :  { %v769_v5 = vld [vmem:[#allocation6 + $0x270] sm:$0xff]  ;;  %v4818_v0 = vcombine.high %v766_v28, %v770_v18  ;;  %v4825_v62 = vcombine.low %v766_v28, %v770_v18 }
  0xc7   :  { %v4815_v44 = vcombine.high %v765_v30, %v769_v5  ;;  %v4821_v6 = vcombine.low %v765_v30, %v769_v5  ;;  %v4884_v30 = vld [vmem:[%s6221_s3] sm:$0xff] }
  0xc8   :  { %1572 = vmatpush2.bf16.msra.mxu0 %v4785_v46  ;;  %1613 = vmatpush2.bf16.msra.mxu1 %v4789_v55  ;;  %6617 = vst [vmem:[#allocation138_spill] sm:$0xff] %v4818_v0  ;;  %v758_v55 = vld [vmem:[#allocation6 + $0x218] sm:$0xff]  ;;  %6619 = vst [vmem:[#allocation140_spill] sm:$0xff] %v4825_v62 }
  0xc9   :  { %1573 = vmatprep.subr.bf16.mxu0 %v4791_v60  ;;  %1614 = vmatprep.subr.bf16.mxu1 %v4794_v61  ;;  %6616 = vst [vmem:[#allocation137_spill] sm:$0xff] %v4815_v44  ;;  %v757_v61 = vld [vmem:[#allocation6 + $0x210] sm:$0xff]  ;;  %v762_v46 = vld [vmem:[#allocation6 + $0x238] sm:$0xff]  ;;  %6618 = vst [vmem:[#allocation139_spill] sm:$0xff] %v4821_v6 }
  0xca   :  { %v761_v60 = vld [vmem:[#allocation6 + $0x230] sm:$0xff]  ;;  %v4830_v29 = vcombine.high %v758_v55, %v762_v46  ;;  %v4837_v5 = vcombine.low %v758_v55, %v762_v46 }
  0xcb   :  { %v4827_v7 = vcombine.high %v757_v61, %v761_v60 }
  0xcc   :  { %1574 = vmatpush2.bf16.msra.mxu0 %v4797_v8  ;;  %1615 = vmatpush2.bf16.msra.mxu1 %v4801_v13  ;;  %6621 = vst [vmem:[#allocation142_spill] sm:$0xff] %v4830_v29  ;;  %6623 = vst [vmem:[#allocation144_spill] sm:$0xff] %v4837_v5 }
  0xcd   :  { %1575 = vmatprep.subr.bf16.mxu0 %v4803_v15  ;;  %1616 = vmatprep.subr.bf16.mxu1 %v4806_v17  ;;  %6620 = vst [vmem:[#allocation141_spill] sm:$0xff] %v4827_v7  ;;  %v4833_v17 = vcombine.low %v757_v61, %v761_v60 }
  0xcf   :  { %6622 = vst [vmem:[#allocation143_spill] sm:$0xff] %v4833_v17 }
  0xd0   :  { %1576 = vmatpush2.bf16.msra.mxu0 %v4809_v31  ;;  %1617 = vmatpush2.bf16.msra.mxu1 %v4813_v45 }
  0xd1   :  { %1577 = vmatprep.subr.bf16.mxu0 %v4815_v44  ;;  %1618 = vmatprep.subr.bf16.mxu1 %v4818_v0 }
  0xd4   :  { %1578 = vmatpush2.bf16.msra.mxu0 %v4821_v6  ;;  %1619 = vmatpush2.bf16.msra.mxu1 %v4825_v62 }
  0xd5   :  { %1579 = vmatprep.subr.bf16.mxu0 %v4827_v7  ;;  %1620 = vmatprep.subr.bf16.mxu1 %v4830_v29 }
  0xd8   :  { %1580 = vmatpush2.bf16.msra.mxu0 %v4833_v17  ;;  %1621 = vmatpush2.bf16.msra.mxu1 %v4837_v5 }
  0xd9   :  { %1697 = vmatprep.subr.bf16.mxu0 %v4408_v14  ;;  %1738 = vmatprep.subr.bf16.mxu1 %v4412_v16 }
  0xdb   :  { %1582 = vmatmul.mubr.bf16.vlgmr.msra.gmra.mxu0 %v6565_v39  ;;  %1623 = vmatmul.mubr.bf16.vlgmr.msra.gmra.mxu1 %v6565_v39  ;;  %v122_v39 = vlaneseq }
  0xdc   :  { %1698 = vmatpush1.bf16.msra.mxu0 %v4436_v24  ;;  %1739 = vmatpush1.bf16.msra.mxu1 %v4438_v25 }
  0xdd   :  { %1699 = vmatprep.subr.bf16.mxu0 %v4440_v26  ;;  %1740 = vmatprep.subr.bf16.mxu1 %v4442_v27  ;;  %v4873_v18 = vshrl.u32 %v122_v39, 7 }
  0xdf   :  { %v124_v28 = vsub.s32 0, %v4873_v18  ;;  %v132_v55 = vsub.s32 2, %v4873_v18  ;;  %v128_v61 = vsub.s32 1, %v4873_v18 }
  0xe0   :  { %1700 = vmatpush1.bf16.msra.mxu0 %v4449_v32  ;;  %1741 = vmatpush1.bf16.msra.mxu1 %v4453_v33 }
  0xe1   :  { %1701 = vmatprep.subr.bf16.mxu0 %v4455_v34  ;;  %1742 = vmatprep.subr.bf16.mxu1 %v4458_v35 }
  0xe4   :  { %1702 = vmatpush1.bf16.msra.mxu0 %v4463_v40  ;;  %1743 = vmatpush1.bf16.msra.mxu1 %v4467_v41 }
  0xe5   :  { %1703 = vmatprep.subr.bf16.mxu0 %v4469_v42  ;;  %1744 = vmatprep.subr.bf16.mxu1 %v4472_v43 }
  0xe8   :  { %1704 = vmatpush1.bf16.msra.mxu0 %v4477_v48  ;;  %1745 = vmatpush1.bf16.msra.mxu1 %v4483_v49 }
  0xe9   :  { %1705 = vmatprep.subr.bf16.mxu0 %v4485_v50  ;;  %1746 = vmatprep.subr.bf16.mxu1 %v4488_v51 }
  0xec   :  { %1706 = vmatpush1.bf16.msra.mxu0 %v4493_v56  ;;  %1747 = vmatpush1.bf16.msra.mxu1 %v4497_v57 }
  0xed   :  { %1707 = vmatprep.subr.bf16.mxu0 %v4499_v58  ;;  %1748 = vmatprep.subr.bf16.mxu1 %v4502_v59 }
  0xf0   :  { %1708 = vmatpush1.bf16.msra.mxu0 %v4507_v1  ;;  %1749 = vmatpush1.bf16.msra.mxu1 %v4513_v2 }
  0xf1   :  { %1709 = vmatprep.subr.bf16.mxu0 %v4515_v3  ;;  %1750 = vmatprep.subr.bf16.mxu1 %v4518_v4 }
  0xf4   :  { %1710 = vmatpush1.bf16.msra.mxu0 %v4523_v9  ;;  %1751 = vmatpush1.bf16.msra.mxu1 %v4527_v10 }
  0xf5   :  { %1711 = vmatprep.subr.bf16.mxu0 %v4529_v11  ;;  %1752 = vmatprep.subr.bf16.mxu1 %v4532_v12 }
  0xf8   :  { %1712 = vmatpush1.bf16.msra.mxu0 %v4537_v20  ;;  %1753 = vmatpush1.bf16.msra.mxu1 %v4543_v21  ;;  %v4905_v20 = vrot.slane %v4884_v30, %v132_v55 }
  0xf9   :  { %1713 = vmatprep.subr.bf16.mxu0 %v4545_v22  ;;  %1754 = vmatprep.subr.bf16.mxu1 %v4548_v23  ;;  %v136_v22 = vsub.s32 3, %v4873_v18  ;;  %v4899_v23 = vrot.slane %v4884_v30, %v124_v28 }
  0xfb   :  { %v4886_v46 = vpop.f32.mrf.mxu0  ;;  %v4889_v60 = vpop.f32.mrf.mxu1  ;;  %v4915_v28 = vrot.slane %v4884_v30, %v136_v22 }
  0xfc   :  { %1714 = vmatpush2.bf16.msra.mxu0 %v4553_v19  ;;  %1755 = vmatpush2.bf16.msra.mxu1 %v4557_v36  ;;  %v4908_v19 = vrot.slane %v4884_v30, %v128_v61 }
  0xfd   :  { %v4893_v39 = vpop.f32.mrf.mxu0  ;;  %1715 = vmatprep.subr.bf16.mxu0 %v4559_v37  ;;  %v4901_v21 = vpop.f32.mrf.mxu1  ;;  %1756 = vmatprep.subr.bf16.mxu1 %v4562_v38 }
  0xff   :  { %v373_v12 = vpop.f32.mrf.mxu0  ;;  %v446_v36 = vpop.f32.mrf.mxu1 }
 0x100   :  { %v4911_v11 = vadd.f32 %v373_v12, %v4899_v23  ;;  %1716 = vmatpush2.bf16.msra.mxu0 %v4565_v47  ;;  %v4918_v37 = vadd.f32 %v446_v36, %v4905_v20  ;;  %1757 = vmatpush2.bf16.msra.mxu1 %v4569_v52  ;;  %v6630_v52 = vld [vmem:[#allocation60_spill] sm:$0xff] }
 0x101   :  { %v375_v38 = vpop.f32.mrf.mxu0  ;;  %1717 = vmatprep.subr.bf16.mxu0 %v4571_v53  ;;  %v448_v61 = vpop.f32.mrf.mxu1  ;;  %1758 = vmatprep.subr.bf16.mxu1 %v4574_v54  ;;  %v6638_v54 = vld [vmem:[#allocation64_spill] sm:$0xff] }
 0x102   :  { %6624 = vst [vmem:[#allocation145_spill] sm:$0xff] %v4911_v11  ;;  %6625 = vst [vmem:[#allocation146_spill] sm:$0xff] %v4918_v37  ;;  %v4923_v55 = vadd.f32 %v375_v38, %v4908_v19  ;;  %v4927_v12 = vadd.f32 %v448_v61, %v4915_v28  ;;  %v6631_v38 = vld [vmem:[#allocation61_spill] sm:$0xff] }
 0x103   :  { %v379_v11 = vpop.f32.mrf.mxu0  ;;  %v452_v36 = vpop.f32.mrf.mxu1 }
 0x104   :  { %6626 = vst [vmem:[#allocation147_spill] sm:$0xff] %v4923_v55  ;;  %6627 = vst [vmem:[#allocation148_spill] sm:$0xff] %v4927_v12  ;;  %v4930_v22 = vadd.f32 %v379_v11, %v4899_v23  ;;  %1718 = vmatpush2.bf16.msra.mxu0 %v4577_v63  ;;  %v4934_v37 = vadd.f32 %v452_v36, %v4905_v20  ;;  %1759 = vmatpush2.bf16.msra.mxu1 %v6630_v52  ;;  %v6633_v12 = vld [vmem:[#allocation62_spill] sm:$0xff] }
 0x105   :  { %v381_v53 = vpop.f32.mrf.mxu0  ;;  %1719 = vmatprep.subr.bf16.mxu0 %v6631_v38  ;;  %v454_v61 = vpop.f32.mrf.mxu1  ;;  %1760 = vmatprep.subr.bf16.mxu1 %v6633_v12  ;;  %v6646_v12 = vld [vmem:[#allocation68_spill] sm:$0xff] }
 0x106   :  { %6628 = vst [vmem:[#allocation149_spill] sm:$0xff] %v4930_v22  ;;  %6629 = vst [vmem:[#allocation150_spill] sm:$0xff] %v4934_v37  ;;  %v4939_v55 = vadd.f32 %v381_v53, %v4908_v19  ;;  %v4943_v11 = vadd.f32 %v454_v61, %v4915_v28  ;;  %v6636_v37 = vld [vmem:[#allocation63_spill] sm:$0xff]  ;;  %v6639_v53 = vld [vmem:[#allocation65_spill] sm:$0xff] }
 0x107   :  { %v383_v22 = vpop.f32.mrf.mxu0  ;;  %v456_v36 = vpop.f32.mrf.mxu1 }
 0x108   :  { %6632 = vst [vmem:[#allocation151_spill] sm:$0xff] %v4939_v55  ;;  %6634 = vst [vmem:[#allocation152_spill] sm:$0xff] %v4943_v11  ;;  %v4946_v63 = vadd.f32 %v383_v22, %v4899_v23  ;;  %1720 = vmatpush2.bf16.msra.mxu0 %v6636_v37  ;;  %v4950_v52 = vadd.f32 %v456_v36, %v4905_v20  ;;  %1761 = vmatpush2.bf16.msra.mxu1 %v6638_v54  ;;  %v6641_v11 = vld [vmem:[#allocation66_spill] sm:$0xff] }
 0x109   :  { %v385_v38 = vpop.f32.mrf.mxu0  ;;  %1721 = vmatprep.subr.bf16.mxu0 %v6639_v53  ;;  %v458_v61 = vpop.f32.mrf.mxu1  ;;  %1762 = vmatprep.subr.bf16.mxu1 %v6641_v11  ;;  %v6654_v11 = vld [vmem:[#allocation72_spill] sm:$0xff] }
 0x10a   :  { %6635 = vst [vmem:[#allocation153_spill] sm:$0xff] %v4946_v63  ;;  %6637 = vst [vmem:[#allocation154_spill] sm:$0xff] %v4950_v52  ;;  %v4955_v55 = vadd.f32 %v385_v38, %v4908_v19  ;;  %v4959_v22 = vadd.f32 %v458_v61, %v4915_v28  ;;  %v6644_v52 = vld [vmem:[#allocation67_spill] sm:$0xff]  ;;  %v6647_v38 = vld [vmem:[#allocation69_spill] sm:$0xff] }
 0x10b   :  { %v389_v63 = vpop.f32.mrf.mxu0  ;;  %v462_v36 = vpop.f32.mrf.mxu1 }
 0x10c   :  { %6640 = vst [vmem:[#allocation155_spill] sm:$0xff] %v4955_v55  ;;  %6642 = vst [vmem:[#allocation156_spill] sm:$0xff] %v4959_v22  ;;  %v4962_v37 = vadd.f32 %v389_v63, %v4899_v23  ;;  %1722 = vmatpush2.bf16.msra.mxu0 %v6644_v52  ;;  %v4966_v54 = vadd.f32 %v462_v36, %v4905_v20  ;;  %1763 = vmatpush2.bf16.msra.mxu1 %v6646_v12  ;;  %v6649_v22 = vld [vmem:[#allocation70_spill] sm:$0xff] }
 0x10d   :  { %v391_v53 = vpop.f32.mrf.mxu0  ;;  %1723 = vmatprep.subr.bf16.mxu0 %v6647_v38  ;;  %v464_v61 = vpop.f32.mrf.mxu1  ;;  %1764 = vmatprep.subr.bf16.mxu1 %v6649_v22  ;;  %v6662_v22 = vld [vmem:[#allocation76_spill] sm:$0xff] }
 0x10e   :  { %6643 = vst [vmem:[#allocation157_spill] sm:$0xff] %v4962_v37  ;;  %6645 = vst [vmem:[#allocation158_spill] sm:$0xff] %v4966_v54  ;;  %v4971_v55 = vadd.f32 %v391_v53, %v4908_v19  ;;  %v4975_v63 = vadd.f32 %v464_v61, %v4915_v28  ;;  %v6652_v54 = vld [vmem:[#allocation71_spill] sm:$0xff]  ;;  %v6655_v53 = vld [vmem:[#allocation73_spill] sm:$0xff] }
 0x10f   :  { %v393_v37 = vpop.f32.mrf.mxu0  ;;  %v466_v36 = vpop.f32.mrf.mxu1 }
 0x110   :  { %6648 = vst [vmem:[#allocation159_spill] sm:$0xff] %v4971_v55  ;;  %6650 = vst [vmem:[#allocation160_spill] sm:$0xff] %v4975_v63  ;;  %v4978_v52 = vadd.f32 %v393_v37, %v4899_v23  ;;  %1724 = vmatpush2.bf16.msra.mxu0 %v6652_v54  ;;  %v4982_v12 = vadd.f32 %v466_v36, %v4905_v20  ;;  %1765 = vmatpush2.bf16.msra.mxu1 %v6654_v11  ;;  %v6657_v63 = vld [vmem:[#allocation74_spill] sm:$0xff] }
 0x111   :  { %v395_v38 = vpop.f32.mrf.mxu0  ;;  %1725 = vmatprep.subr.bf16.mxu0 %v6655_v53  ;;  %v468_v61 = vpop.f32.mrf.mxu1  ;;  %1766 = vmatprep.subr.bf16.mxu1 %v6657_v63  ;;  %v6670_v63 = vld [vmem:[#allocation80_spill] sm:$0xff] }
 0x112   :  { %6651 = vst [vmem:[#allocation161_spill] sm:$0xff] %v4978_v52  ;;  %6653 = vst [vmem:[#allocation162_spill] sm:$0xff] %v4982_v12  ;;  %v4987_v55 = vadd.f32 %v395_v38, %v4908_v19  ;;  %v4991_v37 = vadd.f32 %v468_v61, %v4915_v28  ;;  %v6660_v12 = vld [vmem:[#allocation75_spill] sm:$0xff]  ;;  %v6663_v38 = vld [vmem:[#allocation77_spill] sm:$0xff] }
 0x113   :  { %v399_v52 = vpop.f32.mrf.mxu0  ;;  %v472_v36 = vpop.f32.mrf.mxu1 }
 0x114   :  { %6656 = vst [vmem:[#allocation163_spill] sm:$0xff] %v4987_v55  ;;  %6658 = vst [vmem:[#allocation164_spill] sm:$0xff] %v4991_v37  ;;  %v4994_v54 = vadd.f32 %v399_v52, %v4899_v23  ;;  %1726 = vmatpush2.bf16.msra.mxu0 %v6660_v12  ;;  %v4998_v11 = vadd.f32 %v472_v36, %v4905_v20  ;;  %1767 = vmatpush2.bf16.msra.mxu1 %v6662_v22  ;;  %v6665_v37 = vld [vmem:[#allocation78_spill] sm:$0xff] }
 0x115   :  { %v401_v53 = vpop.f32.mrf.mxu0  ;;  %1727 = vmatprep.subr.bf16.mxu0 %v6663_v38  ;;  %v474_v61 = vpop.f32.mrf.mxu1  ;;  %1768 = vmatprep.subr.bf16.mxu1 %v6665_v37  ;;  %v6673_v37 = vld [vmem:[#allocation82_spill] sm:$0xff] }
 0x116   :  { %6659 = vst [vmem:[#allocation165_spill] sm:$0xff] %v4994_v54  ;;  %6661 = vst [vmem:[#allocation166_spill] sm:$0xff] %v4998_v11  ;;  %v5003_v55 = vadd.f32 %v401_v53, %v4908_v19  ;;  %v5007_v52 = vadd.f32 %v474_v61, %v4915_v28  ;;  %v6668_v11 = vld [vmem:[#allocation79_spill] sm:$0xff]  ;;  %v6671_v53 = vld [vmem:[#allocation81_spill] sm:$0xff] }
 0x117   :  { %v403_v54 = vpop.f32.mrf.mxu0  ;;  %v476_v36 = vpop.f32.mrf.mxu1 }
 0x118   :  { %6664 = vst [vmem:[#allocation167_spill] sm:$0xff] %v5003_v55  ;;  %6666 = vst [vmem:[#allocation168_spill] sm:$0xff] %v5007_v52  ;;  %v5010_v12 = vadd.f32 %v403_v54, %v4899_v23  ;;  %1728 = vmatpush2.bf16.msra.mxu0 %v6668_v11  ;;  %v5014_v22 = vadd.f32 %v476_v36, %v4905_v20  ;;  %1769 = vmatpush2.bf16.msra.mxu1 %v6670_v63  ;;  %v140_v52 = vsub.s32 4, %v4873_v18 }
 0x119   :  { %v405_v38 = vpop.f32.mrf.mxu0  ;;  %1779 = vmatprep.subr.bf16.mxu0 %v6671_v53  ;;  %v478_v61 = vpop.f32.mrf.mxu1  ;;  %1820 = vmatprep.subr.bf16.mxu1 %v6673_v37  ;;  %v148_v36 = vsub.s32 6, %v4873_v18  ;;  %v144_v63 = vsub.s32 5, %v4873_v18 }
 0x11a   :  { %6667 = vst [vmem:[#allocation169_spill] sm:$0xff] %v5010_v12  ;;  %6669 = vst [vmem:[#allocation170_spill] sm:$0xff] %v5014_v22  ;;  %v5019_v55 = vadd.f32 %v405_v38, %v4908_v19  ;;  %v5024_v54 = vadd.f32 %v478_v61, %v4915_v28  ;;  %v152_v38 = vsub.s32 7, %v4873_v18 }
 0x11b   :  { %v5026_v12 = vpop.f32.mrf.mxu0  ;;  %v5029_v22 = vpop.f32.mrf.mxu1  ;;  %v5041_v61 = vrot.slane %v4884_v30, %v148_v36  ;;  %v5044_v37 = vrot.slane %v4884_v30, %v144_v63 }
 0x11c   :  { %6672 = vst [vmem:[#allocation171_spill] sm:$0xff] %v5019_v55  ;;  %6674 = vst [vmem:[#allocation172_spill] sm:$0xff] %v5024_v54  ;;  %v5036_v55 = vrot.slane %v4884_v30, %v140_v52  ;;  %v5050_v9 = vrot.slane %v4884_v30, %v152_v38 }
 0x11d   :  { %v5032_v53 = vpop.f32.mrf.mxu0  ;;  %v5038_v11 = vpop.f32.mrf.mxu1 }
 0x11f   :  { %v519_v54 = vpop.f32.mrf.mxu0  ;;  %v592_v10 = vpop.f32.mrf.mxu1 }
 0x120   :  { %v5047_v47 = vadd.f32 %v519_v54, %v5036_v55  ;;  %v5053_v18 = vadd.f32 %v592_v10, %v5041_v61 }
 0x121   :  { %v521_v52 = vpop.f32.mrf.mxu0  ;;  %v594_v36 = vpop.f32.mrf.mxu1 }
 0x122   :  { %6675 = vst [vmem:[#allocation173_spill] sm:$0xff] %v5047_v47  ;;  %6676 = vst [vmem:[#allocation174_spill] sm:$0xff] %v5053_v18  ;;  %v5056_v4 = vadd.f32 %v521_v52, %v5044_v37  ;;  %v5059_v3 = vadd.f32 %v594_v36, %v5050_v9 }
 0x123   :  { %v525_v63 = vpop.f32.mrf.mxu0  ;;  %v598_v54 = vpop.f32.mrf.mxu1 }
 0x124   :  { %6677 = vst [vmem:[#allocation175_spill] sm:$0xff] %v5056_v4  ;;  %6678 = vst [vmem:[#allocation176_spill] sm:$0xff] %v5059_v3  ;;  %v5062_v2 = vadd.f32 %v525_v63, %v5036_v55  ;;  %v5065_v47 = vadd.f32 %v598_v54, %v5041_v61 }
 0x125   :  { %v527_v30 = vpop.f32.mrf.mxu0  ;;  %v600_v38 = vpop.f32.mrf.mxu1 }
 0x126   :  { %6679 = vst [vmem:[#allocation177_spill] sm:$0xff] %v5062_v2  ;;  %6680 = vst [vmem:[#allocation178_spill] sm:$0xff] %v5065_v47  ;;  %v5068_v10 = vadd.f32 %v527_v30, %v5044_v37  ;;  %v5071_v52 = vadd.f32 %v600_v38, %v5050_v9 }
 0x127   :  { %v529_v4 = vpop.f32.mrf.mxu0  ;;  %v602_v3 = vpop.f32.mrf.mxu1 }
 0x128   :  { %6681 = vst [vmem:[#allocation179_spill] sm:$0xff] %v5068_v10  ;;  %6682 = vst [vmem:[#allocation180_spill] sm:$0xff] %v5071_v52  ;;  %v5074_v36 = vadd.f32 %v529_v4, %v5036_v55  ;;  %v5077_v63 = vadd.f32 %v602_v3, %v5041_v61 }
 0x129   :  { %v531_v2 = vpop.f32.mrf.mxu0  ;;  %v604_v47 = vpop.f32.mrf.mxu1 }
 0x12a   :  { %6683 = vst [vmem:[#allocation181_spill] sm:$0xff] %v5074_v36  ;;  %6684 = vst [vmem:[#allocation182_spill] sm:$0xff] %v5077_v63  ;;  %v5080_v54 = vadd.f32 %v531_v2, %v5044_v37  ;;  %v5083_v30 = vadd.f32 %v604_v47, %v5050_v9 }
 0x12b   :  { %v535_v10 = vpop.f32.mrf.mxu0  ;;  %v608_v52 = vpop.f32.mrf.mxu1 }
 0x12c   :  { %6685 = vst [vmem:[#allocation183_spill] sm:$0xff] %v5080_v54  ;;  %6686 = vst [vmem:[#allocation184_spill] sm:$0xff] %v5083_v30  ;;  %v5086_v38 = vadd.f32 %v535_v10, %v5036_v55  ;;  %v5089_v4 = vadd.f32 %v608_v52, %v5041_v61 }
 0x12d   :  { %v537_v36 = vpop.f32.mrf.mxu0  ;;  %v610_v63 = vpop.f32.mrf.mxu1 }
 0x12e   :  { %6687 = vst [vmem:[#allocation185_spill] sm:$0xff] %v5086_v38  ;;  %6688 = vst [vmem:[#allocation186_spill] sm:$0xff] %v5089_v4  ;;  %v5092_v3 = vadd.f32 %v537_v36, %v5044_v37  ;;  %v5095_v2 = vadd.f32 %v610_v63, %v5050_v9 }
 0x12f   :  { %v539_v54 = vpop.f32.mrf.mxu0  ;;  %v612_v30 = vpop.f32.mrf.mxu1 }
 0x130   :  { %6689 = vst [vmem:[#allocation187_spill] sm:$0xff] %v5092_v3  ;;  %6690 = vst [vmem:[#allocation188_spill] sm:$0xff] %v5095_v2  ;;  %v5098_v47 = vadd.f32 %v539_v54, %v5036_v55  ;;  %v5101_v10 = vadd.f32 %v612_v30, %v5041_v61 }
 0x131   :  { %v541_v38 = vpop.f32.mrf.mxu0  ;;  %v614_v4 = vpop.f32.mrf.mxu1 }
 0x132   :  { %6691 = vst [vmem:[#allocation189_spill] sm:$0xff] %v5098_v47  ;;  %6692 = vst [vmem:[#allocation190_spill] sm:$0xff] %v5101_v10  ;;  %v5104_v52 = vadd.f32 %v541_v38, %v5044_v37  ;;  %v5107_v36 = vadd.f32 %v614_v4, %v5050_v9 }
 0x133   :  { %v545_v3 = vpop.f32.mrf.mxu0  ;;  %v618_v2 = vpop.f32.mrf.mxu1 }
 0x134   :  { %6693 = vst [vmem:[#allocation191_spill] sm:$0xff] %v5104_v52  ;;  %6694 = vst [vmem:[#allocation192_spill] sm:$0xff] %v5107_v36  ;;  %v5110_v63 = vadd.f32 %v545_v3, %v5036_v55  ;;  %v5113_v54 = vadd.f32 %v618_v2, %v5041_v61 }
 0x135   :  { %v547_v47 = vpop.f32.mrf.mxu0  ;;  %v620_v10 = vpop.f32.mrf.mxu1 }
 0x136   :  { %6695 = vst [vmem:[#allocation193_spill] sm:$0xff] %v5110_v63  ;;  %6696 = vst [vmem:[#allocation194_spill] sm:$0xff] %v5113_v54  ;;  %v5116_v30 = vadd.f32 %v547_v47, %v5044_v37  ;;  %v5119_v38 = vadd.f32 %v620_v10, %v5050_v9 }
 0x137   :  { %v549_v52 = vpop.f32.mrf.mxu0  ;;  %v622_v36 = vpop.f32.mrf.mxu1 }
 0x138   :  { %6697 = vst [vmem:[#allocation195_spill] sm:$0xff] %v5116_v30  ;;  %6698 = vst [vmem:[#allocation196_spill] sm:$0xff] %v5119_v38  ;;  %v5122_v4 = vadd.f32 %v549_v52, %v5036_v55  ;;  %v5125_v3 = vadd.f32 %v622_v36, %v5041_v61  ;;  %v370_v36 = vadd.f32 %v4886_v46, %v4899_v23 }
 0x139   :  { %v551_v63 = vpop.f32.mrf.mxu0  ;;  %v624_v54 = vpop.f32.mrf.mxu1 }
 0x13a   :  { %6699 = vst [vmem:[#allocation197_spill] sm:$0xff] %v5122_v4  ;;  %6700 = vst [vmem:[#allocation198_spill] sm:$0xff] %v5125_v3  ;;  %v5128_v2 = vadd.f32 %v551_v63, %v5044_v37  ;;  %v5131_v47 = vadd.f32 %v624_v54, %v5050_v9  ;;  %v443_v3 = vadd.f32 %v4889_v60, %v4905_v20 }
 0x13b   :  { %v372_v63 = vadd.f32 %v4893_v39, %v4908_v19  ;;  %v445_v54 = vadd.f32 %v4901_v21, %v4915_v28  ;;  %v516_v21 = vadd.f32 %v5026_v12, %v5036_v55 }
 0x13c   :  { %6701 = vst [vmem:[#allocation199_spill] sm:$0xff] %v5128_v2  ;;  %6702 = vst [vmem:[#allocation200_spill] sm:$0xff] %v5131_v47 }
 0x15b   :  { %v1501_v30 = vpop.f32.mrf.mxu0  ;;  %v1542_v18 = vpop.f32.mrf.mxu1 }
 0x15c   :  { %v1631_v2 = vadd.f32 %v1501_v30, %v370_v36  ;;  %v1633_v47 = vadd.f32 %v1542_v18, %v443_v3  ;;  %v589_v18 = vadd.f32 %v5029_v22, %v5041_v61 }
 0x15d   :  { %v1503_v10 = vpop.f32.mrf.mxu0  ;;  %v1544_v38 = vpop.f32.mrf.mxu1 }
 0x15e   :  { %v1632_v58 = vadd.f32 %v1503_v10, %v372_v63  ;;  %v1634_v57 = vadd.f32 %v1544_v38, %v445_v54 }
 0x15f   :  { %v1505_v1 = vpop.f32.mrf.mxu0  ;;  %v1546_v59 = vpop.f32.mrf.mxu1 }
 0x160   :  { %v3752_v1 = vmul.f32 -1.442695, %v1631_v2  ;;  %v3754_v59 = vmul.f32 -1.442695, %v1633_v47  ;;  %v591_v2 = vadd.f32 %v5038_v11, %v5050_v9 }
 0x161   :  { %v1506_v52 = vpop.f32.mrf.mxu0  ;;  %v1547_v4 = vpop.f32.mrf.mxu1 }
 0x162   :  { %v3753_v52 = vmul.f32 -1.442695, %v1632_v58  ;;  %v3755_v4 = vmul.f32 -1.442695, %v1634_v57  ;;  %3902 = vpow2.f32 %v3752_v1  ;;  %v518_v58 = vadd.f32 %v5032_v53, %v5044_v37 }
 0x163   :  { %3904 = vpow2.f32 %v3754_v59 }
 0x164   :  { %3906 = vpow2.f32 %v3753_v52 }
 0x165   :  { %3908 = vpow2.f32 %v3755_v4 }
 0x16f   :  { %v3903_v23 = vpop.eup %3902 }
 0x170   :  { %v3905_v20 = vpop.eup %3904  ;;  %v1657_v19 = vadd.f32 1.0, %v3903_v23 }
 0x171   :  { %v3907_v46 = vpop.eup %3906  ;;  %v1659_v39 = vadd.f32 1.0, %v3905_v20 }
 0x172   :  { %v3909_v60 = vpop.eup %3908  ;;  %v1658_v30 = vadd.f32 1.0, %v3907_v46  ;;  %3910 = vrcp.f32 %v1657_v19 }
 0x173   :  { %v1660_v28 = vadd.f32 1.0, %v3909_v60  ;;  %3912 = vrcp.f32 %v1659_v39 }
 0x174   :  { %3914 = vrcp.f32 %v1658_v30 }
 0x175   :  { %3916 = vrcp.f32 %v1660_v28 }
 0x17f   :  { %v3911_v1 = vpop.eup %3910 }
 0x180   :  { %v3913_v59 = vpop.eup %3912 }
 0x181   :  { %v3915_v9 = vpop.eup %3914  ;;  %v1677_v23 = vmul.f32 0.0, %v3913_v59  ;;  %v6712_v59 = vld [vmem:[#allocation92_spill] sm:$0xff] }
 0x182   :  { %v3917_v11 = vpop.eup %3916 }
 0x183   :  { %v1678_v39 = vmul.f32 0.0, %v3917_v11  ;;  %v6714_v11 = vld [vmem:[#allocation94_spill] sm:$0xff] }
 0x19b   :  { %v1583_v57 = vpop.f32.mrf.mxu0  ;;  %v1624_v3 = vpop.f32.mrf.mxu1 }
 0x19c   :  { %v1635_v38 = vadd.f32 %v1583_v57, %v516_v21  ;;  %v1637_v47 = vadd.f32 %v1624_v3, %v589_v18 }
 0x19d   :  { %v1585_v10 = vpop.f32.mrf.mxu0  ;;  %v1626_v36 = vpop.f32.mrf.mxu1 }
 0x19e   :  { %v3756_v55 = vmul.f32 -1.442695, %v1635_v38  ;;  %v1636_v12 = vadd.f32 %v1585_v10, %v518_v58  ;;  %3918 = vtanh.f32 %v1637_v47  ;;  %v1638_v22 = vadd.f32 %v1626_v36, %v591_v2  ;;  %v6704_v36 = vld [vmem:[#allocation84_spill] sm:$0xff] }
 0x19f   :  { %v1587_v61 = vpop.f32.mrf.mxu0  ;;  %v1628_v54 = vpop.f32.mrf.mxu1 }
 0x1a0   :  { %3920 = vpow2.f32 %v3756_v55  ;;  %v3757_v63 = vmul.f32 -1.442695, %v1636_v12  ;;  %v6703_v12 = vld [vmem:[#allocation83_spill] sm:$0xff]  ;;  %v6706_v61 = vld [vmem:[#allocation86_spill] sm:$0xff]  ;;  %v6708_v54 = vld [vmem:[#allocation88_spill] sm:$0xff] }
 0x1a1   :  { %3922 = vtanh.f32 %v1638_v22  ;;  %v1588_v37 = vpop.f32.mrf.mxu0  ;;  %v1629_v53 = vpop.f32.mrf.mxu1  ;;  %v6705_v22 = vld [vmem:[#allocation85_spill] sm:$0xff] }
 0x1a2   :  { %3924 = vpow2.f32 %v3757_v63  ;;  %v6707_v63 = vld [vmem:[#allocation87_spill] sm:$0xff]  ;;  %v6709_v37 = vld [vmem:[#allocation89_spill] sm:$0xff]  ;;  %v6710_v53 = vld [vmem:[#allocation90_spill] sm:$0xff] }
 0x1ab   :  { %v3919_v52 = vpop.eup %3918 }
 0x1ac   :  { %v1679_v20 = vmul.f32 %v3919_v52, %v3911_v1  ;;  %v6711_v1 = vld [vmem:[#allocation91_spill] sm:$0xff] }
 0x1ad   :  { %v3921_v4 = vpop.eup %3920  ;;  %v6715_v52 = vld [vmem:[#allocation95_spill] sm:$0xff] }
 0x1ae   :  { %v3923_v46 = vpop.eup %3922  ;;  %v1661_v60 = vadd.f32 1.0, %v3921_v4  ;;  %v5149_v30 = vadd.f32 %v1679_v20, %v1677_v23  ;;  %v6716_v4 = vld [vmem:[#allocation96_spill] sm:$0xff]  ;;  %v6717_v23 = vld [vmem:[#allocation97_spill] sm:$0xff]  ;;  %v6718_v20 = vld [vmem:[#allocation98_spill] sm:$0xff] }
 0x1af   :  { %v3925_v19 = vpop.eup %3924  ;;  %v1680_v21 = vmul.f32 %v3923_v46, %v3915_v9  ;;  %v6713_v9 = vld [vmem:[#allocation93_spill] sm:$0xff]  ;;  %v6719_v46 = vld [vmem:[#allocation99_spill] sm:$0xff] }
 0x1b0   :  { %3926 = vrcp.f32 %v1661_v60  ;;  %v1662_v28 = vadd.f32 1.0, %v3925_v19  ;;  %v6720_v60 = vld [vmem:[#allocation100_spill] sm:$0xff]  ;;  %v6721_v19 = vld [vmem:[#allocation101_spill] sm:$0xff] }
 0x1b1   :  { %3928 = vtanh.f32 %v5149_v30  ;;  %v5152_v18 = vadd.f32 %v1680_v21, %v1678_v39  ;;  %v6722_v39 = vld [vmem:[#allocation102_spill] sm:$0xff]  ;;  %v6723_v21 = vld [vmem:[#allocation103_spill] sm:$0xff] }
 0x1b2   :  { %3930 = vrcp.f32 %v1662_v28  ;;  %v6724_v28 = vld [vmem:[#allocation104_spill] sm:$0xff] }
 0x1b3   :  { %3932 = vtanh.f32 %v5152_v18 }
 0x1bd   :  { %v3927_v57 = vpop.eup %3926 }
 0x1be   :  { %v3929_v58 = vpop.eup %3928 }
 0x1bf   :  { %v3931_v38 = vpop.eup %3930  ;;  %v1685_v2 = vmul.f32 %v3929_v58, %v3927_v57  ;;  %v6725_v57 = vld [vmem:[#allocation105_spill] sm:$0xff]  ;;  %v6726_v58 = vld [vmem:[#allocation106_spill] sm:$0xff] }
 0x1c0   :  { %v3933_v3 = vpop.eup %3932 }
 0x1c1   :  { %v1686_v47 = vmul.f32 %v3933_v3, %v3931_v38  ;;  %v5155_v55 = vpack.c.bf16 %v1685_v2, %v1685_v2  ;;  %v6727_v38 = vld [vmem:[#allocation107_spill] sm:$0xff]  ;;  %v6728_v3 = vld [vmem:[#allocation108_spill] sm:$0xff]  ;;  %v6729_v2 = vld [vmem:[#allocation109_spill] sm:$0xff] }
 0x1c3   :  { %v1696_v10 = vpack.c.bf16 %v1686_v47, %v1686_v47  ;;  %v6730_v47 = vld [vmem:[#allocation110_spill] sm:$0xff] }
 0x1c5   :  { %1729 = vmatprep.mubr.bf16.mxu0 %v1696_v10  ;;  %1770 = vmatprep.mubr.bf16.mxu1 %v1696_v10 }
 0x1c6   :  { %1730 = vmatmul.mubr.bf16.vlgmr.msra.gmra.mxu0 %v5155_v55  ;;  %1771 = vmatmul.mubr.bf16.vlgmr.msra.gmra.mxu1 %v5155_v55 }
 0x1c7   :  { %1780 = vmatpush1.bf16.msra.mxu0 %v6703_v12  ;;  %1821 = vmatpush1.bf16.msra.mxu1 %v6704_v36 }
 0x1c8   :  { %1811 = vmatprep.mubr.bf16.mxu0 %v1696_v10  ;;  %1852 = vmatprep.mubr.bf16.mxu1 %v1696_v10  ;;  %v6731_v10 = vld [vmem:[#allocation111_spill] sm:$0xff] }
 0x1c9   :  { %1781 = vmatprep.subr.bf16.mxu0 %v6705_v22  ;;  %1822 = vmatprep.subr.bf16.mxu1 %v6706_v61 }
 0x1cb   :  { %1782 = vmatpush1.bf16.msra.mxu0 %v6707_v63  ;;  %1823 = vmatpush1.bf16.msra.mxu1 %v6708_v54 }
 0x1cc   :  { %1783 = vmatprep.subr.bf16.mxu0 %v6709_v37  ;;  %1824 = vmatprep.subr.bf16.mxu1 %v6710_v53 }
 0x1cf   :  { %1784 = vmatpush1.bf16.msra.mxu0 %v6711_v1  ;;  %1825 = vmatpush1.bf16.msra.mxu1 %v6712_v59 }
 0x1d0   :  { %1785 = vmatprep.subr.bf16.mxu0 %v6713_v9  ;;  %1826 = vmatprep.subr.bf16.mxu1 %v6714_v11 }
 0x1d3   :  { %1786 = vmatpush1.bf16.msra.mxu0 %v6715_v52  ;;  %1827 = vmatpush1.bf16.msra.mxu1 %v6716_v4 }
 0x1d4   :  { %1787 = vmatprep.subr.bf16.mxu0 %v6717_v23  ;;  %1828 = vmatprep.subr.bf16.mxu1 %v6718_v20 }
 0x1d7   :  { %1788 = vmatpush1.bf16.msra.mxu0 %v6719_v46  ;;  %1829 = vmatpush1.bf16.msra.mxu1 %v6720_v60 }
 0x1d8   :  { %1789 = vmatprep.subr.bf16.mxu0 %v6721_v19  ;;  %1830 = vmatprep.subr.bf16.mxu1 %v6722_v39  ;;  %v6732_v19 = vld [vmem:[#allocation112_spill] sm:$0xff]  ;;  %v6733_v39 = vld [vmem:[#allocation113_spill] sm:$0xff] }
 0x1db   :  { %1790 = vmatpush1.bf16.msra.mxu0 %v6723_v21  ;;  %1831 = vmatpush1.bf16.msra.mxu1 %v6724_v28  ;;  %v6734_v21 = vld [vmem:[#allocation114_spill] sm:$0xff]  ;;  %v6735_v28 = vld [vmem:[#allocation115_spill] sm:$0xff] }
 0x1dc   :  { %1791 = vmatprep.subr.bf16.mxu0 %v6725_v57  ;;  %1832 = vmatprep.subr.bf16.mxu1 %v6726_v58  ;;  %v6736_v57 = vld [vmem:[#allocation116_spill] sm:$0xff]  ;;  %v6737_v58 = vld [vmem:[#allocation117_spill] sm:$0xff] }
 0x1df   :  { %1792 = vmatpush1.bf16.msra.mxu0 %v6727_v38  ;;  %1833 = vmatpush1.bf16.msra.mxu1 %v6728_v3  ;;  %v6738_v38 = vld [vmem:[#allocation118_spill] sm:$0xff]  ;;  %v6739_v3 = vld [vmem:[#allocation119_spill] sm:$0xff] }
 0x1e0   :  { %1793 = vmatprep.subr.bf16.mxu0 %v6729_v2  ;;  %1834 = vmatprep.subr.bf16.mxu1 %v6730_v47  ;;  %v6740_v2 = vld [vmem:[#allocation120_spill] sm:$0xff]  ;;  %v6741_v47 = vld [vmem:[#allocation121_spill] sm:$0xff] }
 0x1e3   :  { %1794 = vmatpush1.bf16.msra.mxu0 %v6731_v10  ;;  %1835 = vmatpush1.bf16.msra.mxu1 %v6732_v19  ;;  %v6742_v10 = vld [vmem:[#allocation122_spill] sm:$0xff]  ;;  %v6743_v19 = vld [vmem:[#allocation123_spill] sm:$0xff] }
 0x1e4   :  { %1795 = vmatprep.subr.bf16.mxu0 %v6733_v39  ;;  %1836 = vmatprep.subr.bf16.mxu1 %v6734_v21  ;;  %v6744_v39 = vld [vmem:[#allocation124_spill] sm:$0xff]  ;;  %v6745_v21 = vld [vmem:[#allocation125_spill] sm:$0xff] }
 0x1e7   :  { %1796 = vmatpush2.bf16.msra.mxu0 %v6735_v28  ;;  %1837 = vmatpush2.bf16.msra.mxu1 %v6736_v57  ;;  %v6746_v28 = vld [vmem:[#allocation126_spill] sm:$0xff]  ;;  %v6747_v57 = vld [vmem:[#allocation127_spill] sm:$0xff] }
 0x1e8   :  { %1797 = vmatprep.subr.bf16.mxu0 %v6737_v58  ;;  %1838 = vmatprep.subr.bf16.mxu1 %v6738_v38  ;;  %v6748_v58 = vld [vmem:[#allocation128_spill] sm:$0xff]  ;;  %v6749_v38 = vld [vmem:[#allocation129_spill] sm:$0xff] }
 0x1eb   :  { %1798 = vmatpush2.bf16.msra.mxu0 %v6739_v3  ;;  %1839 = vmatpush2.bf16.msra.mxu1 %v6740_v2  ;;  %v6750_v3 = vld [vmem:[#allocation130_spill] sm:$0xff] }
 0x1ec   :  { %1799 = vmatprep.subr.bf16.mxu0 %v6741_v47  ;;  %1840 = vmatprep.subr.bf16.mxu1 %v6742_v10 }
 0x1ef   :  { %1800 = vmatpush2.bf16.msra.mxu0 %v6743_v19  ;;  %1841 = vmatpush2.bf16.msra.mxu1 %v6744_v39  ;;  %v6751_v19 = vld [vmem:[#allocation134_spill] sm:$0xff] }
 0x1f0   :  { %1801 = vmatprep.subr.bf16.mxu0 %v6745_v21  ;;  %1842 = vmatprep.subr.bf16.mxu1 %v6746_v28 }
 0x1f3   :  { %1802 = vmatpush2.bf16.msra.mxu0 %v6747_v57  ;;  %1843 = vmatpush2.bf16.msra.mxu1 %v6748_v58 }
 0x1f4   :  { %1803 = vmatprep.subr.bf16.mxu0 %v6749_v38  ;;  %1844 = vmatprep.subr.bf16.mxu1 %v6750_v3 }
 0x1f7   :  { %1804 = vmatpush2.bf16.msra.mxu0 %v4797_v8  ;;  %1845 = vmatpush2.bf16.msra.mxu1 %v4801_v13 }
 0x1f8   :  { %1805 = vmatprep.subr.bf16.mxu0 %v4803_v15  ;;  %1846 = vmatprep.subr.bf16.mxu1 %v6751_v19 }
 0x1fb   :  { %1806 = vmatpush2.bf16.msra.mxu0 %v4809_v31  ;;  %1847 = vmatpush2.bf16.msra.mxu1 %v4813_v45 }
 0x1fc   :  { %1807 = vmatprep.subr.bf16.mxu0 %v4815_v44  ;;  %1848 = vmatprep.subr.bf16.mxu1 %v4818_v0 }
 0x1ff   :  { %1808 = vmatpush2.bf16.msra.mxu0 %v4821_v6  ;;  %1849 = vmatpush2.bf16.msra.mxu1 %v4825_v62 }
 0x200   :  { %1809 = vmatprep.subr.bf16.mxu0 %v4827_v7  ;;  %1850 = vmatprep.subr.bf16.mxu1 %v4830_v29 }
 0x203   :  { %1810 = vmatpush2.bf16.msra.mxu0 %v4833_v17  ;;  %1851 = vmatpush2.bf16.msra.mxu1 %v4837_v5 }
 0x204   :  { %1927 = vmatprep.subr.bf16.mxu0 %v4408_v14  ;;  %1968 = vmatprep.subr.bf16.mxu1 %v4412_v16 }
 0x206   :  { %1812 = vmatmul.mubr.bf16.vlgmr.msra.gmra.mxu0 %v5155_v55  ;;  %1853 = vmatmul.mubr.bf16.vlgmr.msra.gmra.mxu1 %v5155_v55  ;;  %v6752_v55 = vld [vmem:[#allocation36_spill] sm:$0xff] }
 0x207   :  { %1928 = vmatpush1.bf16.msra.mxu0 %v4436_v24  ;;  %1969 = vmatpush1.bf16.msra.mxu1 %v4438_v25  ;;  %v6801_v25 = vld [vmem:[#allocation147_spill] sm:$0xff] }
 0x208   :  { %1929 = vmatprep.subr.bf16.mxu0 %v4440_v26  ;;  %1970 = vmatprep.subr.bf16.mxu1 %v4442_v27  ;;  %v6799_v27 = vld [vmem:[#allocation145_spill] sm:$0xff]  ;;  %v6800_v26 = vld [vmem:[#allocation146_spill] sm:$0xff] }
 0x20b   :  { %1930 = vmatpush1.bf16.msra.mxu0 %v4449_v32  ;;  %1971 = vmatpush1.bf16.msra.mxu1 %v4453_v33 }
 0x20c   :  { %1931 = vmatprep.subr.bf16.mxu0 %v4455_v34  ;;  %1972 = vmatprep.subr.bf16.mxu1 %v4458_v35  ;;  %v6753_v35 = vld [vmem:[#allocation37_spill] sm:$0xff] }
 0x20f   :  { %1932 = vmatpush1.bf16.msra.mxu0 %v4463_v40  ;;  %1973 = vmatpush1.bf16.msra.mxu1 %v4467_v41  ;;  %v6754_v40 = vld [vmem:[#allocation38_spill] sm:$0xff]  ;;  %v6755_v41 = vld [vmem:[#allocation39_spill] sm:$0xff] }
 0x210   :  { %1933 = vmatprep.subr.bf16.mxu0 %v4469_v42  ;;  %1974 = vmatprep.subr.bf16.mxu1 %v4472_v43  ;;  %v6756_v42 = vld [vmem:[#allocation40_spill] sm:$0xff]  ;;  %v6757_v43 = vld [vmem:[#allocation41_spill] sm:$0xff] }
 0x213   :  { %1934 = vmatpush1.bf16.msra.mxu0 %v4477_v48  ;;  %1975 = vmatpush1.bf16.msra.mxu1 %v4483_v49  ;;  %v6758_v48 = vld [vmem:[#allocation42_spill] sm:$0xff]  ;;  %v6759_v49 = vld [vmem:[#allocation43_spill] sm:$0xff] }
 0x214   :  { %1935 = vmatprep.subr.bf16.mxu0 %v4485_v50  ;;  %1976 = vmatprep.subr.bf16.mxu1 %v4488_v51  ;;  %v6760_v50 = vld [vmem:[#allocation44_spill] sm:$0xff]  ;;  %v6761_v51 = vld [vmem:[#allocation45_spill] sm:$0xff] }
 0x217   :  { %1936 = vmatpush1.bf16.msra.mxu0 %v4493_v56  ;;  %1977 = vmatpush1.bf16.msra.mxu1 %v6752_v55  ;;  %v6762_v56 = vld [vmem:[#allocation46_spill] sm:$0xff]  ;;  %v6763_v55 = vld [vmem:[#allocation47_spill] sm:$0xff] }
 0x218   :  { %1937 = vmatprep.subr.bf16.mxu0 %v6753_v35  ;;  %1978 = vmatprep.subr.bf16.mxu1 %v6754_v40  ;;  %v6764_v35 = vld [vmem:[#allocation48_spill] sm:$0xff]  ;;  %v6765_v40 = vld [vmem:[#allocation49_spill] sm:$0xff] }
 0x21b   :  { %1938 = vmatpush1.bf16.msra.mxu0 %v6755_v41  ;;  %1979 = vmatpush1.bf16.msra.mxu1 %v6756_v42  ;;  %v6766_v41 = vld [vmem:[#allocation50_spill] sm:$0xff]  ;;  %v6767_v42 = vld [vmem:[#allocation51_spill] sm:$0xff] }
 0x21c   :  { %1939 = vmatprep.subr.bf16.mxu0 %v6757_v43  ;;  %1980 = vmatprep.subr.bf16.mxu1 %v6758_v48  ;;  %v6768_v43 = vld [vmem:[#allocation52_spill] sm:$0xff]  ;;  %v6769_v48 = vld [vmem:[#allocation53_spill] sm:$0xff] }
 0x21f   :  { %1940 = vmatpush1.bf16.msra.mxu0 %v6759_v49  ;;  %1981 = vmatpush1.bf16.msra.mxu1 %v6760_v50  ;;  %v6770_v49 = vld [vmem:[#allocation54_spill] sm:$0xff]  ;;  %v6771_v50 = vld [vmem:[#allocation55_spill] sm:$0xff] }
 0x220   :  { %1941 = vmatprep.subr.bf16.mxu0 %v6761_v51  ;;  %1982 = vmatprep.subr.bf16.mxu1 %v6762_v56  ;;  %v6772_v51 = vld [vmem:[#allocation56_spill] sm:$0xff]  ;;  %v6773_v56 = vld [vmem:[#allocation57_spill] sm:$0xff] }
 0x223   :  { %1942 = vmatpush1.bf16.msra.mxu0 %v6763_v55  ;;  %1983 = vmatpush1.bf16.msra.mxu1 %v6764_v35  ;;  %v6774_v55 = vld [vmem:[#allocation58_spill] sm:$0xff]  ;;  %v6775_v35 = vld [vmem:[#allocation59_spill] sm:$0xff] }
 0x224   :  { %1943 = vmatprep.subr.bf16.mxu0 %v6765_v40  ;;  %1984 = vmatprep.subr.bf16.mxu1 %v6766_v41  ;;  %v6776_v40 = vld [vmem:[#allocation60_spill] sm:$0xff]  ;;  %v6777_v41 = vld [vmem:[#allocation61_spill] sm:$0xff] }
 0x227   :  { %1944 = vmatpush2.bf16.msra.mxu0 %v6767_v42  ;;  %1985 = vmatpush2.bf16.msra.mxu1 %v6768_v43  ;;  %v6778_v42 = vld [vmem:[#allocation62_spill] sm:$0xff]  ;;  %v6779_v43 = vld [vmem:[#allocation63_spill] sm:$0xff] }
 0x228   :  { %1945 = vmatprep.subr.bf16.mxu0 %v6769_v48  ;;  %1986 = vmatprep.subr.bf16.mxu1 %v6770_v49  ;;  %v6780_v48 = vld [vmem:[#allocation64_spill] sm:$0xff]  ;;  %v6781_v49 = vld [vmem:[#allocation65_spill] sm:$0xff] }
 0x22b   :  { %1946 = vmatpush2.bf16.msra.mxu0 %v6771_v50  ;;  %1987 = vmatpush2.bf16.msra.mxu1 %v6772_v51  ;;  %v6782_v50 = vld [vmem:[#allocation66_spill] sm:$0xff]  ;;  %v6783_v51 = vld [vmem:[#allocation67_spill] sm:$0xff] }
 0x22c   :  { %1947 = vmatprep.subr.bf16.mxu0 %v6773_v56  ;;  %1988 = vmatprep.subr.bf16.mxu1 %v6774_v55  ;;  %v6784_v56 = vld [vmem:[#allocation68_spill] sm:$0xff]  ;;  %v6785_v55 = vld [vmem:[#allocation69_spill] sm:$0xff] }
 0x22f   :  { %1948 = vmatpush2.bf16.msra.mxu0 %v6775_v35  ;;  %1989 = vmatpush2.bf16.msra.mxu1 %v6776_v40  ;;  %v6786_v35 = vld [vmem:[#allocation70_spill] sm:$0xff]  ;;  %v6787_v40 = vld [vmem:[#allocation71_spill] sm:$0xff] }
 0x230   :  { %1949 = vmatprep.subr.bf16.mxu0 %v6777_v41  ;;  %1990 = vmatprep.subr.bf16.mxu1 %v6778_v42  ;;  %v6788_v41 = vld [vmem:[#allocation72_spill] sm:$0xff]  ;;  %v6789_v42 = vld [vmem:[#allocation73_spill] sm:$0xff] }
 0x233   :  { %1950 = vmatpush2.bf16.msra.mxu0 %v6779_v43  ;;  %1991 = vmatpush2.bf16.msra.mxu1 %v6780_v48  ;;  %v6790_v43 = vld [vmem:[#allocation74_spill] sm:$0xff]  ;;  %v6791_v48 = vld [vmem:[#allocation75_spill] sm:$0xff] }
 0x234   :  { %1951 = vmatprep.subr.bf16.mxu0 %v6781_v49  ;;  %1992 = vmatprep.subr.bf16.mxu1 %v6782_v50  ;;  %v6792_v49 = vld [vmem:[#allocation76_spill] sm:$0xff]  ;;  %v6793_v50 = vld [vmem:[#allocation77_spill] sm:$0xff] }
 0x237   :  { %1952 = vmatpush2.bf16.msra.mxu0 %v6783_v51  ;;  %1993 = vmatpush2.bf16.msra.mxu1 %v6784_v56  ;;  %v6794_v51 = vld [vmem:[#allocation78_spill] sm:$0xff]  ;;  %v6795_v56 = vld [vmem:[#allocation79_spill] sm:$0xff] }
 0x238   :  { %1953 = vmatprep.subr.bf16.mxu0 %v6785_v55  ;;  %1994 = vmatprep.subr.bf16.mxu1 %v6786_v35  ;;  %v6796_v55 = vld [vmem:[#allocation80_spill] sm:$0xff]  ;;  %v6797_v35 = vld [vmem:[#allocation81_spill] sm:$0xff] }
 0x23b   :  { %1954 = vmatpush2.bf16.msra.mxu0 %v6787_v40  ;;  %1995 = vmatpush2.bf16.msra.mxu1 %v6788_v41  ;;  %v6798_v40 = vld [vmem:[#allocation82_spill] sm:$0xff] }
 0x23c   :  { %1955 = vmatprep.subr.bf16.mxu0 %v6789_v42  ;;  %1996 = vmatprep.subr.bf16.mxu1 %v6790_v43 }
 0x23f   :  { %1956 = vmatpush2.bf16.msra.mxu0 %v6791_v48  ;;  %1997 = vmatpush2.bf16.msra.mxu1 %v6792_v49 }
 0x240   :  { %1957 = vmatprep.subr.bf16.mxu0 %v6793_v50  ;;  %1998 = vmatprep.subr.bf16.mxu1 %v6794_v51 }
 0x243   :  { %1958 = vmatpush2.bf16.msra.mxu0 %v6795_v56  ;;  %1999 = vmatpush2.bf16.msra.mxu1 %v6796_v55  ;;  %v6802_v55 = vld [vmem:[#allocation148_spill] sm:$0xff] }
 0x244   :  { %2009 = vmatprep.subr.bf16.mxu0 %v6797_v35  ;;  %2050 = vmatprep.subr.bf16.mxu1 %v6798_v40 }
 0x286   :  { %v1731_v41 = vpop.f32.mrf.mxu0  ;;  %v1772_v42 = vpop.f32.mrf.mxu1 }
 0x287   :  { %v1861_v50 = vadd.f32 %v1731_v41, %v6799_v27  ;;  %v1863_v51 = vadd.f32 %v1772_v42, %v6800_v26  ;;  %v6803_v42 = vld [vmem:[#allocation173_spill] sm:$0xff] }
 0x288   :  { %v1733_v34 = vpop.f32.mrf.mxu0  ;;  %v1774_v43 = vpop.f32.mrf.mxu1 }
 0x289   :  { %v1862_v56 = vadd.f32 %v1733_v34, %v6801_v25  ;;  %v3758_v24 = vmul.f32 -1.442695, %v1861_v50  ;;  %v1864_v16 = vadd.f32 %v1774_v43, %v6802_v55  ;;  %v3760_v35 = vmul.f32 -1.442695, %v1863_v51  ;;  %v6804_v50 = vld [vmem:[#allocation174_spill] sm:$0xff] }
 0x28a   :  { %v1735_v33 = vpop.f32.mrf.mxu0  ;;  %v1776_v48 = vpop.f32.mrf.mxu1 }
 0x28b   :  { %v3759_v14 = vmul.f32 -1.442695, %v1862_v56  ;;  %3934 = vpow2.f32 %v3758_v24  ;;  %v3761_v40 = vmul.f32 -1.442695, %v1864_v16  ;;  %v6806_v56 = vld [vmem:[#allocation176_spill] sm:$0xff] }
 0x28c   :  { %v1736_v32 = vpop.f32.mrf.mxu0  ;;  %v1777_v49 = vpop.f32.mrf.mxu1  ;;  %3936 = vpow2.f32 %v3760_v35 }
 0x28d   :  { %3938 = vpow2.f32 %v3759_v14 }
 0x28e   :  { %3940 = vpow2.f32 %v3761_v40  ;;  %v6805_v40 = vld [vmem:[#allocation175_spill] sm:$0xff] }
 0x298   :  { %v3935_v33 = vpop.eup %3934 }
 0x299   :  { %v3937_v48 = vpop.eup %3936  ;;  %v1887_v49 = vadd.f32 1.0, %v3935_v33 }
 0x29a   :  { %v3939_v32 = vpop.eup %3938  ;;  %v1889_v27 = vadd.f32 1.0, %v3937_v48 }
 0x29b   :  { %v3941_v5 = vpop.eup %3940  ;;  %v1888_v41 = vadd.f32 1.0, %v3939_v32  ;;  %3942 = vrcp.f32 %v1887_v49 }
 0x29c   :  { %v1890_v26 = vadd.f32 1.0, %v3941_v5  ;;  %3944 = vrcp.f32 %v1889_v27 }
 0x29d   :  { %3946 = vrcp.f32 %v1888_v41 }
 0x2a8   :  { %v3943_v27 = vpop.eup %3942 }
 0x2c6   :  { %v1813_v25 = vpop.f32.mrf.mxu0  ;;  %v1854_v34 = vpop.f32.mrf.mxu1 }
 0x2c7   :  { %v1865_v43 = vadd.f32 %v1813_v25, %v6803_v42  ;;  %v1867_v24 = vadd.f32 %v1854_v34, %v6804_v50  ;;  %v3945_v25 = vpop.eup %3944 }
 0x2c8   :  { %v1815_v16 = vpop.f32.mrf.mxu0  ;;  %v1856_v14 = vpop.f32.mrf.mxu1 }
 0x2c9   :  { %v3762_v35 = vmul.f32 -1.442695, %v1865_v43  ;;  %3948 = vtanh.f32 %v1867_v24  ;;  %v1866_v51 = vadd.f32 %v1815_v16, %v6805_v40  ;;  %v1868_v55 = vadd.f32 %v1856_v14, %v6806_v56  ;;  %v3947_v41 = vpop.eup %3946 }
 0x2ca   :  { %3950 = vrcp.f32 %v1890_v26  ;;  %v1817_v33 = vpop.f32.mrf.mxu0  ;;  %v1858_v48 = vpop.f32.mrf.mxu1  ;;  %v1907_v43 = vmul.f32 %v3945_v25, %v5149_v30 }
 0x2cb   :  { %3952 = vpow2.f32 %v3762_v35  ;;  %v3763_v5 = vmul.f32 -1.442695, %v1866_v51 }
 0x2cc   :  { %3954 = vtanh.f32 %v1868_v55  ;;  %v1818_v32 = vpop.f32.mrf.mxu0  ;;  %v1859_v49 = vpop.f32.mrf.mxu1 }
 0x2cd   :  { %3956 = vpow2.f32 %v3763_v5 }
 0x2d6   :  { %v3949_v34 = vpop.eup %3948 }
 0x2d7   :  { %v3951_v42 = vpop.eup %3950  ;;  %v1909_v50 = vmul.f32 %v3949_v34, %v3943_v27  ;;  %v6809_v34 = vld [vmem:[#allocation103_spill] sm:$0xff] }
 0x2d8   :  { %v3953_v24 = vpop.eup %3952  ;;  %v1908_v35 = vmul.f32 %v3951_v42, %v5152_v18  ;;  %v6807_v18 = vld [vmem:[#allocation101_spill] sm:$0xff]  ;;  %v6810_v42 = vld [vmem:[#allocation104_spill] sm:$0xff] }
 0x2d9   :  { %v3955_v16 = vpop.eup %3954  ;;  %v1891_v14 = vadd.f32 1.0, %v3953_v24  ;;  %v5298_v26 = vadd.f32 %v1909_v50, %v1907_v43  ;;  %v6811_v43 = vld [vmem:[#allocation105_spill] sm:$0xff]  ;;  %v6812_v50 = vld [vmem:[#allocation106_spill] sm:$0xff]  ;;  %v6813_v24 = vld [vmem:[#allocation107_spill] sm:$0xff] }
 0x2da   :  { %v3957_v40 = vpop.eup %3956  ;;  %v1910_v51 = vmul.f32 %v3955_v16, %v3947_v41  ;;  %v6808_v41 = vld [vmem:[#allocation102_spill] sm:$0xff]  ;;  %v6814_v16 = vld [vmem:[#allocation108_spill] sm:$0xff] }
 0x2db   :  { %3958 = vrcp.f32 %v1891_v14  ;;  %v1892_v56 = vadd.f32 1.0, %v3957_v40  ;;  %v6815_v14 = vld [vmem:[#allocation109_spill] sm:$0xff]  ;;  %v6816_v40 = vld [vmem:[#allocation110_spill] sm:$0xff] }
 0x2dc   :  { %3960 = vtanh.f32 %v5298_v26  ;;  %v5302_v55 = vadd.f32 %v1910_v51, %v1908_v35  ;;  %v6817_v35 = vld [vmem:[#allocation111_spill] sm:$0xff]  ;;  %v6818_v51 = vld [vmem:[#allocation112_spill] sm:$0xff] }
 0x2dd   :  { %3962 = vrcp.f32 %v1892_v56  ;;  %v6819_v56 = vld [vmem:[#allocation113_spill] sm:$0xff] }
 0x2de   :  { %3964 = vtanh.f32 %v5302_v55 }
 0x2e8   :  { %v3959_v30 = vpop.eup %3958 }
 0x2e9   :  { %v3961_v33 = vpop.eup %3960 }
 0x2ea   :  { %v3963_v48 = vpop.eup %3962  ;;  %v1915_v32 = vmul.f32 %v3961_v33, %v3959_v30  ;;  %v6820_v30 = vld [vmem:[#allocation114_spill] sm:$0xff]  ;;  %v6821_v33 = vld [vmem:[#allocation115_spill] sm:$0xff] }
 0x2eb   :  { %v3965_v5 = vpop.eup %3964 }
 0x2ec   :  { %v1916_v49 = vmul.f32 %v3965_v5, %v3963_v48  ;;  %v5305_v25 = vpack.c.bf16 %v1915_v32, %v1915_v32  ;;  %v6822_v48 = vld [vmem:[#allocation116_spill] sm:$0xff]  ;;  %v6823_v5 = vld [vmem:[#allocation117_spill] sm:$0xff]  ;;  %v6824_v32 = vld [vmem:[#allocation118_spill] sm:$0xff] }
 0x2ee   :  { %v1926_v27 = vpack.c.bf16 %v1916_v49, %v1916_v49  ;;  %v6825_v49 = vld [vmem:[#allocation119_spill] sm:$0xff] }
 0x2f0   :  { %1959 = vmatprep.mubr.bf16.mxu0 %v1926_v27  ;;  %2000 = vmatprep.mubr.bf16.mxu1 %v1926_v27 }
 0x2f1   :  { %1960 = vmatmul.mubr.bf16.vlgmr.msra.gmra.mxu0 %v5305_v25  ;;  %2001 = vmatmul.mubr.bf16.vlgmr.msra.gmra.mxu1 %v5305_v25 }
 0x2f2   :  { %2010 = vmatpush1.bf16.msra.mxu0 %v6703_v12  ;;  %2051 = vmatpush1.bf16.msra.mxu1 %v6704_v36 }
 0x2f3   :  { %2041 = vmatprep.mubr.bf16.mxu0 %v1926_v27  ;;  %2082 = vmatprep.mubr.bf16.mxu1 %v1926_v27  ;;  %v6826_v27 = vld [vmem:[#allocation123_spill] sm:$0xff] }
 0x2f4   :  { %2011 = vmatprep.subr.bf16.mxu0 %v6705_v22  ;;  %2052 = vmatprep.subr.bf16.mxu1 %v6706_v61 }
 0x2f6   :  { %2012 = vmatpush1.bf16.msra.mxu0 %v6707_v63  ;;  %2053 = vmatpush1.bf16.msra.mxu1 %v6708_v54 }
 0x2f7   :  { %2013 = vmatprep.subr.bf16.mxu0 %v6709_v37  ;;  %2054 = vmatprep.subr.bf16.mxu1 %v6710_v53 }
 0x2fa   :  { %2014 = vmatpush1.bf16.msra.mxu0 %v6711_v1  ;;  %2055 = vmatpush1.bf16.msra.mxu1 %v6712_v59 }
 0x2fb   :  { %2015 = vmatprep.subr.bf16.mxu0 %v6713_v9  ;;  %2056 = vmatprep.subr.bf16.mxu1 %v6714_v11 }
 0x2fe   :  { %2016 = vmatpush1.bf16.msra.mxu0 %v6715_v52  ;;  %2057 = vmatpush1.bf16.msra.mxu1 %v6716_v4 }
 0x2ff   :  { %2017 = vmatprep.subr.bf16.mxu0 %v6717_v23  ;;  %2058 = vmatprep.subr.bf16.mxu1 %v6718_v20 }
 0x302   :  { %2018 = vmatpush1.bf16.msra.mxu0 %v6719_v46  ;;  %2059 = vmatpush1.bf16.msra.mxu1 %v6720_v60 }
 0x303   :  { %2019 = vmatprep.subr.bf16.mxu0 %v6807_v18  ;;  %2060 = vmatprep.subr.bf16.mxu1 %v6808_v41 }
 0x306   :  { %2020 = vmatpush1.bf16.msra.mxu0 %v6809_v34  ;;  %2061 = vmatpush1.bf16.msra.mxu1 %v6810_v42 }
 0x307   :  { %2021 = vmatprep.subr.bf16.mxu0 %v6811_v43  ;;  %2062 = vmatprep.subr.bf16.mxu1 %v6812_v50 }
 0x30a   :  { %2022 = vmatpush1.bf16.msra.mxu0 %v6813_v24  ;;  %2063 = vmatpush1.bf16.msra.mxu1 %v6814_v16 }
 0x30b   :  { %2023 = vmatprep.subr.bf16.mxu0 %v6815_v14  ;;  %2064 = vmatprep.subr.bf16.mxu1 %v6816_v40 }
 0x30e   :  { %2024 = vmatpush1.bf16.msra.mxu0 %v6817_v35  ;;  %2065 = vmatpush1.bf16.msra.mxu1 %v6818_v51 }
 0x30f   :  { %2025 = vmatprep.subr.bf16.mxu0 %v6819_v56  ;;  %2066 = vmatprep.subr.bf16.mxu1 %v6820_v30 }
 0x312   :  { %2026 = vmatpush2.bf16.msra.mxu0 %v6821_v33  ;;  %2067 = vmatpush2.bf16.msra.mxu1 %v6822_v48 }
 0x313   :  { %2027 = vmatprep.subr.bf16.mxu0 %v6823_v5  ;;  %2068 = vmatprep.subr.bf16.mxu1 %v6824_v32 }
 0x316   :  { %2028 = vmatpush2.bf16.msra.mxu0 %v6825_v49  ;;  %2069 = vmatpush2.bf16.msra.mxu1 %v6740_v2 }
 0x317   :  { %2029 = vmatprep.subr.bf16.mxu0 %v6741_v47  ;;  %2070 = vmatprep.subr.bf16.mxu1 %v6742_v10 }
 0x31a   :  { %2030 = vmatpush2.bf16.msra.mxu0 %v6826_v27  ;;  %2071 = vmatpush2.bf16.msra.mxu1 %v6744_v39 }
 0x31b   :  { %2031 = vmatprep.subr.bf16.mxu0 %v6745_v21  ;;  %2072 = vmatprep.subr.bf16.mxu1 %v6746_v28 }
 0x31e   :  { %2032 = vmatpush2.bf16.msra.mxu0 %v6747_v57  ;;  %2073 = vmatpush2.bf16.msra.mxu1 %v6748_v58  ;;  %v6896_v58 = vld [vmem:[#allocation151_spill] sm:$0xff] }
 0x31f   :  { %2033 = vmatprep.subr.bf16.mxu0 %v6749_v38  ;;  %2074 = vmatprep.subr.bf16.mxu1 %v6750_v3  ;;  %v6894_v3 = vld [vmem:[#allocation149_spill] sm:$0xff]  ;;  %v6895_v38 = vld [vmem:[#allocation150_spill] sm:$0xff] }
 0x322   :  { %2034 = vmatpush2.bf16.msra.mxu0 %v4797_v8  ;;  %2075 = vmatpush2.bf16.msra.mxu1 %v4801_v13 }
 0x323   :  { %2035 = vmatprep.subr.bf16.mxu0 %v4803_v15  ;;  %2076 = vmatprep.subr.bf16.mxu1 %v6751_v19  ;;  %v6827_v15 = vld [vmem:[#allocation144_spill] sm:$0xff]  ;;  %v6828_v19 = vld [vmem:[#allocation17_spill] sm:$0xff] }
 0x326   :  { %2036 = vmatpush2.bf16.msra.mxu0 %v4809_v31  ;;  %2077 = vmatpush2.bf16.msra.mxu1 %v4813_v45  ;;  %v6829_v31 = vld [vmem:[#allocation18_spill] sm:$0xff] }
 0x327   :  { %2037 = vmatprep.subr.bf16.mxu0 %v4815_v44  ;;  %2078 = vmatprep.subr.bf16.mxu1 %v4818_v0  ;;  %v6830_v0 = vld [vmem:[#allocation19_spill] sm:$0xff]  ;;  %v6839_v44 = vld [vmem:[#allocation28_spill] sm:$0xff] }
 0x32a   :  { %2038 = vmatpush2.bf16.msra.mxu0 %v4821_v6  ;;  %2079 = vmatpush2.bf16.msra.mxu1 %v4825_v62  ;;  %v6831_v6 = vld [vmem:[#allocation20_spill] sm:$0xff]  ;;  %v6832_v62 = vld [vmem:[#allocation21_spill] sm:$0xff] }
 0x32b   :  { %2039 = vmatprep.subr.bf16.mxu0 %v4827_v7  ;;  %2080 = vmatprep.subr.bf16.mxu1 %v4830_v29  ;;  %v6833_v7 = vld [vmem:[#allocation22_spill] sm:$0xff]  ;;  %v6834_v29 = vld [vmem:[#allocation23_spill] sm:$0xff] }
 0x32e   :  { %2040 = vmatpush2.bf16.msra.mxu0 %v4833_v17  ;;  %2081 = vmatpush2.bf16.msra.mxu1 %v6827_v15  ;;  %v6835_v17 = vld [vmem:[#allocation24_spill] sm:$0xff]  ;;  %v6836_v15 = vld [vmem:[#allocation25_spill] sm:$0xff] }
 0x32f   :  { %2157 = vmatprep.subr.bf16.mxu0 %v6828_v19  ;;  %2198 = vmatprep.subr.bf16.mxu1 %v6829_v31  ;;  %v6837_v19 = vld [vmem:[#allocation26_spill] sm:$0xff]  ;;  %v6838_v31 = vld [vmem:[#allocation27_spill] sm:$0xff] }
 0x331   :  { %2042 = vmatmul.mubr.bf16.vlgmr.msra.gmra.mxu0 %v5305_v25  ;;  %2083 = vmatmul.mubr.bf16.vlgmr.msra.gmra.mxu1 %v5305_v25  ;;  %v6840_v25 = vld [vmem:[#allocation29_spill] sm:$0xff] }
 0x332   :  { %2158 = vmatpush1.bf16.msra.mxu0 %v6830_v0  ;;  %2199 = vmatpush1.bf16.msra.mxu1 %v6831_v6  ;;  %v6841_v0 = vld [vmem:[#allocation30_spill] sm:$0xff]  ;;  %v6842_v6 = vld [vmem:[#allocation31_spill] sm:$0xff] }
 0x333   :  { %2159 = vmatprep.subr.bf16.mxu0 %v6832_v62  ;;  %2200 = vmatprep.subr.bf16.mxu1 %v6833_v7  ;;  %v6843_v62 = vld [vmem:[#allocation32_spill] sm:$0xff]  ;;  %v6844_v7 = vld [vmem:[#allocation33_spill] sm:$0xff] }
 0x336   :  { %2160 = vmatpush1.bf16.msra.mxu0 %v6834_v29  ;;  %2201 = vmatpush1.bf16.msra.mxu1 %v6835_v17  ;;  %v6845_v29 = vld [vmem:[#allocation34_spill] sm:$0xff]  ;;  %v6846_v17 = vld [vmem:[#allocation35_spill] sm:$0xff] }
 0x337   :  { %2161 = vmatprep.subr.bf16.mxu0 %v6836_v15  ;;  %2202 = vmatprep.subr.bf16.mxu1 %v6837_v19  ;;  %v6847_v15 = vld [vmem:[#allocation36_spill] sm:$0xff]  ;;  %v6848_v19 = vld [vmem:[#allocation37_spill] sm:$0xff] }
 0x33a   :  { %2162 = vmatpush1.bf16.msra.mxu0 %v6838_v31  ;;  %2203 = vmatpush1.bf16.msra.mxu1 %v6839_v44  ;;  %v6849_v31 = vld [vmem:[#allocation38_spill] sm:$0xff]  ;;  %v6850_v44 = vld [vmem:[#allocation39_spill] sm:$0xff] }
 0x33b   :  { %2163 = vmatprep.subr.bf16.mxu0 %v6840_v25  ;;  %2204 = vmatprep.subr.bf16.mxu1 %v6841_v0  ;;  %v6851_v25 = vld [vmem:[#allocation40_spill] sm:$0xff]  ;;  %v6852_v0 = vld [vmem:[#allocation41_spill] sm:$0xff] }
 0x33e   :  { %2164 = vmatpush1.bf16.msra.mxu0 %v6842_v6  ;;  %2205 = vmatpush1.bf16.msra.mxu1 %v6843_v62  ;;  %v6853_v6 = vld [vmem:[#allocation42_spill] sm:$0xff]  ;;  %v6854_v62 = vld [vmem:[#allocation43_spill] sm:$0xff] }
 0x33f   :  { %2165 = vmatprep.subr.bf16.mxu0 %v6844_v7  ;;  %2206 = vmatprep.subr.bf16.mxu1 %v6845_v29  ;;  %v6855_v7 = vld [vmem:[#allocation44_spill] sm:$0xff]  ;;  %v6856_v29 = vld [vmem:[#allocation45_spill] sm:$0xff] }
 0x342   :  { %2166 = vmatpush1.bf16.msra.mxu0 %v6846_v17  ;;  %2207 = vmatpush1.bf16.msra.mxu1 %v6847_v15  ;;  %v6857_v17 = vld [vmem:[#allocation46_spill] sm:$0xff]  ;;  %v6858_v15 = vld [vmem:[#allocation47_spill] sm:$0xff] }
 0x343   :  { %2167 = vmatprep.subr.bf16.mxu0 %v6848_v19  ;;  %2208 = vmatprep.subr.bf16.mxu1 %v6849_v31  ;;  %v6859_v19 = vld [vmem:[#allocation48_spill] sm:$0xff]  ;;  %v6860_v31 = vld [vmem:[#allocation49_spill] sm:$0xff] }
 0x346   :  { %2168 = vmatpush1.bf16.msra.mxu0 %v6850_v44  ;;  %2209 = vmatpush1.bf16.msra.mxu1 %v6851_v25  ;;  %v6861_v44 = vld [vmem:[#allocation50_spill] sm:$0xff]  ;;  %v6862_v25 = vld [vmem:[#allocation51_spill] sm:$0xff] }
 0x347   :  { %2169 = vmatprep.subr.bf16.mxu0 %v6852_v0  ;;  %2210 = vmatprep.subr.bf16.mxu1 %v6853_v6  ;;  %v6863_v0 = vld [vmem:[#allocation52_spill] sm:$0xff]  ;;  %v6864_v6 = vld [vmem:[#allocation53_spill] sm:$0xff] }
 0x34a   :  { %2170 = vmatpush1.bf16.msra.mxu0 %v6854_v62  ;;  %2211 = vmatpush1.bf16.msra.mxu1 %v6855_v7  ;;  %v6865_v62 = vld [vmem:[#allocation54_spill] sm:$0xff]  ;;  %v6866_v7 = vld [vmem:[#allocation55_spill] sm:$0xff] }
 0x34b   :  { %2171 = vmatprep.subr.bf16.mxu0 %v6856_v29  ;;  %2212 = vmatprep.subr.bf16.mxu1 %v6857_v17  ;;  %v6867_v29 = vld [vmem:[#allocation56_spill] sm:$0xff]  ;;  %v6868_v17 = vld [vmem:[#allocation57_spill] sm:$0xff] }
 0x34e   :  { %2172 = vmatpush1.bf16.msra.mxu0 %v6858_v15  ;;  %2213 = vmatpush1.bf16.msra.mxu1 %v6859_v19  ;;  %v6869_v15 = vld [vmem:[#allocation58_spill] sm:$0xff]  ;;  %v6870_v19 = vld [vmem:[#allocation59_spill] sm:$0xff] }
 0x34f   :  { %2173 = vmatprep.subr.bf16.mxu0 %v6860_v31  ;;  %2214 = vmatprep.subr.bf16.mxu1 %v6861_v44  ;;  %v6871_v31 = vld [vmem:[#allocation60_spill] sm:$0xff]  ;;  %v6872_v44 = vld [vmem:[#allocation61_spill] sm:$0xff] }
 0x352   :  { %2174 = vmatpush2.bf16.msra.mxu0 %v6862_v25  ;;  %2215 = vmatpush2.bf16.msra.mxu1 %v6863_v0  ;;  %v6873_v25 = vld [vmem:[#allocation62_spill] sm:$0xff]  ;;  %v6874_v0 = vld [vmem:[#allocation63_spill] sm:$0xff] }
 0x353   :  { %2175 = vmatprep.subr.bf16.mxu0 %v6864_v6  ;;  %2216 = vmatprep.subr.bf16.mxu1 %v6865_v62  ;;  %v6875_v6 = vld [vmem:[#allocation64_spill] sm:$0xff]  ;;  %v6876_v62 = vld [vmem:[#allocation65_spill] sm:$0xff] }
 0x356   :  { %2176 = vmatpush2.bf16.msra.mxu0 %v6866_v7  ;;  %2217 = vmatpush2.bf16.msra.mxu1 %v6867_v29  ;;  %v6877_v7 = vld [vmem:[#allocation66_spill] sm:$0xff]  ;;  %v6878_v29 = vld [vmem:[#allocation67_spill] sm:$0xff] }
 0x357   :  { %2177 = vmatprep.subr.bf16.mxu0 %v6868_v17  ;;  %2218 = vmatprep.subr.bf16.mxu1 %v6869_v15  ;;  %v6879_v17 = vld [vmem:[#allocation68_spill] sm:$0xff]  ;;  %v6880_v15 = vld [vmem:[#allocation69_spill] sm:$0xff] }
 0x35a   :  { %2178 = vmatpush2.bf16.msra.mxu0 %v6870_v19  ;;  %2219 = vmatpush2.bf16.msra.mxu1 %v6871_v31  ;;  %v6881_v19 = vld [vmem:[#allocation70_spill] sm:$0xff]  ;;  %v6882_v31 = vld [vmem:[#allocation71_spill] sm:$0xff] }
 0x35b   :  { %2179 = vmatprep.subr.bf16.mxu0 %v6872_v44  ;;  %2220 = vmatprep.subr.bf16.mxu1 %v6873_v25  ;;  %v6883_v44 = vld [vmem:[#allocation72_spill] sm:$0xff]  ;;  %v6884_v25 = vld [vmem:[#allocation73_spill] sm:$0xff] }
 0x35e   :  { %2180 = vmatpush2.bf16.msra.mxu0 %v6874_v0  ;;  %2221 = vmatpush2.bf16.msra.mxu1 %v6875_v6  ;;  %v6885_v0 = vld [vmem:[#allocation74_spill] sm:$0xff]  ;;  %v6886_v6 = vld [vmem:[#allocation75_spill] sm:$0xff] }
 0x35f   :  { %2181 = vmatprep.subr.bf16.mxu0 %v6876_v62  ;;  %2222 = vmatprep.subr.bf16.mxu1 %v6877_v7  ;;  %v6887_v62 = vld [vmem:[#allocation76_spill] sm:$0xff]  ;;  %v6888_v7 = vld [vmem:[#allocation77_spill] sm:$0xff] }
 0x362   :  { %2182 = vmatpush2.bf16.msra.mxu0 %v6878_v29  ;;  %2223 = vmatpush2.bf16.msra.mxu1 %v6879_v17  ;;  %v6889_v29 = vld [vmem:[#allocation78_spill] sm:$0xff]  ;;  %v6890_v17 = vld [vmem:[#allocation79_spill] sm:$0xff] }
 0x363   :  { %2183 = vmatprep.subr.bf16.mxu0 %v6880_v15  ;;  %2224 = vmatprep.subr.bf16.mxu1 %v6881_v19  ;;  %v6891_v15 = vld [vmem:[#allocation80_spill] sm:$0xff]  ;;  %v6892_v19 = vld [vmem:[#allocation81_spill] sm:$0xff] }
 0x366   :  { %2184 = vmatpush2.bf16.msra.mxu0 %v6882_v31  ;;  %2225 = vmatpush2.bf16.msra.mxu1 %v6883_v44  ;;  %v6893_v31 = vld [vmem:[#allocation82_spill] sm:$0xff] }
 0x367   :  { %2185 = vmatprep.subr.bf16.mxu0 %v6884_v25  ;;  %2226 = vmatprep.subr.bf16.mxu1 %v6885_v0 }
 0x36a   :  { %2186 = vmatpush2.bf16.msra.mxu0 %v6886_v6  ;;  %2227 = vmatpush2.bf16.msra.mxu1 %v6887_v62 }
 0x36b   :  { %2187 = vmatprep.subr.bf16.mxu0 %v6888_v7  ;;  %2228 = vmatprep.subr.bf16.mxu1 %v6889_v29 }
 0x36e   :  { %2188 = vmatpush2.bf16.msra.mxu0 %v6890_v17  ;;  %2229 = vmatpush2.bf16.msra.mxu1 %v6891_v15  ;;  %v6897_v15 = vld [vmem:[#allocation152_spill] sm:$0xff] }
 0x36f   :  { %2239 = vmatprep.subr.bf16.mxu0 %v6892_v19  ;;  %2280 = vmatprep.subr.bf16.mxu1 %v6893_v31 }
 0x3b1   :  { %v1961_v44 = vpop.f32.mrf.mxu0  ;;  %v2002_v25 = vpop.f32.mrf.mxu1 }
 0x3b2   :  { %v2091_v7 = vadd.f32 %v1961_v44, %v6894_v3  ;;  %v2093_v29 = vadd.f32 %v2002_v25, %v6895_v38 }
 0x3b3   :  { %v1963_v45 = vpop.f32.mrf.mxu0  ;;  %v2004_v0 = vpop.f32.mrf.mxu1 }
 0x3b4   :  { %v2092_v17 = vadd.f32 %v1963_v45, %v6896_v58  ;;  %v3764_v57 = vmul.f32 -1.442695, %v2091_v7  ;;  %v2094_v28 = vadd.f32 %v2004_v0, %v6897_v15  ;;  %v3766_v19 = vmul.f32 -1.442695, %v2093_v29  ;;  %v6898_v15 = vld [vmem:[#allocation177_spill] sm:$0xff]  ;;  %v6901_v58 = vld [vmem:[#allocation180_spill] sm:$0xff] }
 0x3b5   :  { %v1965_v13 = vpop.f32.mrf.mxu0  ;;  %v2006_v6 = vpop.f32.mrf.mxu1 }
 0x3b6   :  { %v3765_v21 = vmul.f32 -1.442695, %v2092_v17  ;;  %3966 = vpow2.f32 %v3764_v57  ;;  %v3767_v31 = vmul.f32 -1.442695, %v2094_v28  ;;  %v6899_v17 = vld [vmem:[#allocation178_spill] sm:$0xff]  ;;  %v6900_v28 = vld [vmem:[#allocation179_spill] sm:$0xff] }
 0x3b7   :  { %v1966_v8 = vpop.f32.mrf.mxu0  ;;  %v2007_v62 = vpop.f32.mrf.mxu1  ;;  %3968 = vpow2.f32 %v3766_v19 }
 0x3b8   :  { %3970 = vpow2.f32 %v3765_v21 }
 0x3b9   :  { %3972 = vpow2.f32 %v3767_v31 }
 0x3c3   :  { %v3967_v13 = vpop.eup %3966 }
 0x3c4   :  { %v3969_v6 = vpop.eup %3968  ;;  %v2117_v62 = vadd.f32 1.0, %v3967_v13 }
 0x3c5   :  { %v3971_v8 = vpop.eup %3970  ;;  %v2119_v44 = vadd.f32 1.0, %v3969_v6 }
 0x3c6   :  { %v3973_v39 = vpop.eup %3972  ;;  %v2118_v3 = vadd.f32 1.0, %v3971_v8  ;;  %3974 = vrcp.f32 %v2117_v62 }
 0x3c7   :  { %v2120_v38 = vadd.f32 1.0, %v3973_v39  ;;  %3976 = vrcp.f32 %v2119_v44 }
 0x3c8   :  { %3978 = vrcp.f32 %v2118_v3 }
 0x3d3   :  { %v3975_v44 = vpop.eup %3974 }
 0x3f1   :  { %v2043_v45 = vpop.f32.mrf.mxu0  ;;  %v2084_v7 = vpop.f32.mrf.mxu1 }
 0x3f2   :  { %v2095_v0 = vadd.f32 %v2043_v45, %v6898_v15  ;;  %v2097_v29 = vadd.f32 %v2084_v7, %v6899_v17  ;;  %v3977_v45 = vpop.eup %3976 }
 0x3f3   :  { %v2045_v19 = vpop.f32.mrf.mxu0  ;;  %v2086_v21 = vpop.f32.mrf.mxu1 }
 0x3f4   :  { %v3768_v31 = vmul.f32 -1.442695, %v2095_v0  ;;  %3980 = vtanh.f32 %v2097_v29  ;;  %v2096_v57 = vadd.f32 %v2045_v19, %v6900_v28  ;;  %v2098_v25 = vadd.f32 %v2086_v21, %v6901_v58  ;;  %v3979_v3 = vpop.eup %3978 }
 0x3f5   :  { %3982 = vrcp.f32 %v2120_v38  ;;  %v2047_v13 = vpop.f32.mrf.mxu0  ;;  %v2088_v6 = vpop.f32.mrf.mxu1  ;;  %v2137_v0 = vmul.f32 %v3977_v45, %v5298_v26 }
 0x3f6   :  { %3984 = vpow2.f32 %v3768_v31  ;;  %v3769_v39 = vmul.f32 -1.442695, %v2096_v57 }
 0x3f7   :  { %3986 = vtanh.f32 %v2098_v25  ;;  %v2048_v8 = vpop.f32.mrf.mxu0  ;;  %v2089_v62 = vpop.f32.mrf.mxu1 }
 0x3f8   :  { %3988 = vpow2.f32 %v3769_v39 }
 0x401   :  { %v3981_v7 = vpop.eup %3980 }
 0x402   :  { %v3983_v15 = vpop.eup %3982  ;;  %v2139_v17 = vmul.f32 %v3981_v7, %v3975_v44  ;;  %v6904_v7 = vld [vmem:[#allocation126_spill] sm:$0xff] }
 0x403   :  { %v3985_v29 = vpop.eup %3984  ;;  %v2138_v31 = vmul.f32 %v3983_v15, %v5302_v55  ;;  %v6902_v55 = vld [vmem:[#allocation124_spill] sm:$0xff]  ;;  %v6905_v15 = vld [vmem:[#allocation127_spill] sm:$0xff] }
 0x404   :  { %v3987_v19 = vpop.eup %3986  ;;  %v2121_v21 = vadd.f32 1.0, %v3985_v29  ;;  %v5448_v38 = vadd.f32 %v2139_v17, %v2137_v0  ;;  %v6906_v0 = vld [vmem:[#allocation128_spill] sm:$0xff]  ;;  %v6907_v17 = vld [vmem:[#allocation129_spill] sm:$0xff]  ;;  %v6908_v29 = vld [vmem:[#allocation130_spill] sm:$0xff] }
 0x405   :  { %v3989_v28 = vpop.eup %3988  ;;  %v2140_v57 = vmul.f32 %v3987_v19, %v3979_v3  ;;  %v6903_v3 = vld [vmem:[#allocation125_spill] sm:$0xff]  ;;  %v6909_v19 = vld [vmem:[#allocation131_spill] sm:$0xff] }
 0x406   :  { %3990 = vrcp.f32 %v2121_v21  ;;  %v2122_v58 = vadd.f32 1.0, %v3989_v28  ;;  %v6910_v21 = vld [vmem:[#allocation132_spill] sm:$0xff]  ;;  %v6911_v28 = vld [vmem:[#allocation133_spill] sm:$0xff] }
 0x407   :  { %3992 = vtanh.f32 %v5448_v38  ;;  %v5452_v25 = vadd.f32 %v2140_v57, %v2138_v31  ;;  %v6912_v31 = vld [vmem:[#allocation134_spill] sm:$0xff]  ;;  %v6913_v57 = vld [vmem:[#allocation135_spill] sm:$0xff] }
 0x408   :  { %3994 = vrcp.f32 %v2122_v58  ;;  %v6914_v58 = vld [vmem:[#allocation136_spill] sm:$0xff] }
 0x409   :  { %3996 = vtanh.f32 %v5452_v25 }
 0x413   :  { %v3991_v26 = vpop.eup %3990 }
 0x414   :  { %v3993_v13 = vpop.eup %3992 }
 0x415   :  { %v3995_v6 = vpop.eup %3994  ;;  %v2145_v8 = vmul.f32 %v3993_v13, %v3991_v26  ;;  %v6915_v26 = vld [vmem:[#allocation137_spill] sm:$0xff]  ;;  %v6916_v13 = vld [vmem:[#allocation138_spill] sm:$0xff] }
 0x416   :  { %v3997_v39 = vpop.eup %3996 }
 0x417   :  { %v2146_v62 = vmul.f32 %v3997_v39, %v3995_v6  ;;  %v5455_v45 = vpack.c.bf16 %v2145_v8, %v2145_v8  ;;  %v6917_v6 = vld [vmem:[#allocation139_spill] sm:$0xff]  ;;  %v6918_v39 = vld [vmem:[#allocation140_spill] sm:$0xff]  ;;  %v6919_v8 = vld [vmem:[#allocation141_spill] sm:$0xff] }
 0x419   :  { %v2156_v44 = vpack.c.bf16 %v2146_v62, %v2146_v62  ;;  %v6920_v62 = vld [vmem:[#allocation142_spill] sm:$0xff] }
 0x41b   :  { %2189 = vmatprep.mubr.bf16.mxu0 %v2156_v44  ;;  %2230 = vmatprep.mubr.bf16.mxu1 %v2156_v44 }
 0x41c   :  { %2190 = vmatmul.mubr.bf16.vlgmr.msra.gmra.mxu0 %v5455_v45  ;;  %2231 = vmatmul.mubr.bf16.vlgmr.msra.gmra.mxu1 %v5455_v45 }
 0x41d   :  { %2240 = vmatpush1.bf16.msra.mxu0 %v6703_v12  ;;  %2281 = vmatpush1.bf16.msra.mxu1 %v6704_v36 }
 0x41e   :  { %2271 = vmatprep.mubr.bf16.mxu0 %v2156_v44  ;;  %2312 = vmatprep.mubr.bf16.mxu1 %v2156_v44  ;;  %v6921_v44 = vld [vmem:[#allocation143_spill] sm:$0xff] }
 0x41f   :  { %2241 = vmatprep.subr.bf16.mxu0 %v6705_v22  ;;  %2282 = vmatprep.subr.bf16.mxu1 %v6706_v61 }
 0x421   :  { %2242 = vmatpush1.bf16.msra.mxu0 %v6707_v63  ;;  %2283 = vmatpush1.bf16.msra.mxu1 %v6708_v54 }
 0x422   :  { %2243 = vmatprep.subr.bf16.mxu0 %v6709_v37  ;;  %2284 = vmatprep.subr.bf16.mxu1 %v6710_v53 }
 0x425   :  { %2244 = vmatpush1.bf16.msra.mxu0 %v6711_v1  ;;  %2285 = vmatpush1.bf16.msra.mxu1 %v6712_v59 }
 0x426   :  { %2245 = vmatprep.subr.bf16.mxu0 %v6713_v9  ;;  %2286 = vmatprep.subr.bf16.mxu1 %v6714_v11 }
 0x429   :  { %2246 = vmatpush1.bf16.msra.mxu0 %v6715_v52  ;;  %2287 = vmatpush1.bf16.msra.mxu1 %v6716_v4 }
 0x42a   :  { %2247 = vmatprep.subr.bf16.mxu0 %v6717_v23  ;;  %2288 = vmatprep.subr.bf16.mxu1 %v6718_v20 }
 0x42d   :  { %2248 = vmatpush1.bf16.msra.mxu0 %v6719_v46  ;;  %2289 = vmatpush1.bf16.msra.mxu1 %v6720_v60 }
 0x42e   :  { %2249 = vmatprep.subr.bf16.mxu0 %v6807_v18  ;;  %2290 = vmatprep.subr.bf16.mxu1 %v6808_v41 }
 0x431   :  { %2250 = vmatpush1.bf16.msra.mxu0 %v6809_v34  ;;  %2291 = vmatpush1.bf16.msra.mxu1 %v6810_v42 }
 0x432   :  { %2251 = vmatprep.subr.bf16.mxu0 %v6811_v43  ;;  %2292 = vmatprep.subr.bf16.mxu1 %v6812_v50 }
 0x435   :  { %2252 = vmatpush1.bf16.msra.mxu0 %v6813_v24  ;;  %2293 = vmatpush1.bf16.msra.mxu1 %v6814_v16 }
 0x436   :  { %2253 = vmatprep.subr.bf16.mxu0 %v6815_v14  ;;  %2294 = vmatprep.subr.bf16.mxu1 %v6816_v40 }
 0x439   :  { %2254 = vmatpush1.bf16.msra.mxu0 %v6817_v35  ;;  %2295 = vmatpush1.bf16.msra.mxu1 %v6818_v51 }
 0x43a   :  { %2255 = vmatprep.subr.bf16.mxu0 %v6819_v56  ;;  %2296 = vmatprep.subr.bf16.mxu1 %v6820_v30 }
 0x43d   :  { %2256 = vmatpush2.bf16.msra.mxu0 %v6821_v33  ;;  %2297 = vmatpush2.bf16.msra.mxu1 %v6822_v48 }
 0x43e   :  { %2257 = vmatprep.subr.bf16.mxu0 %v6823_v5  ;;  %2298 = vmatprep.subr.bf16.mxu1 %v6824_v32 }
 0x441   :  { %2258 = vmatpush2.bf16.msra.mxu0 %v6825_v49  ;;  %2299 = vmatpush2.bf16.msra.mxu1 %v6740_v2 }
 0x442   :  { %2259 = vmatprep.subr.bf16.mxu0 %v6741_v47  ;;  %2300 = vmatprep.subr.bf16.mxu1 %v6742_v10 }
 0x445   :  { %2260 = vmatpush2.bf16.msra.mxu0 %v6826_v27  ;;  %2301 = vmatpush2.bf16.msra.mxu1 %v6902_v55 }
 0x446   :  { %2261 = vmatprep.subr.bf16.mxu0 %v6903_v3  ;;  %2302 = vmatprep.subr.bf16.mxu1 %v6904_v7 }
 0x449   :  { %2262 = vmatpush2.bf16.msra.mxu0 %v6905_v15  ;;  %2303 = vmatpush2.bf16.msra.mxu1 %v6906_v0  ;;  %v6991_v0 = vld [vmem:[#allocation155_spill] sm:$0xff] }
 0x44a   :  { %2263 = vmatprep.subr.bf16.mxu0 %v6907_v17  ;;  %2304 = vmatprep.subr.bf16.mxu1 %v6908_v29  ;;  %v6989_v29 = vld [vmem:[#allocation153_spill] sm:$0xff]  ;;  %v6990_v17 = vld [vmem:[#allocation154_spill] sm:$0xff] }
 0x44d   :  { %2264 = vmatpush2.bf16.msra.mxu0 %v6909_v19  ;;  %2305 = vmatpush2.bf16.msra.mxu1 %v6910_v21 }
 0x44e   :  { %2265 = vmatprep.subr.bf16.mxu0 %v6911_v28  ;;  %2306 = vmatprep.subr.bf16.mxu1 %v6912_v31  ;;  %v6922_v28 = vld [vmem:[#allocation144_spill] sm:$0xff]  ;;  %v6923_v31 = vld [vmem:[#allocation17_spill] sm:$0xff] }
 0x451   :  { %2266 = vmatpush2.bf16.msra.mxu0 %v6913_v57  ;;  %2307 = vmatpush2.bf16.msra.mxu1 %v6914_v58  ;;  %v6924_v57 = vld [vmem:[#allocation18_spill] sm:$0xff] }
 0x452   :  { %2267 = vmatprep.subr.bf16.mxu0 %v6915_v26  ;;  %2308 = vmatprep.subr.bf16.mxu1 %v6916_v13  ;;  %v6925_v13 = vld [vmem:[#allocation19_spill] sm:$0xff]  ;;  %v6934_v26 = vld [vmem:[#allocation28_spill] sm:$0xff] }
 0x455   :  { %2268 = vmatpush2.bf16.msra.mxu0 %v6917_v6  ;;  %2309 = vmatpush2.bf16.msra.mxu1 %v6918_v39  ;;  %v6926_v6 = vld [vmem:[#allocation20_spill] sm:$0xff]  ;;  %v6927_v39 = vld [vmem:[#allocation21_spill] sm:$0xff] }
 0x456   :  { %2269 = vmatprep.subr.bf16.mxu0 %v6919_v8  ;;  %2310 = vmatprep.subr.bf16.mxu1 %v6920_v62  ;;  %v6928_v8 = vld [vmem:[#allocation22_spill] sm:$0xff]  ;;  %v6929_v62 = vld [vmem:[#allocation23_spill] sm:$0xff] }
 0x459   :  { %2270 = vmatpush2.bf16.msra.mxu0 %v6921_v44  ;;  %2311 = vmatpush2.bf16.msra.mxu1 %v6922_v28  ;;  %v6930_v44 = vld [vmem:[#allocation24_spill] sm:$0xff]  ;;  %v6931_v28 = vld [vmem:[#allocation25_spill] sm:$0xff] }
 0x45a   :  { %2387 = vmatprep.subr.bf16.mxu0 %v6923_v31  ;;  %2428 = vmatprep.subr.bf16.mxu1 %v6924_v57  ;;  %v6932_v31 = vld [vmem:[#allocation26_spill] sm:$0xff]  ;;  %v6933_v57 = vld [vmem:[#allocation27_spill] sm:$0xff] }
 0x45c   :  { %2272 = vmatmul.mubr.bf16.vlgmr.msra.gmra.mxu0 %v5455_v45  ;;  %2313 = vmatmul.mubr.bf16.vlgmr.msra.gmra.mxu1 %v5455_v45  ;;  %v6935_v45 = vld [vmem:[#allocation29_spill] sm:$0xff] }
 0x45d   :  { %2388 = vmatpush1.bf16.msra.mxu0 %v6925_v13  ;;  %2429 = vmatpush1.bf16.msra.mxu1 %v6926_v6  ;;  %v6936_v13 = vld [vmem:[#allocation30_spill] sm:$0xff]  ;;  %v6937_v6 = vld [vmem:[#allocation31_spill] sm:$0xff] }
 0x45e   :  { %2389 = vmatprep.subr.bf16.mxu0 %v6927_v39  ;;  %2430 = vmatprep.subr.bf16.mxu1 %v6928_v8  ;;  %v6938_v39 = vld [vmem:[#allocation32_spill] sm:$0xff]  ;;  %v6939_v8 = vld [vmem:[#allocation33_spill] sm:$0xff] }
 0x461   :  { %2390 = vmatpush1.bf16.msra.mxu0 %v6929_v62  ;;  %2431 = vmatpush1.bf16.msra.mxu1 %v6930_v44  ;;  %v6940_v62 = vld [vmem:[#allocation34_spill] sm:$0xff]  ;;  %v6941_v44 = vld [vmem:[#allocation35_spill] sm:$0xff] }
 0x462   :  { %2391 = vmatprep.subr.bf16.mxu0 %v6931_v28  ;;  %2432 = vmatprep.subr.bf16.mxu1 %v6932_v31  ;;  %v6942_v28 = vld [vmem:[#allocation36_spill] sm:$0xff]  ;;  %v6943_v31 = vld [vmem:[#allocation37_spill] sm:$0xff] }
 0x465   :  { %2392 = vmatpush1.bf16.msra.mxu0 %v6933_v57  ;;  %2433 = vmatpush1.bf16.msra.mxu1 %v6934_v26  ;;  %v6944_v57 = vld [vmem:[#allocation38_spill] sm:$0xff]  ;;  %v6945_v26 = vld [vmem:[#allocation39_spill] sm:$0xff] }
 0x466   :  { %2393 = vmatprep.subr.bf16.mxu0 %v6935_v45  ;;  %2434 = vmatprep.subr.bf16.mxu1 %v6936_v13  ;;  %v6946_v45 = vld [vmem:[#allocation40_spill] sm:$0xff]  ;;  %v6947_v13 = vld [vmem:[#allocation41_spill] sm:$0xff] }
 0x469   :  { %2394 = vmatpush1.bf16.msra.mxu0 %v6937_v6  ;;  %2435 = vmatpush1.bf16.msra.mxu1 %v6938_v39  ;;  %v6948_v6 = vld [vmem:[#allocation42_spill] sm:$0xff]  ;;  %v6949_v39 = vld [vmem:[#allocation43_spill] sm:$0xff] }
 0x46a   :  { %2395 = vmatprep.subr.bf16.mxu0 %v6939_v8  ;;  %2436 = vmatprep.subr.bf16.mxu1 %v6940_v62  ;;  %v6950_v8 = vld [vmem:[#allocation44_spill] sm:$0xff]  ;;  %v6951_v62 = vld [vmem:[#allocation45_spill] sm:$0xff] }
 0x46d   :  { %2396 = vmatpush1.bf16.msra.mxu0 %v6941_v44  ;;  %2437 = vmatpush1.bf16.msra.mxu1 %v6942_v28  ;;  %v6952_v44 = vld [vmem:[#allocation46_spill] sm:$0xff]  ;;  %v6953_v28 = vld [vmem:[#allocation47_spill] sm:$0xff] }
 0x46e   :  { %2397 = vmatprep.subr.bf16.mxu0 %v6943_v31  ;;  %2438 = vmatprep.subr.bf16.mxu1 %v6944_v57  ;;  %v6954_v31 = vld [vmem:[#allocation48_spill] sm:$0xff]  ;;  %v6955_v57 = vld [vmem:[#allocation49_spill] sm:$0xff] }
 0x471   :  { %2398 = vmatpush1.bf16.msra.mxu0 %v6945_v26  ;;  %2439 = vmatpush1.bf16.msra.mxu1 %v6946_v45  ;;  %v6956_v26 = vld [vmem:[#allocation50_spill] sm:$0xff]  ;;  %v6957_v45 = vld [vmem:[#allocation51_spill] sm:$0xff] }
 0x472   :  { %2399 = vmatprep.subr.bf16.mxu0 %v6947_v13  ;;  %2440 = vmatprep.subr.bf16.mxu1 %v6948_v6  ;;  %v6958_v13 = vld [vmem:[#allocation52_spill] sm:$0xff]  ;;  %v6959_v6 = vld [vmem:[#allocation53_spill] sm:$0xff] }
 0x475   :  { %2400 = vmatpush1.bf16.msra.mxu0 %v6949_v39  ;;  %2441 = vmatpush1.bf16.msra.mxu1 %v6950_v8  ;;  %v6960_v39 = vld [vmem:[#allocation54_spill] sm:$0xff]  ;;  %v6961_v8 = vld [vmem:[#allocation55_spill] sm:$0xff] }
 0x476   :  { %2401 = vmatprep.subr.bf16.mxu0 %v6951_v62  ;;  %2442 = vmatprep.subr.bf16.mxu1 %v6952_v44  ;;  %v6962_v62 = vld [vmem:[#allocation56_spill] sm:$0xff]  ;;  %v6963_v44 = vld [vmem:[#allocation57_spill] sm:$0xff] }
 0x479   :  { %2402 = vmatpush1.bf16.msra.mxu0 %v6953_v28  ;;  %2443 = vmatpush1.bf16.msra.mxu1 %v6954_v31  ;;  %v6964_v28 = vld [vmem:[#allocation58_spill] sm:$0xff]  ;;  %v6965_v31 = vld [vmem:[#allocation59_spill] sm:$0xff] }
 0x47a   :  { %2403 = vmatprep.subr.bf16.mxu0 %v6955_v57  ;;  %2444 = vmatprep.subr.bf16.mxu1 %v6956_v26  ;;  %v6966_v57 = vld [vmem:[#allocation60_spill] sm:$0xff]  ;;  %v6967_v26 = vld [vmem:[#allocation61_spill] sm:$0xff] }
 0x47d   :  { %2404 = vmatpush2.bf16.msra.mxu0 %v6957_v45  ;;  %2445 = vmatpush2.bf16.msra.mxu1 %v6958_v13  ;;  %v6968_v45 = vld [vmem:[#allocation62_spill] sm:$0xff]  ;;  %v6969_v13 = vld [vmem:[#allocation63_spill] sm:$0xff] }
 0x47e   :  { %2405 = vmatprep.subr.bf16.mxu0 %v6959_v6  ;;  %2446 = vmatprep.subr.bf16.mxu1 %v6960_v39  ;;  %v6970_v6 = vld [vmem:[#allocation64_spill] sm:$0xff]  ;;  %v6971_v39 = vld [vmem:[#allocation65_spill] sm:$0xff] }
 0x481   :  { %2406 = vmatpush2.bf16.msra.mxu0 %v6961_v8  ;;  %2447 = vmatpush2.bf16.msra.mxu1 %v6962_v62  ;;  %v6972_v8 = vld [vmem:[#allocation66_spill] sm:$0xff]  ;;  %v6973_v62 = vld [vmem:[#allocation67_spill] sm:$0xff] }
 0x482   :  { %2407 = vmatprep.subr.bf16.mxu0 %v6963_v44  ;;  %2448 = vmatprep.subr.bf16.mxu1 %v6964_v28  ;;  %v6974_v44 = vld [vmem:[#allocation68_spill] sm:$0xff]  ;;  %v6975_v28 = vld [vmem:[#allocation69_spill] sm:$0xff] }
 0x485   :  { %2408 = vmatpush2.bf16.msra.mxu0 %v6965_v31  ;;  %2449 = vmatpush2.bf16.msra.mxu1 %v6966_v57  ;;  %v6976_v31 = vld [vmem:[#allocation70_spill] sm:$0xff]  ;;  %v6977_v57 = vld [vmem:[#allocation71_spill] sm:$0xff] }
 0x486   :  { %2409 = vmatprep.subr.bf16.mxu0 %v6967_v26  ;;  %2450 = vmatprep.subr.bf16.mxu1 %v6968_v45  ;;  %v6978_v26 = vld [vmem:[#allocation72_spill] sm:$0xff]  ;;  %v6979_v45 = vld [vmem:[#allocation73_spill] sm:$0xff] }
 0x489   :  { %2410 = vmatpush2.bf16.msra.mxu0 %v6969_v13  ;;  %2451 = vmatpush2.bf16.msra.mxu1 %v6970_v6  ;;  %v6980_v13 = vld [vmem:[#allocation74_spill] sm:$0xff]  ;;  %v6981_v6 = vld [vmem:[#allocation75_spill] sm:$0xff] }
 0x48a   :  { %2411 = vmatprep.subr.bf16.mxu0 %v6971_v39  ;;  %2452 = vmatprep.subr.bf16.mxu1 %v6972_v8  ;;  %v6982_v39 = vld [vmem:[#allocation76_spill] sm:$0xff]  ;;  %v6983_v8 = vld [vmem:[#allocation77_spill] sm:$0xff] }
 0x48d   :  { %2412 = vmatpush2.bf16.msra.mxu0 %v6973_v62  ;;  %2453 = vmatpush2.bf16.msra.mxu1 %v6974_v44  ;;  %v6984_v62 = vld [vmem:[#allocation78_spill] sm:$0xff]  ;;  %v6985_v44 = vld [vmem:[#allocation79_spill] sm:$0xff] }
 0x48e   :  { %2413 = vmatprep.subr.bf16.mxu0 %v6975_v28  ;;  %2454 = vmatprep.subr.bf16.mxu1 %v6976_v31  ;;  %v6986_v28 = vld [vmem:[#allocation80_spill] sm:$0xff]  ;;  %v6987_v31 = vld [vmem:[#allocation81_spill] sm:$0xff] }
 0x491   :  { %2414 = vmatpush2.bf16.msra.mxu0 %v6977_v57  ;;  %2455 = vmatpush2.bf16.msra.mxu1 %v6978_v26  ;;  %v6988_v57 = vld [vmem:[#allocation82_spill] sm:$0xff] }
 0x492   :  { %2415 = vmatprep.subr.bf16.mxu0 %v6979_v45  ;;  %2456 = vmatprep.subr.bf16.mxu1 %v6980_v13 }
 0x495   :  { %2416 = vmatpush2.bf16.msra.mxu0 %v6981_v6  ;;  %2457 = vmatpush2.bf16.msra.mxu1 %v6982_v39 }
 0x496   :  { %2417 = vmatprep.subr.bf16.mxu0 %v6983_v8  ;;  %2458 = vmatprep.subr.bf16.mxu1 %v6984_v62 }
 0x499   :  { %2418 = vmatpush2.bf16.msra.mxu0 %v6985_v44  ;;  %2459 = vmatpush2.bf16.msra.mxu1 %v6986_v28  ;;  %v6992_v28 = vld [vmem:[#allocation156_spill] sm:$0xff] }
 0x49a   :  { %2469 = vmatprep.subr.bf16.mxu0 %v6987_v31  ;;  %2510 = vmatprep.subr.bf16.mxu1 %v6988_v57 }
 0x4dc   :  { %v2191_v26 = vpop.f32.mrf.mxu0  ;;  %v2232_v45 = vpop.f32.mrf.mxu1 }
 0x4dd   :  { %v2321_v8 = vadd.f32 %v2191_v26, %v6989_v29  ;;  %v2323_v62 = vadd.f32 %v2232_v45, %v6990_v17 }
 0x4de   :  { %v2193_v58 = vpop.f32.mrf.mxu0  ;;  %v2234_v13 = vpop.f32.mrf.mxu1 }
 0x4df   :  { %v2322_v44 = vadd.f32 %v2193_v58, %v6991_v0  ;;  %v3770_v15 = vmul.f32 -1.442695, %v2321_v8  ;;  %v2324_v7 = vadd.f32 %v2234_v13, %v6992_v28  ;;  %v3772_v31 = vmul.f32 -1.442695, %v2323_v62  ;;  %v6993_v28 = vld [vmem:[#allocation181_spill] sm:$0xff]  ;;  %v6994_v8 = vld [vmem:[#allocation182_spill] sm:$0xff] }
 0x4e0   :  { %v2195_v21 = vpop.f32.mrf.mxu0  ;;  %v2236_v6 = vpop.f32.mrf.mxu1 }
 0x4e1   :  { %v3771_v3 = vmul.f32 -1.442695, %v2322_v44  ;;  %3998 = vpow2.f32 %v3770_v15  ;;  %v3773_v57 = vmul.f32 -1.442695, %v2324_v7  ;;  %v6996_v44 = vld [vmem:[#allocation184_spill] sm:$0xff] }
 0x4e2   :  { %v2196_v19 = vpop.f32.mrf.mxu0  ;;  %v2237_v39 = vpop.f32.mrf.mxu1  ;;  %4000 = vpow2.f32 %v3772_v31 }
 0x4e3   :  { %4002 = vpow2.f32 %v3771_v3 }
 0x4e4   :  { %4004 = vpow2.f32 %v3773_v57  ;;  %v6995_v57 = vld [vmem:[#allocation183_spill] sm:$0xff] }
 0x4ee   :  { %v3999_v21 = vpop.eup %3998 }
 0x4ef   :  { %v4001_v6 = vpop.eup %4000  ;;  %v2347_v39 = vadd.f32 1.0, %v3999_v21 }
 0x4f0   :  { %v4003_v19 = vpop.eup %4002  ;;  %v2349_v29 = vadd.f32 1.0, %v4001_v6 }
 0x4f1   :  { %v4005_v55 = vpop.eup %4004  ;;  %v2348_v26 = vadd.f32 1.0, %v4003_v19  ;;  %4006 = vrcp.f32 %v2347_v39 }
 0x4f2   :  { %v2350_v17 = vadd.f32 1.0, %v4005_v55  ;;  %4008 = vrcp.f32 %v2349_v29 }
 0x4f3   :  { %4010 = vrcp.f32 %v2348_v26 }
 0x4fe   :  { %v4007_v29 = vpop.eup %4006 }
 0x51c   :  { %v2273_v0 = vpop.f32.mrf.mxu0  ;;  %v2314_v58 = vpop.f32.mrf.mxu1 }
 0x51d   :  { %v2325_v13 = vadd.f32 %v2273_v0, %v6993_v28  ;;  %v2327_v15 = vadd.f32 %v2314_v58, %v6994_v8  ;;  %v4009_v0 = vpop.eup %4008 }
 0x51e   :  { %v2275_v7 = vpop.f32.mrf.mxu0  ;;  %v2316_v3 = vpop.f32.mrf.mxu1 }
 0x51f   :  { %v3774_v31 = vmul.f32 -1.442695, %v2325_v13  ;;  %4012 = vtanh.f32 %v2327_v15  ;;  %v2326_v62 = vadd.f32 %v2275_v7, %v6995_v57  ;;  %v2328_v45 = vadd.f32 %v2316_v3, %v6996_v44  ;;  %v4011_v26 = vpop.eup %4010 }
 0x520   :  { %4014 = vrcp.f32 %v2350_v17  ;;  %v2277_v21 = vpop.f32.mrf.mxu0  ;;  %v2318_v6 = vpop.f32.mrf.mxu1  ;;  %v2367_v13 = vmul.f32 %v4009_v0, %v5448_v38 }
 0x521   :  { %4016 = vpow2.f32 %v3774_v31  ;;  %v3775_v55 = vmul.f32 -1.442695, %v2326_v62 }
 0x522   :  { %4018 = vtanh.f32 %v2328_v45  ;;  %v2278_v19 = vpop.f32.mrf.mxu0  ;;  %v2319_v39 = vpop.f32.mrf.mxu1 }
 0x523   :  { %4020 = vpow2.f32 %v3775_v55 }
 0x52c   :  { %v4013_v58 = vpop.eup %4012 }
 0x52d   :  { %v4015_v28 = vpop.eup %4014  ;;  %v2369_v8 = vmul.f32 %v4013_v58, %v4007_v29  ;;  %v6999_v58 = vld [vmem:[#allocation126_spill] sm:$0xff] }
 0x52e   :  { %v4017_v15 = vpop.eup %4016  ;;  %v2368_v31 = vmul.f32 %v4015_v28, %v5452_v25  ;;  %v6997_v25 = vld [vmem:[#allocation124_spill] sm:$0xff]  ;;  %v7000_v28 = vld [vmem:[#allocation127_spill] sm:$0xff] }
 0x52f   :  { %v4019_v7 = vpop.eup %4018  ;;  %v2351_v3 = vadd.f32 1.0, %v4017_v15  ;;  %v5598_v17 = vadd.f32 %v2369_v8, %v2367_v13  ;;  %v7001_v13 = vld [vmem:[#allocation128_spill] sm:$0xff]  ;;  %v7002_v8 = vld [vmem:[#allocation129_spill] sm:$0xff]  ;;  %v7003_v15 = vld [vmem:[#allocation130_spill] sm:$0xff] }
 0x530   :  { %v4021_v57 = vpop.eup %4020  ;;  %v2370_v62 = vmul.f32 %v4019_v7, %v4011_v26  ;;  %v6998_v26 = vld [vmem:[#allocation125_spill] sm:$0xff]  ;;  %v7004_v7 = vld [vmem:[#allocation131_spill] sm:$0xff] }
 0x531   :  { %4022 = vrcp.f32 %v2351_v3  ;;  %v2352_v44 = vadd.f32 1.0, %v4021_v57  ;;  %v7005_v3 = vld [vmem:[#allocation132_spill] sm:$0xff]  ;;  %v7006_v57 = vld [vmem:[#allocation133_spill] sm:$0xff] }
 0x532   :  { %4024 = vtanh.f32 %v5598_v17  ;;  %v5602_v45 = vadd.f32 %v2370_v62, %v2368_v31  ;;  %v7007_v31 = vld [vmem:[#allocation134_spill] sm:$0xff]  ;;  %v7008_v62 = vld [vmem:[#allocation135_spill] sm:$0xff] }
 0x533   :  { %4026 = vrcp.f32 %v2352_v44  ;;  %v7009_v44 = vld [vmem:[#allocation136_spill] sm:$0xff] }
 0x534   :  { %4028 = vtanh.f32 %v5602_v45 }
 0x53e   :  { %v4023_v38 = vpop.eup %4022 }
 0x53f   :  { %v4025_v21 = vpop.eup %4024 }
 0x540   :  { %v4027_v6 = vpop.eup %4026  ;;  %v2375_v19 = vmul.f32 %v4025_v21, %v4023_v38  ;;  %v7010_v38 = vld [vmem:[#allocation137_spill] sm:$0xff]  ;;  %v7011_v21 = vld [vmem:[#allocation138_spill] sm:$0xff] }
 0x541   :  { %v4029_v55 = vpop.eup %4028 }
 0x542   :  { %v2376_v39 = vmul.f32 %v4029_v55, %v4027_v6  ;;  %v5605_v0 = vpack.c.bf16 %v2375_v19, %v2375_v19  ;;  %v7012_v6 = vld [vmem:[#allocation139_spill] sm:$0xff]  ;;  %v7013_v55 = vld [vmem:[#allocation140_spill] sm:$0xff]  ;;  %v7014_v19 = vld [vmem:[#allocation141_spill] sm:$0xff] }
 0x544   :  { %v2386_v29 = vpack.c.bf16 %v2376_v39, %v2376_v39  ;;  %v7015_v39 = vld [vmem:[#allocation142_spill] sm:$0xff] }
 0x546   :  { %2419 = vmatprep.mubr.bf16.mxu0 %v2386_v29  ;;  %2460 = vmatprep.mubr.bf16.mxu1 %v2386_v29 }
 0x547   :  { %2420 = vmatmul.mubr.bf16.vlgmr.msra.gmra.mxu0 %v5605_v0  ;;  %2461 = vmatmul.mubr.bf16.vlgmr.msra.gmra.mxu1 %v5605_v0 }
 0x548   :  { %2470 = vmatpush1.bf16.msra.mxu0 %v6703_v12  ;;  %2511 = vmatpush1.bf16.msra.mxu1 %v6704_v36 }
 0x549   :  { %2501 = vmatprep.mubr.bf16.mxu0 %v2386_v29  ;;  %2542 = vmatprep.mubr.bf16.mxu1 %v2386_v29  ;;  %v7016_v29 = vld [vmem:[#allocation143_spill] sm:$0xff] }
 0x54a   :  { %2471 = vmatprep.subr.bf16.mxu0 %v6705_v22  ;;  %2512 = vmatprep.subr.bf16.mxu1 %v6706_v61 }
 0x54c   :  { %2472 = vmatpush1.bf16.msra.mxu0 %v6707_v63  ;;  %2513 = vmatpush1.bf16.msra.mxu1 %v6708_v54 }
 0x54d   :  { %2473 = vmatprep.subr.bf16.mxu0 %v6709_v37  ;;  %2514 = vmatprep.subr.bf16.mxu1 %v6710_v53 }
 0x550   :  { %2474 = vmatpush1.bf16.msra.mxu0 %v6711_v1  ;;  %2515 = vmatpush1.bf16.msra.mxu1 %v6712_v59 }
 0x551   :  { %2475 = vmatprep.subr.bf16.mxu0 %v6713_v9  ;;  %2516 = vmatprep.subr.bf16.mxu1 %v6714_v11 }
 0x554   :  { %2476 = vmatpush1.bf16.msra.mxu0 %v6715_v52  ;;  %2517 = vmatpush1.bf16.msra.mxu1 %v6716_v4 }
 0x555   :  { %2477 = vmatprep.subr.bf16.mxu0 %v6717_v23  ;;  %2518 = vmatprep.subr.bf16.mxu1 %v6718_v20 }
 0x558   :  { %2478 = vmatpush1.bf16.msra.mxu0 %v6719_v46  ;;  %2519 = vmatpush1.bf16.msra.mxu1 %v6720_v60 }
 0x559   :  { %2479 = vmatprep.subr.bf16.mxu0 %v6807_v18  ;;  %2520 = vmatprep.subr.bf16.mxu1 %v6808_v41 }
 0x55c   :  { %2480 = vmatpush1.bf16.msra.mxu0 %v6809_v34  ;;  %2521 = vmatpush1.bf16.msra.mxu1 %v6810_v42 }
 0x55d   :  { %2481 = vmatprep.subr.bf16.mxu0 %v6811_v43  ;;  %2522 = vmatprep.subr.bf16.mxu1 %v6812_v50 }
 0x560   :  { %2482 = vmatpush1.bf16.msra.mxu0 %v6813_v24  ;;  %2523 = vmatpush1.bf16.msra.mxu1 %v6814_v16 }
 0x561   :  { %2483 = vmatprep.subr.bf16.mxu0 %v6815_v14  ;;  %2524 = vmatprep.subr.bf16.mxu1 %v6816_v40 }
 0x564   :  { %2484 = vmatpush1.bf16.msra.mxu0 %v6817_v35  ;;  %2525 = vmatpush1.bf16.msra.mxu1 %v6818_v51 }
 0x565   :  { %2485 = vmatprep.subr.bf16.mxu0 %v6819_v56  ;;  %2526 = vmatprep.subr.bf16.mxu1 %v6820_v30 }
 0x568   :  { %2486 = vmatpush2.bf16.msra.mxu0 %v6821_v33  ;;  %2527 = vmatpush2.bf16.msra.mxu1 %v6822_v48 }
 0x569   :  { %2487 = vmatprep.subr.bf16.mxu0 %v6823_v5  ;;  %2528 = vmatprep.subr.bf16.mxu1 %v6824_v32 }
 0x56c   :  { %2488 = vmatpush2.bf16.msra.mxu0 %v6825_v49  ;;  %2529 = vmatpush2.bf16.msra.mxu1 %v6740_v2 }
 0x56d   :  { %2489 = vmatprep.subr.bf16.mxu0 %v6741_v47  ;;  %2530 = vmatprep.subr.bf16.mxu1 %v6742_v10 }
 0x570   :  { %2490 = vmatpush2.bf16.msra.mxu0 %v6826_v27  ;;  %2531 = vmatpush2.bf16.msra.mxu1 %v6997_v25 }
 0x571   :  { %2491 = vmatprep.subr.bf16.mxu0 %v6998_v26  ;;  %2532 = vmatprep.subr.bf16.mxu1 %v6999_v58 }
 0x574   :  { %2492 = vmatpush2.bf16.msra.mxu0 %v7000_v28  ;;  %2533 = vmatpush2.bf16.msra.mxu1 %v7001_v13  ;;  %v7086_v13 = vld [vmem:[#allocation159_spill] sm:$0xff] }
 0x575   :  { %2493 = vmatprep.subr.bf16.mxu0 %v7002_v8  ;;  %2534 = vmatprep.subr.bf16.mxu1 %v7003_v15  ;;  %v7084_v15 = vld [vmem:[#allocation157_spill] sm:$0xff]  ;;  %v7085_v8 = vld [vmem:[#allocation158_spill] sm:$0xff] }
 0x578   :  { %2494 = vmatpush2.bf16.msra.mxu0 %v7004_v7  ;;  %2535 = vmatpush2.bf16.msra.mxu1 %v7005_v3 }
 0x579   :  { %2495 = vmatprep.subr.bf16.mxu0 %v7006_v57  ;;  %2536 = vmatprep.subr.bf16.mxu1 %v7007_v31  ;;  %v7017_v57 = vld [vmem:[#allocation144_spill] sm:$0xff]  ;;  %v7018_v31 = vld [vmem:[#allocation17_spill] sm:$0xff] }
 0x57c   :  { %2496 = vmatpush2.bf16.msra.mxu0 %v7008_v62  ;;  %2537 = vmatpush2.bf16.msra.mxu1 %v7009_v44  ;;  %v7019_v62 = vld [vmem:[#allocation18_spill] sm:$0xff] }
 0x57d   :  { %2497 = vmatprep.subr.bf16.mxu0 %v7010_v38  ;;  %2538 = vmatprep.subr.bf16.mxu1 %v7011_v21  ;;  %v7020_v21 = vld [vmem:[#allocation19_spill] sm:$0xff]  ;;  %v7029_v38 = vld [vmem:[#allocation28_spill] sm:$0xff] }
 0x580   :  { %2498 = vmatpush2.bf16.msra.mxu0 %v7012_v6  ;;  %2539 = vmatpush2.bf16.msra.mxu1 %v7013_v55  ;;  %v7021_v6 = vld [vmem:[#allocation20_spill] sm:$0xff]  ;;  %v7022_v55 = vld [vmem:[#allocation21_spill] sm:$0xff] }
 0x581   :  { %2499 = vmatprep.subr.bf16.mxu0 %v7014_v19  ;;  %2540 = vmatprep.subr.bf16.mxu1 %v7015_v39  ;;  %v7023_v19 = vld [vmem:[#allocation22_spill] sm:$0xff]  ;;  %v7024_v39 = vld [vmem:[#allocation23_spill] sm:$0xff] }
 0x584   :  { %2500 = vmatpush2.bf16.msra.mxu0 %v7016_v29  ;;  %2541 = vmatpush2.bf16.msra.mxu1 %v7017_v57  ;;  %v7025_v29 = vld [vmem:[#allocation24_spill] sm:$0xff]  ;;  %v7026_v57 = vld [vmem:[#allocation25_spill] sm:$0xff] }
 0x585   :  { %2617 = vmatprep.subr.bf16.mxu0 %v7018_v31  ;;  %2658 = vmatprep.subr.bf16.mxu1 %v7019_v62  ;;  %v7027_v31 = vld [vmem:[#allocation26_spill] sm:$0xff]  ;;  %v7028_v62 = vld [vmem:[#allocation27_spill] sm:$0xff] }
 0x587   :  { %2502 = vmatmul.mubr.bf16.vlgmr.msra.gmra.mxu0 %v5605_v0  ;;  %2543 = vmatmul.mubr.bf16.vlgmr.msra.gmra.mxu1 %v5605_v0  ;;  %v7030_v0 = vld [vmem:[#allocation29_spill] sm:$0xff] }
 0x588   :  { %2618 = vmatpush1.bf16.msra.mxu0 %v7020_v21  ;;  %2659 = vmatpush1.bf16.msra.mxu1 %v7021_v6  ;;  %v7031_v21 = vld [vmem:[#allocation30_spill] sm:$0xff]  ;;  %v7032_v6 = vld [vmem:[#allocation31_spill] sm:$0xff] }
 0x589   :  { %2619 = vmatprep.subr.bf16.mxu0 %v7022_v55  ;;  %2660 = vmatprep.subr.bf16.mxu1 %v7023_v19  ;;  %v7033_v55 = vld [vmem:[#allocation32_spill] sm:$0xff]  ;;  %v7034_v19 = vld [vmem:[#allocation33_spill] sm:$0xff] }
 0x58c   :  { %2620 = vmatpush1.bf16.msra.mxu0 %v7024_v39  ;;  %2661 = vmatpush1.bf16.msra.mxu1 %v7025_v29  ;;  %v7035_v39 = vld [vmem:[#allocation34_spill] sm:$0xff]  ;;  %v7036_v29 = vld [vmem:[#allocation35_spill] sm:$0xff] }
 0x58d   :  { %2621 = vmatprep.subr.bf16.mxu0 %v7026_v57  ;;  %2662 = vmatprep.subr.bf16.mxu1 %v7027_v31  ;;  %v7037_v57 = vld [vmem:[#allocation36_spill] sm:$0xff]  ;;  %v7038_v31 = vld [vmem:[#allocation37_spill] sm:$0xff] }
 0x590   :  { %2622 = vmatpush1.bf16.msra.mxu0 %v7028_v62  ;;  %2663 = vmatpush1.bf16.msra.mxu1 %v7029_v38  ;;  %v7039_v62 = vld [vmem:[#allocation38_spill] sm:$0xff]  ;;  %v7040_v38 = vld [vmem:[#allocation39_spill] sm:$0xff] }
 0x591   :  { %2623 = vmatprep.subr.bf16.mxu0 %v7030_v0  ;;  %2664 = vmatprep.subr.bf16.mxu1 %v7031_v21  ;;  %v7041_v0 = vld [vmem:[#allocation40_spill] sm:$0xff]  ;;  %v7042_v21 = vld [vmem:[#allocation41_spill] sm:$0xff] }
 0x594   :  { %2624 = vmatpush1.bf16.msra.mxu0 %v7032_v6  ;;  %2665 = vmatpush1.bf16.msra.mxu1 %v7033_v55  ;;  %v7043_v6 = vld [vmem:[#allocation42_spill] sm:$0xff]  ;;  %v7044_v55 = vld [vmem:[#allocation43_spill] sm:$0xff] }
 0x595   :  { %2625 = vmatprep.subr.bf16.mxu0 %v7034_v19  ;;  %2666 = vmatprep.subr.bf16.mxu1 %v7035_v39  ;;  %v7045_v19 = vld [vmem:[#allocation44_spill] sm:$0xff]  ;;  %v7046_v39 = vld [vmem:[#allocation45_spill] sm:$0xff] }
 0x598   :  { %2626 = vmatpush1.bf16.msra.mxu0 %v7036_v29  ;;  %2667 = vmatpush1.bf16.msra.mxu1 %v7037_v57  ;;  %v7047_v29 = vld [vmem:[#allocation46_spill] sm:$0xff]  ;;  %v7048_v57 = vld [vmem:[#allocation47_spill] sm:$0xff] }
 0x599   :  { %2627 = vmatprep.subr.bf16.mxu0 %v7038_v31  ;;  %2668 = vmatprep.subr.bf16.mxu1 %v7039_v62  ;;  %v7049_v31 = vld [vmem:[#allocation48_spill] sm:$0xff]  ;;  %v7050_v62 = vld [vmem:[#allocation49_spill] sm:$0xff] }
 0x59c   :  { %2628 = vmatpush1.bf16.msra.mxu0 %v7040_v38  ;;  %2669 = vmatpush1.bf16.msra.mxu1 %v7041_v0  ;;  %v7051_v38 = vld [vmem:[#allocation50_spill] sm:$0xff]  ;;  %v7052_v0 = vld [vmem:[#allocation51_spill] sm:$0xff] }
 0x59d   :  { %2629 = vmatprep.subr.bf16.mxu0 %v7042_v21  ;;  %2670 = vmatprep.subr.bf16.mxu1 %v7043_v6  ;;  %v7053_v21 = vld [vmem:[#allocation52_spill] sm:$0xff]  ;;  %v7054_v6 = vld [vmem:[#allocation53_spill] sm:$0xff] }
 0x5a0   :  { %2630 = vmatpush1.bf16.msra.mxu0 %v7044_v55  ;;  %2671 = vmatpush1.bf16.msra.mxu1 %v7045_v19  ;;  %v7055_v55 = vld [vmem:[#allocation54_spill] sm:$0xff]  ;;  %v7056_v19 = vld [vmem:[#allocation55_spill] sm:$0xff] }
 0x5a1   :  { %2631 = vmatprep.subr.bf16.mxu0 %v7046_v39  ;;  %2672 = vmatprep.subr.bf16.mxu1 %v7047_v29  ;;  %v7057_v39 = vld [vmem:[#allocation56_spill] sm:$0xff]  ;;  %v7058_v29 = vld [vmem:[#allocation57_spill] sm:$0xff] }
 0x5a4   :  { %2632 = vmatpush1.bf16.msra.mxu0 %v7048_v57  ;;  %2673 = vmatpush1.bf16.msra.mxu1 %v7049_v31  ;;  %v7059_v57 = vld [vmem:[#allocation58_spill] sm:$0xff]  ;;  %v7060_v31 = vld [vmem:[#allocation59_spill] sm:$0xff] }
 0x5a5   :  { %2633 = vmatprep.subr.bf16.mxu0 %v7050_v62  ;;  %2674 = vmatprep.subr.bf16.mxu1 %v7051_v38  ;;  %v7061_v62 = vld [vmem:[#allocation60_spill] sm:$0xff]  ;;  %v7062_v38 = vld [vmem:[#allocation61_spill] sm:$0xff] }
 0x5a8   :  { %2634 = vmatpush2.bf16.msra.mxu0 %v7052_v0  ;;  %2675 = vmatpush2.bf16.msra.mxu1 %v7053_v21  ;;  %v7063_v0 = vld [vmem:[#allocation62_spill] sm:$0xff]  ;;  %v7064_v21 = vld [vmem:[#allocation63_spill] sm:$0xff] }
 0x5a9   :  { %2635 = vmatprep.subr.bf16.mxu0 %v7054_v6  ;;  %2676 = vmatprep.subr.bf16.mxu1 %v7055_v55  ;;  %v7065_v6 = vld [vmem:[#allocation64_spill] sm:$0xff]  ;;  %v7066_v55 = vld [vmem:[#allocation65_spill] sm:$0xff] }
 0x5ac   :  { %2636 = vmatpush2.bf16.msra.mxu0 %v7056_v19  ;;  %2677 = vmatpush2.bf16.msra.mxu1 %v7057_v39  ;;  %v7067_v19 = vld [vmem:[#allocation66_spill] sm:$0xff]  ;;  %v7068_v39 = vld [vmem:[#allocation67_spill] sm:$0xff] }
 0x5ad   :  { %2637 = vmatprep.subr.bf16.mxu0 %v7058_v29  ;;  %2678 = vmatprep.subr.bf16.mxu1 %v7059_v57  ;;  %v7069_v29 = vld [vmem:[#allocation68_spill] sm:$0xff]  ;;  %v7070_v57 = vld [vmem:[#allocation69_spill] sm:$0xff] }
 0x5b0   :  { %2638 = vmatpush2.bf16.msra.mxu0 %v7060_v31  ;;  %2679 = vmatpush2.bf16.msra.mxu1 %v7061_v62  ;;  %v7071_v31 = vld [vmem:[#allocation70_spill] sm:$0xff]  ;;  %v7072_v62 = vld [vmem:[#allocation71_spill] sm:$0xff] }
 0x5b1   :  { %2639 = vmatprep.subr.bf16.mxu0 %v7062_v38  ;;  %2680 = vmatprep.subr.bf16.mxu1 %v7063_v0  ;;  %v7073_v38 = vld [vmem:[#allocation72_spill] sm:$0xff]  ;;  %v7074_v0 = vld [vmem:[#allocation73_spill] sm:$0xff] }
 0x5b4   :  { %2640 = vmatpush2.bf16.msra.mxu0 %v7064_v21  ;;  %2681 = vmatpush2.bf16.msra.mxu1 %v7065_v6  ;;  %v7075_v21 = vld [vmem:[#allocation74_spill] sm:$0xff]  ;;  %v7076_v6 = vld [vmem:[#allocation75_spill] sm:$0xff] }
 0x5b5   :  { %2641 = vmatprep.subr.bf16.mxu0 %v7066_v55  ;;  %2682 = vmatprep.subr.bf16.mxu1 %v7067_v19  ;;  %v7077_v55 = vld [vmem:[#allocation76_spill] sm:$0xff]  ;;  %v7078_v19 = vld [vmem:[#allocation77_spill] sm:$0xff] }
 0x5b8   :  { %2642 = vmatpush2.bf16.msra.mxu0 %v7068_v39  ;;  %2683 = vmatpush2.bf16.msra.mxu1 %v7069_v29  ;;  %v7079_v39 = vld [vmem:[#allocation78_spill] sm:$0xff]  ;;  %v7080_v29 = vld [vmem:[#allocation79_spill] sm:$0xff] }
 0x5b9   :  { %2643 = vmatprep.subr.bf16.mxu0 %v7070_v57  ;;  %2684 = vmatprep.subr.bf16.mxu1 %v7071_v31  ;;  %v7081_v57 = vld [vmem:[#allocation80_spill] sm:$0xff]  ;;  %v7082_v31 = vld [vmem:[#allocation81_spill] sm:$0xff] }
 0x5bc   :  { %2644 = vmatpush2.bf16.msra.mxu0 %v7072_v62  ;;  %2685 = vmatpush2.bf16.msra.mxu1 %v7073_v38  ;;  %v7083_v62 = vld [vmem:[#allocation82_spill] sm:$0xff] }
 0x5bd   :  { %2645 = vmatprep.subr.bf16.mxu0 %v7074_v0  ;;  %2686 = vmatprep.subr.bf16.mxu1 %v7075_v21 }
 0x5c0   :  { %2646 = vmatpush2.bf16.msra.mxu0 %v7076_v6  ;;  %2687 = vmatpush2.bf16.msra.mxu1 %v7077_v55 }
 0x5c1   :  { %2647 = vmatprep.subr.bf16.mxu0 %v7078_v19  ;;  %2688 = vmatprep.subr.bf16.mxu1 %v7079_v39 }
 0x5c4   :  { %2648 = vmatpush2.bf16.msra.mxu0 %v7080_v29  ;;  %2689 = vmatpush2.bf16.msra.mxu1 %v7081_v57  ;;  %v7087_v57 = vld [vmem:[#allocation160_spill] sm:$0xff] }
 0x5c5   :  { %2699 = vmatprep.subr.bf16.mxu0 %v7082_v31  ;;  %2740 = vmatprep.subr.bf16.mxu1 %v7083_v62 }
 0x607   :  { %v2421_v38 = vpop.f32.mrf.mxu0  ;;  %v2462_v0 = vpop.f32.mrf.mxu1 }
 0x608   :  { %v2551_v19 = vadd.f32 %v2421_v38, %v7084_v15  ;;  %v2553_v39 = vadd.f32 %v2462_v0, %v7085_v8 }
 0x609   :  { %v2423_v44 = vpop.f32.mrf.mxu0  ;;  %v2464_v21 = vpop.f32.mrf.mxu1 }
 0x60a   :  { %v2552_v29 = vadd.f32 %v2423_v44, %v7086_v13  ;;  %v3776_v28 = vmul.f32 -1.442695, %v2551_v19  ;;  %v2554_v58 = vadd.f32 %v2464_v21, %v7087_v57  ;;  %v3778_v31 = vmul.f32 -1.442695, %v2553_v39  ;;  %v7088_v57 = vld [vmem:[#allocation185_spill] sm:$0xff]  ;;  %v7089_v19 = vld [vmem:[#allocation186_spill] sm:$0xff] }
 0x60b   :  { %v2425_v3 = vpop.f32.mrf.mxu0  ;;  %v2466_v6 = vpop.f32.mrf.mxu1 }
 0x60c   :  { %v3777_v26 = vmul.f32 -1.442695, %v2552_v29  ;;  %4030 = vpow2.f32 %v3776_v28  ;;  %v3779_v62 = vmul.f32 -1.442695, %v2554_v58  ;;  %v7091_v29 = vld [vmem:[#allocation188_spill] sm:$0xff] }
 0x60d   :  { %v2426_v7 = vpop.f32.mrf.mxu0  ;;  %v2467_v55 = vpop.f32.mrf.mxu1  ;;  %4032 = vpow2.f32 %v3778_v31 }
 0x60e   :  { %4034 = vpow2.f32 %v3777_v26 }
 0x60f   :  { %4036 = vpow2.f32 %v3779_v62  ;;  %v7090_v62 = vld [vmem:[#allocation187_spill] sm:$0xff] }
 0x619   :  { %v4031_v3 = vpop.eup %4030 }
 0x61a   :  { %v4033_v6 = vpop.eup %4032  ;;  %v2577_v55 = vadd.f32 1.0, %v4031_v3 }
 0x61b   :  { %v4035_v7 = vpop.eup %4034  ;;  %v2579_v15 = vadd.f32 1.0, %v4033_v6 }
 0x61c   :  { %v4037_v25 = vpop.eup %4036  ;;  %v2578_v38 = vadd.f32 1.0, %v4035_v7  ;;  %4038 = vrcp.f32 %v2577_v55 }
 0x61d   :  { %v2580_v8 = vadd.f32 1.0, %v4037_v25  ;;  %4040 = vrcp.f32 %v2579_v15 }
 0x61e   :  { %4042 = vrcp.f32 %v2578_v38 }
 0x629   :  { %v4039_v15 = vpop.eup %4038 }
 0x647   :  { %v2503_v13 = vpop.f32.mrf.mxu0  ;;  %v2544_v44 = vpop.f32.mrf.mxu1 }
 0x648   :  { %v2555_v21 = vadd.f32 %v2503_v13, %v7088_v57  ;;  %v2557_v28 = vadd.f32 %v2544_v44, %v7089_v19  ;;  %v4041_v13 = vpop.eup %4040 }
 0x649   :  { %v2505_v58 = vpop.f32.mrf.mxu0  ;;  %v2546_v26 = vpop.f32.mrf.mxu1 }
 0x64a   :  { %v3780_v31 = vmul.f32 -1.442695, %v2555_v21  ;;  %4044 = vtanh.f32 %v2557_v28  ;;  %v2556_v39 = vadd.f32 %v2505_v58, %v7090_v62  ;;  %v2558_v0 = vadd.f32 %v2546_v26, %v7091_v29  ;;  %v4043_v38 = vpop.eup %4042 }
 0x64b   :  { %4046 = vrcp.f32 %v2580_v8  ;;  %v2507_v3 = vpop.f32.mrf.mxu0  ;;  %v2548_v6 = vpop.f32.mrf.mxu1  ;;  %v2597_v21 = vmul.f32 %v4041_v13, %v5598_v17 }
 0x64c   :  { %4048 = vpow2.f32 %v3780_v31  ;;  %v3781_v25 = vmul.f32 -1.442695, %v2556_v39 }
 0x64d   :  { %4050 = vtanh.f32 %v2558_v0  ;;  %v2508_v7 = vpop.f32.mrf.mxu0  ;;  %v2549_v55 = vpop.f32.mrf.mxu1 }
 0x64e   :  { %4052 = vpow2.f32 %v3781_v25 }
 0x657   :  { %v4045_v44 = vpop.eup %4044 }
 0x658   :  { %v4047_v57 = vpop.eup %4046  ;;  %v2599_v19 = vmul.f32 %v4045_v44, %v4039_v15  ;;  %v7094_v44 = vld [vmem:[#allocation126_spill] sm:$0xff] }
 0x659   :  { %v4049_v28 = vpop.eup %4048  ;;  %v2598_v31 = vmul.f32 %v4047_v57, %v5602_v45  ;;  %v7092_v45 = vld [vmem:[#allocation124_spill] sm:$0xff]  ;;  %v7095_v57 = vld [vmem:[#allocation127_spill] sm:$0xff] }
 0x65a   :  { %v4051_v58 = vpop.eup %4050  ;;  %v2581_v26 = vadd.f32 1.0, %v4049_v28  ;;  %v5748_v8 = vadd.f32 %v2599_v19, %v2597_v21  ;;  %v7096_v21 = vld [vmem:[#allocation128_spill] sm:$0xff]  ;;  %v7097_v19 = vld [vmem:[#allocation129_spill] sm:$0xff]  ;;  %v7098_v28 = vld [vmem:[#allocation130_spill] sm:$0xff] }
 0x65b   :  { %v4053_v62 = vpop.eup %4052  ;;  %v2600_v39 = vmul.f32 %v4051_v58, %v4043_v38  ;;  %v7093_v38 = vld [vmem:[#allocation125_spill] sm:$0xff]  ;;  %v7099_v58 = vld [vmem:[#allocation131_spill] sm:$0xff] }
 0x65c   :  { %4054 = vrcp.f32 %v2581_v26  ;;  %v2582_v29 = vadd.f32 1.0, %v4053_v62  ;;  %v7100_v26 = vld [vmem:[#allocation132_spill] sm:$0xff]  ;;  %v7101_v62 = vld [vmem:[#allocation133_spill] sm:$0xff] }
 0x65d   :  { %4056 = vtanh.f32 %v5748_v8  ;;  %v5752_v0 = vadd.f32 %v2600_v39, %v2598_v31  ;;  %v7102_v31 = vld [vmem:[#allocation134_spill] sm:$0xff]  ;;  %v7103_v39 = vld [vmem:[#allocation135_spill] sm:$0xff] }
 0x65e   :  { %4058 = vrcp.f32 %v2582_v29  ;;  %v7104_v29 = vld [vmem:[#allocation136_spill] sm:$0xff] }
 0x65f   :  { %4060 = vtanh.f32 %v5752_v0 }
 0x669   :  { %v4055_v17 = vpop.eup %4054 }
 0x66a   :  { %v4057_v3 = vpop.eup %4056 }
 0x66b   :  { %v4059_v6 = vpop.eup %4058  ;;  %v2605_v7 = vmul.f32 %v4057_v3, %v4055_v17  ;;  %v7105_v17 = vld [vmem:[#allocation137_spill] sm:$0xff]  ;;  %v7106_v3 = vld [vmem:[#allocation138_spill] sm:$0xff] }
 0x66c   :  { %v4061_v25 = vpop.eup %4060 }
 0x66d   :  { %v2606_v55 = vmul.f32 %v4061_v25, %v4059_v6  ;;  %v5755_v13 = vpack.c.bf16 %v2605_v7, %v2605_v7  ;;  %v7107_v6 = vld [vmem:[#allocation139_spill] sm:$0xff]  ;;  %v7108_v25 = vld [vmem:[#allocation140_spill] sm:$0xff]  ;;  %v7109_v7 = vld [vmem:[#allocation141_spill] sm:$0xff] }
 0x66f   :  { %v2616_v15 = vpack.c.bf16 %v2606_v55, %v2606_v55  ;;  %v7110_v55 = vld [vmem:[#allocation142_spill] sm:$0xff] }
 0x671   :  { %2649 = vmatprep.mubr.bf16.mxu0 %v2616_v15  ;;  %2690 = vmatprep.mubr.bf16.mxu1 %v2616_v15 }
 0x672   :  { %2650 = vmatmul.mubr.bf16.vlgmr.msra.gmra.mxu0 %v5755_v13  ;;  %2691 = vmatmul.mubr.bf16.vlgmr.msra.gmra.mxu1 %v5755_v13 }
 0x673   :  { %2700 = vmatpush1.bf16.msra.mxu0 %v6703_v12  ;;  %2741 = vmatpush1.bf16.msra.mxu1 %v6704_v36 }
 0x674   :  { %2731 = vmatprep.mubr.bf16.mxu0 %v2616_v15  ;;  %2772 = vmatprep.mubr.bf16.mxu1 %v2616_v15  ;;  %v7111_v15 = vld [vmem:[#allocation143_spill] sm:$0xff] }
 0x675   :  { %2701 = vmatprep.subr.bf16.mxu0 %v6705_v22  ;;  %2742 = vmatprep.subr.bf16.mxu1 %v6706_v61 }
 0x677   :  { %2702 = vmatpush1.bf16.msra.mxu0 %v6707_v63  ;;  %2743 = vmatpush1.bf16.msra.mxu1 %v6708_v54 }
 0x678   :  { %2703 = vmatprep.subr.bf16.mxu0 %v6709_v37  ;;  %2744 = vmatprep.subr.bf16.mxu1 %v6710_v53 }
 0x67b   :  { %2704 = vmatpush1.bf16.msra.mxu0 %v6711_v1  ;;  %2745 = vmatpush1.bf16.msra.mxu1 %v6712_v59 }
 0x67c   :  { %2705 = vmatprep.subr.bf16.mxu0 %v6713_v9  ;;  %2746 = vmatprep.subr.bf16.mxu1 %v6714_v11 }
 0x67f   :  { %2706 = vmatpush1.bf16.msra.mxu0 %v6715_v52  ;;  %2747 = vmatpush1.bf16.msra.mxu1 %v6716_v4 }
 0x680   :  { %2707 = vmatprep.subr.bf16.mxu0 %v6717_v23  ;;  %2748 = vmatprep.subr.bf16.mxu1 %v6718_v20 }
 0x683   :  { %2708 = vmatpush1.bf16.msra.mxu0 %v6719_v46  ;;  %2749 = vmatpush1.bf16.msra.mxu1 %v6720_v60 }
 0x684   :  { %2709 = vmatprep.subr.bf16.mxu0 %v6807_v18  ;;  %2750 = vmatprep.subr.bf16.mxu1 %v6808_v41 }
 0x687   :  { %2710 = vmatpush1.bf16.msra.mxu0 %v6809_v34  ;;  %2751 = vmatpush1.bf16.msra.mxu1 %v6810_v42 }
 0x688   :  { %2711 = vmatprep.subr.bf16.mxu0 %v6811_v43  ;;  %2752 = vmatprep.subr.bf16.mxu1 %v6812_v50 }
 0x68b   :  { %2712 = vmatpush1.bf16.msra.mxu0 %v6813_v24  ;;  %2753 = vmatpush1.bf16.msra.mxu1 %v6814_v16 }
 0x68c   :  { %2713 = vmatprep.subr.bf16.mxu0 %v6815_v14  ;;  %2754 = vmatprep.subr.bf16.mxu1 %v6816_v40 }
 0x68f   :  { %2714 = vmatpush1.bf16.msra.mxu0 %v6817_v35  ;;  %2755 = vmatpush1.bf16.msra.mxu1 %v6818_v51 }
 0x690   :  { %2715 = vmatprep.subr.bf16.mxu0 %v6819_v56  ;;  %2756 = vmatprep.subr.bf16.mxu1 %v6820_v30 }
 0x693   :  { %2716 = vmatpush2.bf16.msra.mxu0 %v6821_v33  ;;  %2757 = vmatpush2.bf16.msra.mxu1 %v6822_v48 }
 0x694   :  { %2717 = vmatprep.subr.bf16.mxu0 %v6823_v5  ;;  %2758 = vmatprep.subr.bf16.mxu1 %v6824_v32 }
 0x697   :  { %2718 = vmatpush2.bf16.msra.mxu0 %v6825_v49  ;;  %2759 = vmatpush2.bf16.msra.mxu1 %v6740_v2 }
 0x698   :  { %2719 = vmatprep.subr.bf16.mxu0 %v6741_v47  ;;  %2760 = vmatprep.subr.bf16.mxu1 %v6742_v10 }
 0x69b   :  { %2720 = vmatpush2.bf16.msra.mxu0 %v6826_v27  ;;  %2761 = vmatpush2.bf16.msra.mxu1 %v7092_v45 }
 0x69c   :  { %2721 = vmatprep.subr.bf16.mxu0 %v7093_v38  ;;  %2762 = vmatprep.subr.bf16.mxu1 %v7094_v44 }
 0x69f   :  { %2722 = vmatpush2.bf16.msra.mxu0 %v7095_v57  ;;  %2763 = vmatpush2.bf16.msra.mxu1 %v7096_v21  ;;  %v7181_v21 = vld [vmem:[#allocation163_spill] sm:$0xff] }
 0x6a0   :  { %2723 = vmatprep.subr.bf16.mxu0 %v7097_v19  ;;  %2764 = vmatprep.subr.bf16.mxu1 %v7098_v28  ;;  %v7179_v28 = vld [vmem:[#allocation161_spill] sm:$0xff]  ;;  %v7180_v19 = vld [vmem:[#allocation162_spill] sm:$0xff] }
 0x6a3   :  { %2724 = vmatpush2.bf16.msra.mxu0 %v7099_v58  ;;  %2765 = vmatpush2.bf16.msra.mxu1 %v7100_v26 }
 0x6a4   :  { %2725 = vmatprep.subr.bf16.mxu0 %v7101_v62  ;;  %2766 = vmatprep.subr.bf16.mxu1 %v7102_v31  ;;  %v7112_v62 = vld [vmem:[#allocation144_spill] sm:$0xff]  ;;  %v7113_v31 = vld [vmem:[#allocation17_spill] sm:$0xff] }
 0x6a7   :  { %2726 = vmatpush2.bf16.msra.mxu0 %v7103_v39  ;;  %2767 = vmatpush2.bf16.msra.mxu1 %v7104_v29  ;;  %v7114_v39 = vld [vmem:[#allocation18_spill] sm:$0xff] }
 0x6a8   :  { %2727 = vmatprep.subr.bf16.mxu0 %v7105_v17  ;;  %2768 = vmatprep.subr.bf16.mxu1 %v7106_v3  ;;  %v7115_v3 = vld [vmem:[#allocation19_spill] sm:$0xff]  ;;  %v7124_v17 = vld [vmem:[#allocation28_spill] sm:$0xff] }
 0x6ab   :  { %2728 = vmatpush2.bf16.msra.mxu0 %v7107_v6  ;;  %2769 = vmatpush2.bf16.msra.mxu1 %v7108_v25  ;;  %v7116_v6 = vld [vmem:[#allocation20_spill] sm:$0xff]  ;;  %v7117_v25 = vld [vmem:[#allocation21_spill] sm:$0xff] }
 0x6ac   :  { %2729 = vmatprep.subr.bf16.mxu0 %v7109_v7  ;;  %2770 = vmatprep.subr.bf16.mxu1 %v7110_v55  ;;  %v7118_v7 = vld [vmem:[#allocation22_spill] sm:$0xff]  ;;  %v7119_v55 = vld [vmem:[#allocation23_spill] sm:$0xff] }
 0x6af   :  { %2730 = vmatpush2.bf16.msra.mxu0 %v7111_v15  ;;  %2771 = vmatpush2.bf16.msra.mxu1 %v7112_v62  ;;  %v7120_v15 = vld [vmem:[#allocation24_spill] sm:$0xff]  ;;  %v7121_v62 = vld [vmem:[#allocation25_spill] sm:$0xff] }
 0x6b0   :  { %2847 = vmatprep.subr.bf16.mxu0 %v7113_v31  ;;  %2888 = vmatprep.subr.bf16.mxu1 %v7114_v39  ;;  %v7122_v31 = vld [vmem:[#allocation26_spill] sm:$0xff]  ;;  %v7123_v39 = vld [vmem:[#allocation27_spill] sm:$0xff] }
 0x6b2   :  { %2732 = vmatmul.mubr.bf16.vlgmr.msra.gmra.mxu0 %v5755_v13  ;;  %2773 = vmatmul.mubr.bf16.vlgmr.msra.gmra.mxu1 %v5755_v13  ;;  %v7125_v13 = vld [vmem:[#allocation29_spill] sm:$0xff] }
 0x6b3   :  { %2848 = vmatpush1.bf16.msra.mxu0 %v7115_v3  ;;  %2889 = vmatpush1.bf16.msra.mxu1 %v7116_v6  ;;  %v7126_v3 = vld [vmem:[#allocation30_spill] sm:$0xff]  ;;  %v7127_v6 = vld [vmem:[#allocation31_spill] sm:$0xff] }
 0x6b4   :  { %2849 = vmatprep.subr.bf16.mxu0 %v7117_v25  ;;  %2890 = vmatprep.subr.bf16.mxu1 %v7118_v7  ;;  %v7128_v25 = vld [vmem:[#allocation32_spill] sm:$0xff]  ;;  %v7129_v7 = vld [vmem:[#allocation33_spill] sm:$0xff] }
 0x6b7   :  { %2850 = vmatpush1.bf16.msra.mxu0 %v7119_v55  ;;  %2891 = vmatpush1.bf16.msra.mxu1 %v7120_v15  ;;  %v7130_v55 = vld [vmem:[#allocation34_spill] sm:$0xff]  ;;  %v7131_v15 = vld [vmem:[#allocation35_spill] sm:$0xff] }
 0x6b8   :  { %2851 = vmatprep.subr.bf16.mxu0 %v7121_v62  ;;  %2892 = vmatprep.subr.bf16.mxu1 %v7122_v31  ;;  %v7132_v62 = vld [vmem:[#allocation36_spill] sm:$0xff]  ;;  %v7133_v31 = vld [vmem:[#allocation37_spill] sm:$0xff] }
 0x6bb   :  { %2852 = vmatpush1.bf16.msra.mxu0 %v7123_v39  ;;  %2893 = vmatpush1.bf16.msra.mxu1 %v7124_v17  ;;  %v7134_v39 = vld [vmem:[#allocation38_spill] sm:$0xff]  ;;  %v7135_v17 = vld [vmem:[#allocation39_spill] sm:$0xff] }
 0x6bc   :  { %2853 = vmatprep.subr.bf16.mxu0 %v7125_v13  ;;  %2894 = vmatprep.subr.bf16.mxu1 %v7126_v3  ;;  %v7136_v13 = vld [vmem:[#allocation40_spill] sm:$0xff]  ;;  %v7137_v3 = vld [vmem:[#allocation41_spill] sm:$0xff] }
 0x6bf   :  { %2854 = vmatpush1.bf16.msra.mxu0 %v7127_v6  ;;  %2895 = vmatpush1.bf16.msra.mxu1 %v7128_v25  ;;  %v7138_v6 = vld [vmem:[#allocation42_spill] sm:$0xff]  ;;  %v7139_v25 = vld [vmem:[#allocation43_spill] sm:$0xff] }
 0x6c0   :  { %2855 = vmatprep.subr.bf16.mxu0 %v7129_v7  ;;  %2896 = vmatprep.subr.bf16.mxu1 %v7130_v55  ;;  %v7140_v7 = vld [vmem:[#allocation44_spill] sm:$0xff]  ;;  %v7141_v55 = vld [vmem:[#allocation45_spill] sm:$0xff] }
 0x6c3   :  { %2856 = vmatpush1.bf16.msra.mxu0 %v7131_v15  ;;  %2897 = vmatpush1.bf16.msra.mxu1 %v7132_v62  ;;  %v7142_v15 = vld [vmem:[#allocation46_spill] sm:$0xff]  ;;  %v7143_v62 = vld [vmem:[#allocation47_spill] sm:$0xff] }
 0x6c4   :  { %2857 = vmatprep.subr.bf16.mxu0 %v7133_v31  ;;  %2898 = vmatprep.subr.bf16.mxu1 %v7134_v39  ;;  %v7144_v31 = vld [vmem:[#allocation48_spill] sm:$0xff]  ;;  %v7145_v39 = vld [vmem:[#allocation49_spill] sm:$0xff] }
 0x6c7   :  { %2858 = vmatpush1.bf16.msra.mxu0 %v7135_v17  ;;  %2899 = vmatpush1.bf16.msra.mxu1 %v7136_v13  ;;  %v7146_v17 = vld [vmem:[#allocation50_spill] sm:$0xff]  ;;  %v7147_v13 = vld [vmem:[#allocation51_spill] sm:$0xff] }
 0x6c8   :  { %2859 = vmatprep.subr.bf16.mxu0 %v7137_v3  ;;  %2900 = vmatprep.subr.bf16.mxu1 %v7138_v6  ;;  %v7148_v3 = vld [vmem:[#allocation52_spill] sm:$0xff]  ;;  %v7149_v6 = vld [vmem:[#allocation53_spill] sm:$0xff] }
 0x6cb   :  { %2860 = vmatpush1.bf16.msra.mxu0 %v7139_v25  ;;  %2901 = vmatpush1.bf16.msra.mxu1 %v7140_v7  ;;  %v7150_v25 = vld [vmem:[#allocation54_spill] sm:$0xff]  ;;  %v7151_v7 = vld [vmem:[#allocation55_spill] sm:$0xff] }
 0x6cc   :  { %2861 = vmatprep.subr.bf16.mxu0 %v7141_v55  ;;  %2902 = vmatprep.subr.bf16.mxu1 %v7142_v15  ;;  %v7152_v55 = vld [vmem:[#allocation56_spill] sm:$0xff]  ;;  %v7153_v15 = vld [vmem:[#allocation57_spill] sm:$0xff] }
 0x6cf   :  { %2862 = vmatpush1.bf16.msra.mxu0 %v7143_v62  ;;  %2903 = vmatpush1.bf16.msra.mxu1 %v7144_v31  ;;  %v7154_v62 = vld [vmem:[#allocation58_spill] sm:$0xff]  ;;  %v7155_v31 = vld [vmem:[#allocation59_spill] sm:$0xff] }
 0x6d0   :  { %2863 = vmatprep.subr.bf16.mxu0 %v7145_v39  ;;  %2904 = vmatprep.subr.bf16.mxu1 %v7146_v17  ;;  %v7156_v39 = vld [vmem:[#allocation60_spill] sm:$0xff]  ;;  %v7157_v17 = vld [vmem:[#allocation61_spill] sm:$0xff] }
 0x6d3   :  { %2864 = vmatpush2.bf16.msra.mxu0 %v7147_v13  ;;  %2905 = vmatpush2.bf16.msra.mxu1 %v7148_v3  ;;  %v7158_v13 = vld [vmem:[#allocation62_spill] sm:$0xff]  ;;  %v7159_v3 = vld [vmem:[#allocation63_spill] sm:$0xff] }
 0x6d4   :  { %2865 = vmatprep.subr.bf16.mxu0 %v7149_v6  ;;  %2906 = vmatprep.subr.bf16.mxu1 %v7150_v25  ;;  %v7160_v6 = vld [vmem:[#allocation64_spill] sm:$0xff]  ;;  %v7161_v25 = vld [vmem:[#allocation65_spill] sm:$0xff] }
 0x6d7   :  { %2866 = vmatpush2.bf16.msra.mxu0 %v7151_v7  ;;  %2907 = vmatpush2.bf16.msra.mxu1 %v7152_v55  ;;  %v7162_v7 = vld [vmem:[#allocation66_spill] sm:$0xff]  ;;  %v7163_v55 = vld [vmem:[#allocation67_spill] sm:$0xff] }
 0x6d8   :  { %2867 = vmatprep.subr.bf16.mxu0 %v7153_v15  ;;  %2908 = vmatprep.subr.bf16.mxu1 %v7154_v62  ;;  %v7164_v15 = vld [vmem:[#allocation68_spill] sm:$0xff]  ;;  %v7165_v62 = vld [vmem:[#allocation69_spill] sm:$0xff] }
 0x6db   :  { %2868 = vmatpush2.bf16.msra.mxu0 %v7155_v31  ;;  %2909 = vmatpush2.bf16.msra.mxu1 %v7156_v39  ;;  %v7166_v31 = vld [vmem:[#allocation70_spill] sm:$0xff]  ;;  %v7167_v39 = vld [vmem:[#allocation71_spill] sm:$0xff] }
 0x6dc   :  { %2869 = vmatprep.subr.bf16.mxu0 %v7157_v17  ;;  %2910 = vmatprep.subr.bf16.mxu1 %v7158_v13  ;;  %v7168_v17 = vld [vmem:[#allocation72_spill] sm:$0xff]  ;;  %v7169_v13 = vld [vmem:[#allocation73_spill] sm:$0xff] }
 0x6df   :  { %2870 = vmatpush2.bf16.msra.mxu0 %v7159_v3  ;;  %2911 = vmatpush2.bf16.msra.mxu1 %v7160_v6  ;;  %v7170_v3 = vld [vmem:[#allocation74_spill] sm:$0xff]  ;;  %v7171_v6 = vld [vmem:[#allocation75_spill] sm:$0xff] }
 0x6e0   :  { %2871 = vmatprep.subr.bf16.mxu0 %v7161_v25  ;;  %2912 = vmatprep.subr.bf16.mxu1 %v7162_v7  ;;  %v7172_v25 = vld [vmem:[#allocation76_spill] sm:$0xff]  ;;  %v7173_v7 = vld [vmem:[#allocation77_spill] sm:$0xff] }
 0x6e3   :  { %2872 = vmatpush2.bf16.msra.mxu0 %v7163_v55  ;;  %2913 = vmatpush2.bf16.msra.mxu1 %v7164_v15  ;;  %v7174_v55 = vld [vmem:[#allocation78_spill] sm:$0xff]  ;;  %v7175_v15 = vld [vmem:[#allocation79_spill] sm:$0xff] }
 0x6e4   :  { %2873 = vmatprep.subr.bf16.mxu0 %v7165_v62  ;;  %2914 = vmatprep.subr.bf16.mxu1 %v7166_v31  ;;  %v7176_v62 = vld [vmem:[#allocation80_spill] sm:$0xff]  ;;  %v7177_v31 = vld [vmem:[#allocation81_spill] sm:$0xff] }
 0x6e7   :  { %2874 = vmatpush2.bf16.msra.mxu0 %v7167_v39  ;;  %2915 = vmatpush2.bf16.msra.mxu1 %v7168_v17  ;;  %v7178_v39 = vld [vmem:[#allocation82_spill] sm:$0xff] }
 0x6e8   :  { %2875 = vmatprep.subr.bf16.mxu0 %v7169_v13  ;;  %2916 = vmatprep.subr.bf16.mxu1 %v7170_v3 }
 0x6eb   :  { %2876 = vmatpush2.bf16.msra.mxu0 %v7171_v6  ;;  %2917 = vmatpush2.bf16.msra.mxu1 %v7172_v25 }
 0x6ec   :  { %2877 = vmatprep.subr.bf16.mxu0 %v7173_v7  ;;  %2918 = vmatprep.subr.bf16.mxu1 %v7174_v55 }
 0x6ef   :  { %2878 = vmatpush2.bf16.msra.mxu0 %v7175_v15  ;;  %2919 = vmatpush2.bf16.msra.mxu1 %v7176_v62  ;;  %v7182_v62 = vld [vmem:[#allocation164_spill] sm:$0xff] }
 0x6f0   :  { %2929 = vmatprep.subr.bf16.mxu0 %v7177_v31  ;;  %2970 = vmatprep.subr.bf16.mxu1 %v7178_v39 }
 0x732   :  { %v2651_v17 = vpop.f32.mrf.mxu0  ;;  %v2692_v13 = vpop.f32.mrf.mxu1 }
 0x733   :  { %v2781_v7 = vadd.f32 %v2651_v17, %v7179_v28  ;;  %v2783_v55 = vadd.f32 %v2692_v13, %v7180_v19 }
 0x734   :  { %v2653_v29 = vpop.f32.mrf.mxu0  ;;  %v2694_v3 = vpop.f32.mrf.mxu1 }
 0x735   :  { %v2782_v15 = vadd.f32 %v2653_v29, %v7181_v21  ;;  %v3782_v57 = vmul.f32 -1.442695, %v2781_v7  ;;  %v2784_v44 = vadd.f32 %v2694_v3, %v7182_v62  ;;  %v3784_v31 = vmul.f32 -1.442695, %v2783_v55  ;;  %v7183_v62 = vld [vmem:[#allocation189_spill] sm:$0xff]  ;;  %v7184_v7 = vld [vmem:[#allocation190_spill] sm:$0xff] }
 0x736   :  { %v2655_v26 = vpop.f32.mrf.mxu0  ;;  %v2696_v6 = vpop.f32.mrf.mxu1 }
 0x737   :  { %v3783_v38 = vmul.f32 -1.442695, %v2782_v15  ;;  %4062 = vpow2.f32 %v3782_v57  ;;  %v3785_v39 = vmul.f32 -1.442695, %v2784_v44  ;;  %v7186_v15 = vld [vmem:[#allocation192_spill] sm:$0xff] }
 0x738   :  { %v2656_v58 = vpop.f32.mrf.mxu0  ;;  %v2697_v25 = vpop.f32.mrf.mxu1  ;;  %4064 = vpow2.f32 %v3784_v31 }
 0x739   :  { %4066 = vpow2.f32 %v3783_v38 }
 0x73a   :  { %4068 = vpow2.f32 %v3785_v39  ;;  %v7185_v39 = vld [vmem:[#allocation191_spill] sm:$0xff] }
 0x744   :  { %v4063_v26 = vpop.eup %4062 }
 0x745   :  { %v4065_v6 = vpop.eup %4064  ;;  %v2807_v25 = vadd.f32 1.0, %v4063_v26 }
 0x746   :  { %v4067_v58 = vpop.eup %4066  ;;  %v2809_v28 = vadd.f32 1.0, %v4065_v6 }
 0x747   :  { %v4069_v45 = vpop.eup %4068  ;;  %v2808_v17 = vadd.f32 1.0, %v4067_v58  ;;  %4070 = vrcp.f32 %v2807_v25 }
 0x748   :  { %v2810_v19 = vadd.f32 1.0, %v4069_v45  ;;  %4072 = vrcp.f32 %v2809_v28 }
 0x749   :  { %4074 = vrcp.f32 %v2808_v17 }
 0x754   :  { %v4071_v28 = vpop.eup %4070 }
 0x772   :  { %v2733_v21 = vpop.f32.mrf.mxu0  ;;  %v2774_v29 = vpop.f32.mrf.mxu1 }
 0x773   :  { %v2785_v3 = vadd.f32 %v2733_v21, %v7183_v62  ;;  %v2787_v57 = vadd.f32 %v2774_v29, %v7184_v7  ;;  %v4073_v21 = vpop.eup %4072 }
 0x774   :  { %v2735_v44 = vpop.f32.mrf.mxu0  ;;  %v2776_v38 = vpop.f32.mrf.mxu1 }
 0x775   :  { %v3786_v31 = vmul.f32 -1.442695, %v2785_v3  ;;  %4076 = vtanh.f32 %v2787_v57  ;;  %v2786_v55 = vadd.f32 %v2735_v44, %v7185_v39  ;;  %v2788_v13 = vadd.f32 %v2776_v38, %v7186_v15  ;;  %v4075_v17 = vpop.eup %4074 }
 0x776   :  { %4078 = vrcp.f32 %v2810_v19  ;;  %v2737_v26 = vpop.f32.mrf.mxu0  ;;  %v2778_v6 = vpop.f32.mrf.mxu1  ;;  %v2827_v3 = vmul.f32 %v4073_v21, %v5748_v8 }
 0x777   :  { %4080 = vpow2.f32 %v3786_v31  ;;  %v3787_v45 = vmul.f32 -1.442695, %v2786_v55 }
 0x778   :  { %4082 = vtanh.f32 %v2788_v13  ;;  %v2738_v58 = vpop.f32.mrf.mxu0  ;;  %v2779_v25 = vpop.f32.mrf.mxu1 }
 0x779   :  { %4084 = vpow2.f32 %v3787_v45 }
 0x782   :  { %v4077_v29 = vpop.eup %4076 }
 0x783   :  { %v4079_v62 = vpop.eup %4078  ;;  %v2829_v7 = vmul.f32 %v4077_v29, %v4071_v28  ;;  %v7189_v29 = vld [vmem:[#allocation126_spill] sm:$0xff] }
 0x784   :  { %v4081_v57 = vpop.eup %4080  ;;  %v2828_v31 = vmul.f32 %v4079_v62, %v5752_v0  ;;  %v7187_v0 = vld [vmem:[#allocation124_spill] sm:$0xff]  ;;  %v7190_v62 = vld [vmem:[#allocation127_spill] sm:$0xff] }
 0x785   :  { %v4083_v44 = vpop.eup %4082  ;;  %v2811_v38 = vadd.f32 1.0, %v4081_v57  ;;  %v5898_v19 = vadd.f32 %v2829_v7, %v2827_v3  ;;  %v7191_v3 = vld [vmem:[#allocation128_spill] sm:$0xff]  ;;  %v7192_v7 = vld [vmem:[#allocation129_spill] sm:$0xff]  ;;  %v7193_v57 = vld [vmem:[#allocation130_spill] sm:$0xff] }
 0x786   :  { %v4085_v39 = vpop.eup %4084  ;;  %v2830_v55 = vmul.f32 %v4083_v44, %v4075_v17  ;;  %v7188_v17 = vld [vmem:[#allocation125_spill] sm:$0xff]  ;;  %v7194_v44 = vld [vmem:[#allocation131_spill] sm:$0xff] }
 0x787   :  { %4086 = vrcp.f32 %v2811_v38  ;;  %v2812_v15 = vadd.f32 1.0, %v4085_v39  ;;  %v7195_v38 = vld [vmem:[#allocation132_spill] sm:$0xff]  ;;  %v7196_v39 = vld [vmem:[#allocation133_spill] sm:$0xff] }
 0x788   :  { %4088 = vtanh.f32 %v5898_v19  ;;  %v5902_v13 = vadd.f32 %v2830_v55, %v2828_v31  ;;  %v7197_v31 = vld [vmem:[#allocation134_spill] sm:$0xff]  ;;  %v7198_v55 = vld [vmem:[#allocation135_spill] sm:$0xff] }
 0x789   :  { %4090 = vrcp.f32 %v2812_v15  ;;  %v7199_v15 = vld [vmem:[#allocation136_spill] sm:$0xff] }
 0x78a   :  { %4092 = vtanh.f32 %v5902_v13 }
 0x794   :  { %v4087_v8 = vpop.eup %4086 }
 0x795   :  { %v4089_v26 = vpop.eup %4088 }
 0x796   :  { %v4091_v6 = vpop.eup %4090  ;;  %v2835_v58 = vmul.f32 %v4089_v26, %v4087_v8  ;;  %v7200_v8 = vld [vmem:[#allocation137_spill] sm:$0xff]  ;;  %v7201_v26 = vld [vmem:[#allocation138_spill] sm:$0xff] }
 0x797   :  { %v4093_v45 = vpop.eup %4092 }
 0x798   :  { %v2836_v25 = vmul.f32 %v4093_v45, %v4091_v6  ;;  %v5905_v21 = vpack.c.bf16 %v2835_v58, %v2835_v58  ;;  %v7202_v6 = vld [vmem:[#allocation139_spill] sm:$0xff]  ;;  %v7203_v45 = vld [vmem:[#allocation140_spill] sm:$0xff]  ;;  %v7204_v58 = vld [vmem:[#allocation141_spill] sm:$0xff] }
 0x79a   :  { %v2846_v28 = vpack.c.bf16 %v2836_v25, %v2836_v25  ;;  %v7205_v25 = vld [vmem:[#allocation142_spill] sm:$0xff] }
 0x79c   :  { %2879 = vmatprep.mubr.bf16.mxu0 %v2846_v28  ;;  %2920 = vmatprep.mubr.bf16.mxu1 %v2846_v28 }
 0x79d   :  { %2880 = vmatmul.mubr.bf16.vlgmr.msra.gmra.mxu0 %v5905_v21  ;;  %2921 = vmatmul.mubr.bf16.vlgmr.msra.gmra.mxu1 %v5905_v21 }
 0x79e   :  { %2930 = vmatpush1.bf16.msra.mxu0 %v6703_v12  ;;  %2971 = vmatpush1.bf16.msra.mxu1 %v6704_v36 }
 0x79f   :  { %2961 = vmatprep.mubr.bf16.mxu0 %v2846_v28  ;;  %3002 = vmatprep.mubr.bf16.mxu1 %v2846_v28  ;;  %v7206_v28 = vld [vmem:[#allocation143_spill] sm:$0xff] }
 0x7a0   :  { %2931 = vmatprep.subr.bf16.mxu0 %v6705_v22  ;;  %2972 = vmatprep.subr.bf16.mxu1 %v6706_v61 }
 0x7a2   :  { %2932 = vmatpush1.bf16.msra.mxu0 %v6707_v63  ;;  %2973 = vmatpush1.bf16.msra.mxu1 %v6708_v54 }
 0x7a3   :  { %2933 = vmatprep.subr.bf16.mxu0 %v6709_v37  ;;  %2974 = vmatprep.subr.bf16.mxu1 %v6710_v53 }
 0x7a6   :  { %2934 = vmatpush1.bf16.msra.mxu0 %v6711_v1  ;;  %2975 = vmatpush1.bf16.msra.mxu1 %v6712_v59 }
 0x7a7   :  { %2935 = vmatprep.subr.bf16.mxu0 %v6713_v9  ;;  %2976 = vmatprep.subr.bf16.mxu1 %v6714_v11 }
 0x7aa   :  { %2936 = vmatpush1.bf16.msra.mxu0 %v6715_v52  ;;  %2977 = vmatpush1.bf16.msra.mxu1 %v6716_v4 }
 0x7ab   :  { %2937 = vmatprep.subr.bf16.mxu0 %v6717_v23  ;;  %2978 = vmatprep.subr.bf16.mxu1 %v6718_v20 }
 0x7ae   :  { %2938 = vmatpush1.bf16.msra.mxu0 %v6719_v46  ;;  %2979 = vmatpush1.bf16.msra.mxu1 %v6720_v60 }
 0x7af   :  { %2939 = vmatprep.subr.bf16.mxu0 %v6807_v18  ;;  %2980 = vmatprep.subr.bf16.mxu1 %v6808_v41 }
 0x7b2   :  { %2940 = vmatpush1.bf16.msra.mxu0 %v6809_v34  ;;  %2981 = vmatpush1.bf16.msra.mxu1 %v6810_v42 }
 0x7b3   :  { %2941 = vmatprep.subr.bf16.mxu0 %v6811_v43  ;;  %2982 = vmatprep.subr.bf16.mxu1 %v6812_v50 }
 0x7b6   :  { %2942 = vmatpush1.bf16.msra.mxu0 %v6813_v24  ;;  %2983 = vmatpush1.bf16.msra.mxu1 %v6814_v16 }
 0x7b7   :  { %2943 = vmatprep.subr.bf16.mxu0 %v6815_v14  ;;  %2984 = vmatprep.subr.bf16.mxu1 %v6816_v40 }
 0x7ba   :  { %2944 = vmatpush1.bf16.msra.mxu0 %v6817_v35  ;;  %2985 = vmatpush1.bf16.msra.mxu1 %v6818_v51 }
 0x7bb   :  { %2945 = vmatprep.subr.bf16.mxu0 %v6819_v56  ;;  %2986 = vmatprep.subr.bf16.mxu1 %v6820_v30 }
 0x7be   :  { %2946 = vmatpush2.bf16.msra.mxu0 %v6821_v33  ;;  %2987 = vmatpush2.bf16.msra.mxu1 %v6822_v48 }
 0x7bf   :  { %2947 = vmatprep.subr.bf16.mxu0 %v6823_v5  ;;  %2988 = vmatprep.subr.bf16.mxu1 %v6824_v32 }
 0x7c2   :  { %2948 = vmatpush2.bf16.msra.mxu0 %v6825_v49  ;;  %2989 = vmatpush2.bf16.msra.mxu1 %v6740_v2 }
 0x7c3   :  { %2949 = vmatprep.subr.bf16.mxu0 %v6741_v47  ;;  %2990 = vmatprep.subr.bf16.mxu1 %v6742_v10 }
 0x7c6   :  { %2950 = vmatpush2.bf16.msra.mxu0 %v6826_v27  ;;  %2991 = vmatpush2.bf16.msra.mxu1 %v7187_v0 }
 0x7c7   :  { %2951 = vmatprep.subr.bf16.mxu0 %v7188_v17  ;;  %2992 = vmatprep.subr.bf16.mxu1 %v7189_v29 }
 0x7ca   :  { %2952 = vmatpush2.bf16.msra.mxu0 %v7190_v62  ;;  %2993 = vmatpush2.bf16.msra.mxu1 %v7191_v3  ;;  %v7276_v3 = vld [vmem:[#allocation167_spill] sm:$0xff] }
 0x7cb   :  { %2953 = vmatprep.subr.bf16.mxu0 %v7192_v7  ;;  %2994 = vmatprep.subr.bf16.mxu1 %v7193_v57  ;;  %v7274_v57 = vld [vmem:[#allocation165_spill] sm:$0xff]  ;;  %v7275_v7 = vld [vmem:[#allocation166_spill] sm:$0xff] }
 0x7ce   :  { %2954 = vmatpush2.bf16.msra.mxu0 %v7194_v44  ;;  %2995 = vmatpush2.bf16.msra.mxu1 %v7195_v38 }
 0x7cf   :  { %2955 = vmatprep.subr.bf16.mxu0 %v7196_v39  ;;  %2996 = vmatprep.subr.bf16.mxu1 %v7197_v31  ;;  %v7207_v39 = vld [vmem:[#allocation144_spill] sm:$0xff]  ;;  %v7208_v31 = vld [vmem:[#allocation17_spill] sm:$0xff] }
 0x7d2   :  { %2956 = vmatpush2.bf16.msra.mxu0 %v7198_v55  ;;  %2997 = vmatpush2.bf16.msra.mxu1 %v7199_v15  ;;  %v7209_v55 = vld [vmem:[#allocation18_spill] sm:$0xff] }
 0x7d3   :  { %2957 = vmatprep.subr.bf16.mxu0 %v7200_v8  ;;  %2998 = vmatprep.subr.bf16.mxu1 %v7201_v26  ;;  %v7210_v26 = vld [vmem:[#allocation19_spill] sm:$0xff]  ;;  %v7219_v8 = vld [vmem:[#allocation28_spill] sm:$0xff] }
 0x7d6   :  { %2958 = vmatpush2.bf16.msra.mxu0 %v7202_v6  ;;  %2999 = vmatpush2.bf16.msra.mxu1 %v7203_v45  ;;  %v7211_v6 = vld [vmem:[#allocation20_spill] sm:$0xff]  ;;  %v7212_v45 = vld [vmem:[#allocation21_spill] sm:$0xff] }
 0x7d7   :  { %2959 = vmatprep.subr.bf16.mxu0 %v7204_v58  ;;  %3000 = vmatprep.subr.bf16.mxu1 %v7205_v25  ;;  %v7213_v58 = vld [vmem:[#allocation22_spill] sm:$0xff]  ;;  %v7214_v25 = vld [vmem:[#allocation23_spill] sm:$0xff] }
 0x7da   :  { %2960 = vmatpush2.bf16.msra.mxu0 %v7206_v28  ;;  %3001 = vmatpush2.bf16.msra.mxu1 %v7207_v39  ;;  %v7215_v28 = vld [vmem:[#allocation24_spill] sm:$0xff]  ;;  %v7216_v39 = vld [vmem:[#allocation25_spill] sm:$0xff] }
 0x7db   :  { %3077 = vmatprep.subr.bf16.mxu0 %v7208_v31  ;;  %3118 = vmatprep.subr.bf16.mxu1 %v7209_v55  ;;  %v7217_v31 = vld [vmem:[#allocation26_spill] sm:$0xff]  ;;  %v7218_v55 = vld [vmem:[#allocation27_spill] sm:$0xff] }
 0x7dd   :  { %2962 = vmatmul.mubr.bf16.vlgmr.msra.gmra.mxu0 %v5905_v21  ;;  %3003 = vmatmul.mubr.bf16.vlgmr.msra.gmra.mxu1 %v5905_v21  ;;  %v7220_v21 = vld [vmem:[#allocation29_spill] sm:$0xff] }
 0x7de   :  { %3078 = vmatpush1.bf16.msra.mxu0 %v7210_v26  ;;  %3119 = vmatpush1.bf16.msra.mxu1 %v7211_v6  ;;  %v7221_v26 = vld [vmem:[#allocation30_spill] sm:$0xff]  ;;  %v7222_v6 = vld [vmem:[#allocation31_spill] sm:$0xff] }
 0x7df   :  { %3079 = vmatprep.subr.bf16.mxu0 %v7212_v45  ;;  %3120 = vmatprep.subr.bf16.mxu1 %v7213_v58  ;;  %v7223_v45 = vld [vmem:[#allocation32_spill] sm:$0xff]  ;;  %v7224_v58 = vld [vmem:[#allocation33_spill] sm:$0xff] }
 0x7e2   :  { %3080 = vmatpush1.bf16.msra.mxu0 %v7214_v25  ;;  %3121 = vmatpush1.bf16.msra.mxu1 %v7215_v28  ;;  %v7225_v25 = vld [vmem:[#allocation34_spill] sm:$0xff]  ;;  %v7226_v28 = vld [vmem:[#allocation35_spill] sm:$0xff] }
 0x7e3   :  { %3081 = vmatprep.subr.bf16.mxu0 %v7216_v39  ;;  %3122 = vmatprep.subr.bf16.mxu1 %v7217_v31  ;;  %v7227_v39 = vld [vmem:[#allocation36_spill] sm:$0xff]  ;;  %v7228_v31 = vld [vmem:[#allocation37_spill] sm:$0xff] }
 0x7e6   :  { %3082 = vmatpush1.bf16.msra.mxu0 %v7218_v55  ;;  %3123 = vmatpush1.bf16.msra.mxu1 %v7219_v8  ;;  %v7229_v55 = vld [vmem:[#allocation38_spill] sm:$0xff]  ;;  %v7230_v8 = vld [vmem:[#allocation39_spill] sm:$0xff] }
 0x7e7   :  { %3083 = vmatprep.subr.bf16.mxu0 %v7220_v21  ;;  %3124 = vmatprep.subr.bf16.mxu1 %v7221_v26  ;;  %v7231_v21 = vld [vmem:[#allocation40_spill] sm:$0xff]  ;;  %v7232_v26 = vld [vmem:[#allocation41_spill] sm:$0xff] }
 0x7ea   :  { %3084 = vmatpush1.bf16.msra.mxu0 %v7222_v6  ;;  %3125 = vmatpush1.bf16.msra.mxu1 %v7223_v45  ;;  %v7233_v6 = vld [vmem:[#allocation42_spill] sm:$0xff]  ;;  %v7234_v45 = vld [vmem:[#allocation43_spill] sm:$0xff] }
 0x7eb   :  { %3085 = vmatprep.subr.bf16.mxu0 %v7224_v58  ;;  %3126 = vmatprep.subr.bf16.mxu1 %v7225_v25  ;;  %v7235_v58 = vld [vmem:[#allocation44_spill] sm:$0xff]  ;;  %v7236_v25 = vld [vmem:[#allocation45_spill] sm:$0xff] }
 0x7ee   :  { %3086 = vmatpush1.bf16.msra.mxu0 %v7226_v28  ;;  %3127 = vmatpush1.bf16.msra.mxu1 %v7227_v39  ;;  %v7237_v28 = vld [vmem:[#allocation46_spill] sm:$0xff]  ;;  %v7238_v39 = vld [vmem:[#allocation47_spill] sm:$0xff] }
 0x7ef   :  { %3087 = vmatprep.subr.bf16.mxu0 %v7228_v31  ;;  %3128 = vmatprep.subr.bf16.mxu1 %v7229_v55  ;;  %v7239_v31 = vld [vmem:[#allocation48_spill] sm:$0xff]  ;;  %v7240_v55 = vld [vmem:[#allocation49_spill] sm:$0xff] }
 0x7f2   :  { %3088 = vmatpush1.bf16.msra.mxu0 %v7230_v8  ;;  %3129 = vmatpush1.bf16.msra.mxu1 %v7231_v21  ;;  %v7241_v8 = vld [vmem:[#allocation50_spill] sm:$0xff]  ;;  %v7242_v21 = vld [vmem:[#allocation51_spill] sm:$0xff] }
 0x7f3   :  { %3089 = vmatprep.subr.bf16.mxu0 %v7232_v26  ;;  %3130 = vmatprep.subr.bf16.mxu1 %v7233_v6  ;;  %v7243_v26 = vld [vmem:[#allocation52_spill] sm:$0xff]  ;;  %v7244_v6 = vld [vmem:[#allocation53_spill] sm:$0xff] }
 0x7f6   :  { %3090 = vmatpush1.bf16.msra.mxu0 %v7234_v45  ;;  %3131 = vmatpush1.bf16.msra.mxu1 %v7235_v58  ;;  %v7245_v45 = vld [vmem:[#allocation54_spill] sm:$0xff]  ;;  %v7246_v58 = vld [vmem:[#allocation55_spill] sm:$0xff] }
 0x7f7   :  { %3091 = vmatprep.subr.bf16.mxu0 %v7236_v25  ;;  %3132 = vmatprep.subr.bf16.mxu1 %v7237_v28  ;;  %v7247_v25 = vld [vmem:[#allocation56_spill] sm:$0xff]  ;;  %v7248_v28 = vld [vmem:[#allocation57_spill] sm:$0xff] }
 0x7fa   :  { %3092 = vmatpush1.bf16.msra.mxu0 %v7238_v39  ;;  %3133 = vmatpush1.bf16.msra.mxu1 %v7239_v31  ;;  %v7249_v39 = vld [vmem:[#allocation58_spill] sm:$0xff]  ;;  %v7250_v31 = vld [vmem:[#allocation59_spill] sm:$0xff] }
 0x7fb   :  { %3093 = vmatprep.subr.bf16.mxu0 %v7240_v55  ;;  %3134 = vmatprep.subr.bf16.mxu1 %v7241_v8  ;;  %v7251_v55 = vld [vmem:[#allocation60_spill] sm:$0xff]  ;;  %v7252_v8 = vld [vmem:[#allocation61_spill] sm:$0xff] }
 0x7fe   :  { %3094 = vmatpush2.bf16.msra.mxu0 %v7242_v21  ;;  %3135 = vmatpush2.bf16.msra.mxu1 %v7243_v26  ;;  %v7253_v21 = vld [vmem:[#allocation62_spill] sm:$0xff]  ;;  %v7254_v26 = vld [vmem:[#allocation63_spill] sm:$0xff] }
 0x7ff   :  { %3095 = vmatprep.subr.bf16.mxu0 %v7244_v6  ;;  %3136 = vmatprep.subr.bf16.mxu1 %v7245_v45  ;;  %v7255_v6 = vld [vmem:[#allocation64_spill] sm:$0xff]  ;;  %v7256_v45 = vld [vmem:[#allocation65_spill] sm:$0xff] }
 0x802   :  { %3096 = vmatpush2.bf16.msra.mxu0 %v7246_v58  ;;  %3137 = vmatpush2.bf16.msra.mxu1 %v7247_v25  ;;  %v7257_v58 = vld [vmem:[#allocation66_spill] sm:$0xff]  ;;  %v7258_v25 = vld [vmem:[#allocation67_spill] sm:$0xff] }
 0x803   :  { %3097 = vmatprep.subr.bf16.mxu0 %v7248_v28  ;;  %3138 = vmatprep.subr.bf16.mxu1 %v7249_v39  ;;  %v7259_v28 = vld [vmem:[#allocation68_spill] sm:$0xff]  ;;  %v7260_v39 = vld [vmem:[#allocation69_spill] sm:$0xff] }
 0x806   :  { %3098 = vmatpush2.bf16.msra.mxu0 %v7250_v31  ;;  %3139 = vmatpush2.bf16.msra.mxu1 %v7251_v55  ;;  %v7261_v31 = vld [vmem:[#allocation70_spill] sm:$0xff]  ;;  %v7262_v55 = vld [vmem:[#allocation71_spill] sm:$0xff] }
 0x807   :  { %3099 = vmatprep.subr.bf16.mxu0 %v7252_v8  ;;  %3140 = vmatprep.subr.bf16.mxu1 %v7253_v21  ;;  %v7263_v8 = vld [vmem:[#allocation72_spill] sm:$0xff]  ;;  %v7264_v21 = vld [vmem:[#allocation73_spill] sm:$0xff] }
 0x80a   :  { %3100 = vmatpush2.bf16.msra.mxu0 %v7254_v26  ;;  %3141 = vmatpush2.bf16.msra.mxu1 %v7255_v6  ;;  %v7265_v26 = vld [vmem:[#allocation74_spill] sm:$0xff]  ;;  %v7266_v6 = vld [vmem:[#allocation75_spill] sm:$0xff] }
 0x80b   :  { %3101 = vmatprep.subr.bf16.mxu0 %v7256_v45  ;;  %3142 = vmatprep.subr.bf16.mxu1 %v7257_v58  ;;  %v7267_v45 = vld [vmem:[#allocation76_spill] sm:$0xff]  ;;  %v7268_v58 = vld [vmem:[#allocation77_spill] sm:$0xff] }
 0x80e   :  { %3102 = vmatpush2.bf16.msra.mxu0 %v7258_v25  ;;  %3143 = vmatpush2.bf16.msra.mxu1 %v7259_v28  ;;  %v7269_v25 = vld [vmem:[#allocation78_spill] sm:$0xff]  ;;  %v7270_v28 = vld [vmem:[#allocation79_spill] sm:$0xff] }
 0x80f   :  { %3103 = vmatprep.subr.bf16.mxu0 %v7260_v39  ;;  %3144 = vmatprep.subr.bf16.mxu1 %v7261_v31  ;;  %v7271_v39 = vld [vmem:[#allocation80_spill] sm:$0xff]  ;;  %v7272_v31 = vld [vmem:[#allocation81_spill] sm:$0xff] }
 0x812   :  { %3104 = vmatpush2.bf16.msra.mxu0 %v7262_v55  ;;  %3145 = vmatpush2.bf16.msra.mxu1 %v7263_v8  ;;  %v7273_v55 = vld [vmem:[#allocation82_spill] sm:$0xff] }
 0x813   :  { %3105 = vmatprep.subr.bf16.mxu0 %v7264_v21  ;;  %3146 = vmatprep.subr.bf16.mxu1 %v7265_v26 }
 0x816   :  { %3106 = vmatpush2.bf16.msra.mxu0 %v7266_v6  ;;  %3147 = vmatpush2.bf16.msra.mxu1 %v7267_v45 }
 0x817   :  { %3107 = vmatprep.subr.bf16.mxu0 %v7268_v58  ;;  %3148 = vmatprep.subr.bf16.mxu1 %v7269_v25 }
 0x81a   :  { %3108 = vmatpush2.bf16.msra.mxu0 %v7270_v28  ;;  %3149 = vmatpush2.bf16.msra.mxu1 %v7271_v39  ;;  %v7277_v39 = vld [vmem:[#allocation168_spill] sm:$0xff] }
 0x81b   :  { %3159 = vmatprep.subr.bf16.mxu0 %v7272_v31  ;;  %3200 = vmatprep.subr.bf16.mxu1 %v7273_v55 }
 0x85d   :  { %v2881_v8 = vpop.f32.mrf.mxu0  ;;  %v2922_v21 = vpop.f32.mrf.mxu1 }
 0x85e   :  { %v3011_v58 = vadd.f32 %v2881_v8, %v7274_v57  ;;  %v3013_v25 = vadd.f32 %v2922_v21, %v7275_v7  ;;  %v7278_v21 = vld [vmem:[#allocation193_spill] sm:$0xff] }
 0x85f   :  { %v2883_v15 = vpop.f32.mrf.mxu0  ;;  %v2924_v26 = vpop.f32.mrf.mxu1 }
 0x860   :  { %v3012_v28 = vadd.f32 %v2883_v15, %v7276_v3  ;;  %v3788_v62 = vmul.f32 -1.442695, %v3011_v58  ;;  %v3014_v29 = vadd.f32 %v2924_v26, %v7277_v39  ;;  %v3790_v31 = vmul.f32 -1.442695, %v3013_v25  ;;  %v7279_v58 = vld [vmem:[#allocation194_spill] sm:$0xff] }
 0x861   :  { %v2885_v38 = vpop.f32.mrf.mxu0  ;;  %v2926_v6 = vpop.f32.mrf.mxu1 }
 0x862   :  { %v3789_v17 = vmul.f32 -1.442695, %v3012_v28  ;;  %4094 = vpow2.f32 %v3788_v62  ;;  %v3791_v55 = vmul.f32 -1.442695, %v3014_v29  ;;  %v7280_v28 = vld [vmem:[#allocation195_spill] sm:$0xff] }
 0x863   :  { %v2886_v44 = vpop.f32.mrf.mxu0  ;;  %v2927_v45 = vpop.f32.mrf.mxu1  ;;  %4096 = vpow2.f32 %v3790_v31  ;;  %v7281_v31 = vld [vmem:[#allocation196_spill] sm:$0xff] }
 0x864   :  { %4098 = vpow2.f32 %v3789_v17 }
 0x865   :  { %4100 = vpow2.f32 %v3791_v55 }
 0x86f   :  { %v4095_v38 = vpop.eup %4094 }
 0x870   :  { %v4097_v6 = vpop.eup %4096  ;;  %v3037_v45 = vadd.f32 1.0, %v4095_v38 }
 0x871   :  { %v4099_v44 = vpop.eup %4098  ;;  %v3039_v57 = vadd.f32 1.0, %v4097_v6 }
 0x872   :  { %v4101_v0 = vpop.eup %4100  ;;  %v3038_v8 = vadd.f32 1.0, %v4099_v44  ;;  %4102 = vrcp.f32 %v3037_v45 }
 0x873   :  { %v3040_v7 = vadd.f32 1.0, %v4101_v0  ;;  %4104 = vrcp.f32 %v3039_v57 }
 0x874   :  { %4106 = vrcp.f32 %v3038_v8 }
 0x87f   :  { %v4103_v57 = vpop.eup %4102 }
 0x89d   :  { %v2963_v3 = vpop.f32.mrf.mxu0  ;;  %v3004_v15 = vpop.f32.mrf.mxu1 }
 0x89e   :  { %v3015_v26 = vadd.f32 %v2963_v3, %v7278_v21  ;;  %v3017_v62 = vadd.f32 %v3004_v15, %v7279_v58  ;;  %v4105_v3 = vpop.eup %4104 }
 0x89f   :  { %v2965_v29 = vpop.f32.mrf.mxu0  ;;  %v3006_v17 = vpop.f32.mrf.mxu1 }
 0x8a0   :  { %v3792_v25 = vmul.f32 -1.442695, %v3015_v26  ;;  %4108 = vtanh.f32 %v3017_v62  ;;  %v3016_v39 = vadd.f32 %v2965_v29, %v7280_v28  ;;  %v3018_v55 = vadd.f32 %v3006_v17, %v7281_v31  ;;  %v4107_v8 = vpop.eup %4106 }
 0x8a1   :  { %4110 = vrcp.f32 %v3040_v7  ;;  %v2967_v38 = vpop.f32.mrf.mxu0  ;;  %v3008_v6 = vpop.f32.mrf.mxu1  ;;  %v3057_v26 = vmul.f32 %v4105_v3, %v5898_v19 }
 0x8a2   :  { %4112 = vpow2.f32 %v3792_v25  ;;  %v3793_v0 = vmul.f32 -1.442695, %v3016_v39 }
 0x8a3   :  { %4114 = vtanh.f32 %v3018_v55  ;;  %v2968_v44 = vpop.f32.mrf.mxu0  ;;  %v3009_v45 = vpop.f32.mrf.mxu1 }
 0x8a4   :  { %4116 = vpow2.f32 %v3793_v0 }
 0x8ad   :  { %v4109_v15 = vpop.eup %4108 }
 0x8ae   :  { %v4111_v21 = vpop.eup %4110  ;;  %v3059_v58 = vmul.f32 %v4109_v15, %v4103_v57  ;;  %v3317_v15 = vld [vmem:[#allocation8 + $0xa0] sm:$0xff] }
 0x8af   :  { %v4113_v62 = vpop.eup %4112  ;;  %v3058_v25 = vmul.f32 %v4111_v21, %v5902_v13  ;;  %v3318_v13 = vld [vmem:[#allocation8 + $0xa8] sm:$0xff]  ;;  %v3301_v21 = vld [vmem:[#allocation8 + $0x20] sm:$0xff] }
 0x8b0   :  { %v4115_v29 = vpop.eup %4114  ;;  %v3041_v17 = vadd.f32 1.0, %v4113_v62  ;;  %v6048_v7 = vadd.f32 %v3059_v58, %v3057_v26  ;;  %v3316_v26 = vld [vmem:[#allocation8 + $0x98] sm:$0xff]  ;;  %v3315_v62 = vld [vmem:[#allocation8 + $0x90] sm:$0xff] }
 0x8b1   :  { %v4117_v28 = vpop.eup %4116  ;;  %v3060_v39 = vmul.f32 %v4115_v29, %v4107_v8  ;;  %v3302_v8 = vld [vmem:[#allocation8 + $0x28] sm:$0xff]  ;;  %v3300_v58 = vld [vmem:[#allocation8 + $0x18] sm:$0xff]  ;;  %v3299_v29 = vld [vmem:[#allocation8 + $0x10] sm:$0xff] }
 0x8b2   :  { %4118 = vrcp.f32 %v3041_v17  ;;  %v3042_v31 = vadd.f32 1.0, %v4117_v28  ;;  %v3314_v17 = vld [vmem:[#allocation8 + $0x88] sm:$0xff] }
 0x8b3   :  { %4120 = vtanh.f32 %v6048_v7  ;;  %v6052_v55 = vadd.f32 %v3060_v39, %v3058_v25  ;;  %v3298_v28 = vld [vmem:[#allocation8 + $0x8] sm:$0xff]  ;;  %v3313_v25 = vld [vmem:[#allocation8 + $0x80] sm:$0xff] }
 0x8b4   :  { %4122 = vrcp.f32 %v3042_v31  ;;  %v3297_v39 = vld [vmem:[#allocation8] sm:$0xff]  ;;  %v3414_v31 = vld [vmem:[%s6224_s6 + $0x78] sm:$0xff] }
 0x8b5   :  { %4124 = vtanh.f32 %v6052_v55 }
 0x8bf   :  { %v4119_v19 = vpop.eup %4118 }
 0x8c0   :  { %v4121_v38 = vpop.eup %4120 }
 0x8c1   :  { %v4123_v6 = vpop.eup %4122  ;;  %v3065_v44 = vmul.f32 %v4121_v38, %v4119_v19  ;;  %v4302_v19 = vmov 0.0   ;;  %v3413_v38 = vld [vmem:[%s6224_s6 + $0x70] sm:$0xff] }
 0x8c2   :  { %v4125_v0 = vpop.eup %4124 }
 0x8c3   :  { %v3066_v45 = vmul.f32 %v4125_v0, %v4123_v6  ;;  %v6055_v3 = vpack.c.bf16 %v3065_v44, %v3065_v44  ;;  %v3412_v6 = vld [vmem:[%s6224_s6 + $0x68] sm:$0xff]  ;;  %v3411_v0 = vld [vmem:[%s6224_s6 + $0x60] sm:$0xff]  ;;  %v3410_v44 = vld [vmem:[%s6224_s6 + $0x58] sm:$0xff] }
 0x8c5   :  { %v3076_v57 = vpack.c.bf16 %v3066_v45, %v3066_v45  ;;  %v3409_v45 = vld [vmem:[%s6224_s6 + $0x50] sm:$0xff] }
 0x8c7   :  { %3109 = vmatprep.mubr.bf16.mxu0 %v3076_v57  ;;  %3150 = vmatprep.mubr.bf16.mxu1 %v3076_v57 }
 0x8c8   :  { %3110 = vmatmul.mubr.bf16.vlgmr.msra.gmra.mxu0 %v6055_v3  ;;  %3151 = vmatmul.mubr.bf16.vlgmr.msra.gmra.mxu1 %v6055_v3 }
 0x8c9   :  { %3160 = vmatpush1.bf16.msra.mxu0 %v6703_v12  ;;  %3201 = vmatpush1.bf16.msra.mxu1 %v6704_v36  ;;  %v7282_v12 = vld [vmem:[#allocation124_spill] sm:$0xff]  ;;  %v7283_v36 = vld [vmem:[#allocation125_spill] sm:$0xff] }
 0x8ca   :  { %3191 = vmatprep.mubr.bf16.mxu0 %v3076_v57  ;;  %3232 = vmatprep.mubr.bf16.mxu1 %v3076_v57  ;;  %v3408_v57 = vld [vmem:[%s6224_s6 + $0x48] sm:$0xff] }
 0x8cb   :  { %3161 = vmatprep.subr.bf16.mxu0 %v6705_v22  ;;  %3202 = vmatprep.subr.bf16.mxu1 %v6706_v61  ;;  %v7284_v22 = vld [vmem:[#allocation126_spill] sm:$0xff]  ;;  %v7285_v61 = vld [vmem:[#allocation127_spill] sm:$0xff] }
 0x8cd   :  { %3162 = vmatpush1.bf16.msra.mxu0 %v6707_v63  ;;  %3203 = vmatpush1.bf16.msra.mxu1 %v6708_v54  ;;  %v7286_v63 = vld [vmem:[#allocation128_spill] sm:$0xff]  ;;  %v7287_v54 = vld [vmem:[#allocation129_spill] sm:$0xff] }
 0x8ce   :  { %3163 = vmatprep.subr.bf16.mxu0 %v6709_v37  ;;  %3204 = vmatprep.subr.bf16.mxu1 %v6710_v53  ;;  %v7288_v37 = vld [vmem:[#allocation130_spill] sm:$0xff]  ;;  %v7289_v53 = vld [vmem:[#allocation131_spill] sm:$0xff] }
 0x8d1   :  { %3164 = vmatpush1.bf16.msra.mxu0 %v6711_v1  ;;  %3205 = vmatpush1.bf16.msra.mxu1 %v6712_v59  ;;  %v7290_v1 = vld [vmem:[#allocation132_spill] sm:$0xff]  ;;  %v7291_v59 = vld [vmem:[#allocation133_spill] sm:$0xff] }
 0x8d2   :  { %3165 = vmatprep.subr.bf16.mxu0 %v6713_v9  ;;  %3206 = vmatprep.subr.bf16.mxu1 %v6714_v11  ;;  %v7292_v9 = vld [vmem:[#allocation134_spill] sm:$0xff]  ;;  %v7293_v11 = vld [vmem:[#allocation135_spill] sm:$0xff] }
 0x8d5   :  { %3166 = vmatpush1.bf16.msra.mxu0 %v6715_v52  ;;  %3207 = vmatpush1.bf16.msra.mxu1 %v6716_v4  ;;  %v7294_v52 = vld [vmem:[#allocation136_spill] sm:$0xff]  ;;  %v7295_v4 = vld [vmem:[#allocation137_spill] sm:$0xff] }
 0x8d6   :  { %3167 = vmatprep.subr.bf16.mxu0 %v6717_v23  ;;  %3208 = vmatprep.subr.bf16.mxu1 %v6718_v20  ;;  %v7296_v23 = vld [vmem:[#allocation138_spill] sm:$0xff]  ;;  %v7297_v20 = vld [vmem:[#allocation139_spill] sm:$0xff] }
 0x8d9   :  { %3168 = vmatpush1.bf16.msra.mxu0 %v6719_v46  ;;  %3209 = vmatpush1.bf16.msra.mxu1 %v6720_v60  ;;  %v7298_v46 = vld [vmem:[#allocation140_spill] sm:$0xff]  ;;  %v7299_v60 = vld [vmem:[#allocation141_spill] sm:$0xff] }
 0x8da   :  { %3169 = vmatprep.subr.bf16.mxu0 %v6807_v18  ;;  %3210 = vmatprep.subr.bf16.mxu1 %v6808_v41  ;;  %v3328_v18 = vld [vmem:[#allocation8 + $0xf8] sm:$0xff] }
 0x8db   :  { %v3312_v41 = vld [vmem:[#allocation8 + $0x78] sm:$0xff] }
 0x8dd   :  { %3170 = vmatpush1.bf16.msra.mxu0 %v6809_v34  ;;  %3211 = vmatpush1.bf16.msra.mxu1 %v6810_v42  ;;  %v3327_v34 = vld [vmem:[#allocation8 + $0xf0] sm:$0xff] }
 0x8de   :  { %3171 = vmatprep.subr.bf16.mxu0 %v6811_v43  ;;  %3212 = vmatprep.subr.bf16.mxu1 %v6812_v50  ;;  %v3311_v42 = vld [vmem:[#allocation8 + $0x70] sm:$0xff]  ;;  %v3326_v43 = vld [vmem:[#allocation8 + $0xe8] sm:$0xff] }
 0x8df   :  { %v3310_v50 = vld [vmem:[#allocation8 + $0x68] sm:$0xff] }
 0x8e1   :  { %3172 = vmatpush1.bf16.msra.mxu0 %v6813_v24  ;;  %3213 = vmatpush1.bf16.msra.mxu1 %v6814_v16  ;;  %v3325_v24 = vld [vmem:[#allocation8 + $0xe0] sm:$0xff] }
 0x8e2   :  { %3173 = vmatprep.subr.bf16.mxu0 %v6815_v14  ;;  %3214 = vmatprep.subr.bf16.mxu1 %v6816_v40  ;;  %v3309_v16 = vld [vmem:[#allocation8 + $0x60] sm:$0xff]  ;;  %v3324_v14 = vld [vmem:[#allocation8 + $0xd8] sm:$0xff] }
 0x8e3   :  { %v3308_v40 = vld [vmem:[#allocation8 + $0x58] sm:$0xff] }
 0x8e5   :  { %3174 = vmatpush1.bf16.msra.mxu0 %v6817_v35  ;;  %3215 = vmatpush1.bf16.msra.mxu1 %v6818_v51  ;;  %v3323_v35 = vld [vmem:[#allocation8 + $0xd0] sm:$0xff] }
 0x8e6   :  { %3175 = vmatprep.subr.bf16.mxu0 %v6819_v56  ;;  %3216 = vmatprep.subr.bf16.mxu1 %v6820_v30  ;;  %v3307_v51 = vld [vmem:[#allocation8 + $0x50] sm:$0xff]  ;;  %v3322_v56 = vld [vmem:[#allocation8 + $0xc8] sm:$0xff] }
 0x8e7   :  { %v3306_v30 = vld [vmem:[#allocation8 + $0x48] sm:$0xff] }
 0x8e9   :  { %3176 = vmatpush2.bf16.msra.mxu0 %v6821_v33  ;;  %3217 = vmatpush2.bf16.msra.mxu1 %v6822_v48  ;;  %v3321_v33 = vld [vmem:[#allocation8 + $0xc0] sm:$0xff] }
 0x8ea   :  { %3177 = vmatprep.subr.bf16.mxu0 %v6823_v5  ;;  %3218 = vmatprep.subr.bf16.mxu1 %v6824_v32  ;;  %v3305_v48 = vld [vmem:[#allocation8 + $0x40] sm:$0xff]  ;;  %v3320_v5 = vld [vmem:[#allocation8 + $0xb8] sm:$0xff] }
 0x8eb   :  { %v3304_v32 = vld [vmem:[#allocation8 + $0x38] sm:$0xff] }
 0x8ed   :  { %3178 = vmatpush2.bf16.msra.mxu0 %v6825_v49  ;;  %3219 = vmatpush2.bf16.msra.mxu1 %v6740_v2  ;;  %v7300_v2 = vld [vmem:[#allocation142_spill] sm:$0xff]  ;;  %v3319_v49 = vld [vmem:[#allocation8 + $0xb0] sm:$0xff] }
 0x8ee   :  { %3179 = vmatprep.subr.bf16.mxu0 %v6741_v47  ;;  %3220 = vmatprep.subr.bf16.mxu1 %v6742_v10  ;;  %v7301_v47 = vld [vmem:[#allocation143_spill] sm:$0xff]  ;;  %v7302_v10 = vld [vmem:[#allocation144_spill] sm:$0xff] }
 0x8f1   :  { %3180 = vmatpush2.bf16.msra.mxu0 %v6826_v27  ;;  %3221 = vmatpush2.bf16.msra.mxu1 %v7282_v12  ;;  %v3303_v27 = vld [vmem:[#allocation8 + $0x30] sm:$0xff]  ;;  %v3406_v12 = vld [vmem:[%s6224_s6 + $0x38] sm:$0xff] }
 0x8f2   :  { %3181 = vmatprep.subr.bf16.mxu0 %v7283_v36  ;;  %3222 = vmatprep.subr.bf16.mxu1 %v7284_v22  ;;  %v3405_v36 = vld [vmem:[%s6224_s6 + $0x30] sm:$0xff]  ;;  %v3404_v22 = vld [vmem:[%s6224_s6 + $0x28] sm:$0xff] }
 0x8f5   :  { %3182 = vmatpush2.bf16.msra.mxu0 %v7285_v61  ;;  %3223 = vmatpush2.bf16.msra.mxu1 %v7286_v63  ;;  %v3403_v61 = vld [vmem:[%s6224_s6 + $0x20] sm:$0xff] }
 0x8f6   :  { %3183 = vmatprep.subr.bf16.mxu0 %v7287_v54  ;;  %3224 = vmatprep.subr.bf16.mxu1 %v7288_v37  ;;  %v3402_v37 = vld [vmem:[%s6224_s6 + $0x18] sm:$0xff] }
 0x8f9   :  { %3184 = vmatpush2.bf16.msra.mxu0 %v7289_v53  ;;  %3225 = vmatpush2.bf16.msra.mxu1 %v7290_v1 }
 0x8fa   :  { %3185 = vmatprep.subr.bf16.mxu0 %v7291_v59  ;;  %3226 = vmatprep.subr.bf16.mxu1 %v7292_v9 }
 0x8fd   :  { %3186 = vmatpush2.bf16.msra.mxu0 %v7293_v11  ;;  %3227 = vmatpush2.bf16.msra.mxu1 %v7294_v52 }
 0x8fe   :  { %3187 = vmatprep.subr.bf16.mxu0 %v7295_v4  ;;  %3228 = vmatprep.subr.bf16.mxu1 %v7296_v23  ;;  %v7303_v4 = vld [vmem:[#allocation169_spill] sm:$0xff] }
 0x901   :  { %3188 = vmatpush2.bf16.msra.mxu0 %v7297_v20  ;;  %3229 = vmatpush2.bf16.msra.mxu1 %v7298_v46  ;;  %v7304_v20 = vld [vmem:[#allocation170_spill] sm:$0xff] }
 0x902   :  { %3189 = vmatprep.subr.bf16.mxu0 %v7299_v60  ;;  %3230 = vmatprep.subr.bf16.mxu1 %v7300_v2  ;;  %v7305_v60 = vld [vmem:[#allocation171_spill] sm:$0xff] }
 0x905   :  { %3190 = vmatpush2.bf16.msra.mxu0 %v7301_v47  ;;  %3231 = vmatpush2.bf16.msra.mxu1 %v7302_v10  ;;  %v7306_v10 = vld [vmem:[#allocation172_spill] sm:$0xff] }
 0x906   :  { %3801 = vmatprep.subr.mxu0 %v3328_v18  ;;  %3853 = vmatprep.subr.mxu1 %v4302_v19 }
 0x908   :  { %3192 = vmatmul.mubr.bf16.vlgmr.msra.gmra.mxu0 %v6055_v3  ;;  %3233 = vmatmul.mubr.bf16.vlgmr.msra.gmra.mxu1 %v6055_v3  ;;  %v3407_v3 = vld [vmem:[%s6224_s6 + $0x40] sm:$0xff] }
 0x909   :  { %3802 = vmatpush3.msra.mxu0 %v3312_v41  ;;  %3854 = vmatpush3.msra.mxu1 %v3414_v31 }
 0x90a   :  { %3803 = vmatprep.subr.mxu0 %v3327_v34  ;;  %3855 = vmatprep.subr.mxu1 %v4302_v19 }
 0x90b   :  { %3804 = vmatpush3.msra.mxu0 %v3311_v42  ;;  %3856 = vmatpush3.msra.mxu1 %v3413_v38 }
 0x90c   :  { %3805 = vmatprep.subr.mxu0 %v3326_v43  ;;  %3857 = vmatprep.subr.mxu1 %v4302_v19 }
 0x90d   :  { %3806 = vmatpush3.msra.mxu0 %v3310_v50  ;;  %3858 = vmatpush3.msra.mxu1 %v3412_v6 }
 0x90e   :  { %3807 = vmatprep.subr.mxu0 %v3325_v24  ;;  %3859 = vmatprep.subr.mxu1 %v4302_v19 }
 0x90f   :  { %3808 = vmatpush3.msra.mxu0 %v3309_v16  ;;  %3860 = vmatpush3.msra.mxu1 %v3411_v0 }
 0x910   :  { %3809 = vmatprep.subr.mxu0 %v3324_v14  ;;  %3861 = vmatprep.subr.mxu1 %v4302_v19 }
 0x911   :  { %3810 = vmatpush3.msra.mxu0 %v3308_v40  ;;  %3862 = vmatpush3.msra.mxu1 %v3410_v44 }
 0x912   :  { %3811 = vmatprep.subr.mxu0 %v3323_v35  ;;  %3863 = vmatprep.subr.mxu1 %v4302_v19 }
 0x913   :  { %3812 = vmatpush3.msra.mxu0 %v3307_v51  ;;  %3864 = vmatpush3.msra.mxu1 %v3409_v45 }
 0x914   :  { %3813 = vmatprep.subr.mxu0 %v3322_v56  ;;  %3865 = vmatprep.subr.mxu1 %v4302_v19 }
 0x915   :  { %3814 = vmatpush3.msra.mxu0 %v3306_v30  ;;  %3866 = vmatpush3.msra.mxu1 %v3408_v57 }
 0x916   :  { %3815 = vmatprep.subr.mxu0 %v3321_v33  ;;  %3867 = vmatprep.subr.mxu1 %v4302_v19  ;;  %v7307_v33 = vld [vmem:[#allocation197_spill] sm:$0xff] }
 0x917   :  { %3816 = vmatpush3.msra.mxu0 %v3305_v48  ;;  %3868 = vmatpush3.msra.mxu1 %v3407_v3 }
 0x918   :  { %3817 = vmatprep.subr.mxu0 %v3320_v5  ;;  %3869 = vmatprep.subr.mxu1 %v4302_v19  ;;  %v7308_v5 = vld [vmem:[#allocation198_spill] sm:$0xff] }
 0x919   :  { %3818 = vmatpush3.msra.mxu0 %v3304_v32  ;;  %3870 = vmatpush3.msra.mxu1 %v3406_v12 }
 0x91a   :  { %3819 = vmatprep.subr.mxu0 %v3319_v49  ;;  %3871 = vmatprep.subr.mxu1 %v4302_v19 }
 0x91b   :  { %3820 = vmatpush3.msra.mxu0 %v3303_v27  ;;  %3872 = vmatpush3.msra.mxu1 %v3405_v36 }
 0x91c   :  { %3821 = vmatprep.subr.mxu0 %v3318_v13  ;;  %3873 = vmatprep.subr.mxu1 %v4302_v19 }
 0x91d   :  { %3822 = vmatpush3.msra.mxu0 %v3302_v8  ;;  %3874 = vmatpush3.msra.mxu1 %v3404_v22  ;;  %v7309_v8 = vld [vmem:[#allocation199_spill] sm:$0xff] }
 0x91e   :  { %3823 = vmatprep.subr.mxu0 %v3317_v15  ;;  %3875 = vmatprep.subr.mxu1 %v4302_v19 }
 0x91f   :  { %3824 = vmatpush3.msra.mxu0 %v3301_v21  ;;  %3876 = vmatpush3.msra.mxu1 %v3403_v61  ;;  %v7310_v21 = vld [vmem:[#allocation200_spill] sm:$0xff] }
 0x920   :  { %3825 = vmatprep.subr.mxu0 %v3316_v26  ;;  %3877 = vmatprep.subr.mxu1 %v4302_v19 }
 0x921   :  { %3826 = vmatpush3.msra.mxu0 %v3300_v58  ;;  %3878 = vmatpush3.msra.mxu1 %v3402_v37 }
 0x922   :  { %3827 = vmatprep.subr.mxu0 %v3315_v62  ;;  %3879 = vmatprep.subr.mxu1 %v4302_v19 }
 0x923   :  { %3828 = vmatpush3.msra.mxu0 %v3299_v29  ;;  %3885 = vmatprep.mubr.msk.f32.mxu1 %vm4303_vm1, %v4302_v19 }
 0x924   :  { %3829 = vmatprep.subr.mxu0 %v3314_v17 }
 0x925   :  { %3830 = vmatpush3.msra.mxu0 %v3298_v28 }
 0x926   :  { %3831 = vmatprep.subr.mxu0 %v3313_v25 }
 0x927   :  { %3832 = vmatpush3.msra.mxu0 %v3297_v39 }
 0x988   :  { %v3111_v63 = vpop.f32.mrf.mxu0  ;;  %v3152_v54 = vpop.f32.mrf.mxu1 }
 0x989   :  { %v3241_v23 = vadd.f32 %v3111_v63, %v7303_v4  ;;  %v3243_v46 = vadd.f32 %v3152_v54, %v7304_v20 }
 0x98a   :  { %v3113_v53 = vpop.f32.mrf.mxu0  ;;  %v3154_v1 = vpop.f32.mrf.mxu1 }
 0x98b   :  { %v3242_v2 = vadd.f32 %v3113_v53, %v7305_v60  ;;  %v3794_v47 = vmul.f32 -1.442695, %v3241_v23  ;;  %v3244_v18 = vadd.f32 %v3154_v1, %v7306_v10  ;;  %v3796_v41 = vmul.f32 -1.442695, %v3243_v46  ;;  %v3800_v46 = vld [vmem:[%s6225_s7] ss:$0 sm:$0xff] }
 0x98c   :  { %v3115_v59 = vpop.f32.mrf.mxu0  ;;  %v3156_v9 = vpop.f32.mrf.mxu1 }
 0x98d   :  { %v3795_v34 = vmul.f32 -1.442695, %v3242_v2  ;;  %4126 = vpow2.f32 %v3794_v47  ;;  %v3797_v42 = vmul.f32 -1.442695, %v3244_v18 }
 0x98e   :  { %v3116_v11 = vpop.f32.mrf.mxu0  ;;  %v3157_v52 = vpop.f32.mrf.mxu1  ;;  %4128 = vpow2.f32 %v3796_v41 }
 0x98f   :  { %4130 = vpow2.f32 %v3795_v34  ;;  %v3401_v11 = vld [vmem:[%s6224_s6 + $0x10] sm:$0xff]  ;;  %v3399_v52 = vld [vmem:[%s6224_s6] sm:$0xff] }
 0x990   :  { %4132 = vpow2.f32 %v3797_v42  ;;  %3880 = vmatpush3.msra.mxu1 %v3401_v11 }
 0x991   :  { %3881 = vmatprep.subr.mxu1 %v4302_v19 }
 0x99a   :  { %v4127_v43 = vpop.eup %4126 }
 0x99b   :  { %v4129_v50 = vpop.eup %4128  ;;  %v3267_v16 = vadd.f32 1.0, %v4127_v43 }
 0x99c   :  { %v4131_v24 = vpop.eup %4130  ;;  %v3269_v40 = vadd.f32 1.0, %v4129_v50 }
 0x99d   :  { %v4133_v14 = vpop.eup %4132  ;;  %v3268_v35 = vadd.f32 1.0, %v4131_v24  ;;  %4134 = vrcp.f32 %v3267_v16 }
 0x99e   :  { %v3270_v51 = vadd.f32 1.0, %v4133_v14  ;;  %4136 = vrcp.f32 %v3269_v40 }
 0x99f   :  { %4138 = vrcp.f32 %v3268_v35 }
 0x9aa   :  { %v4135_v25 = vpop.eup %4134 }
 0x9ab   :  { %v4137_v39 = vpop.eup %4136 }
 0x9ac   :  { %v4139_v31 = vpop.eup %4138  ;;  %v3287_v0 = vmul.f32 %v4137_v39, %v6048_v7 }
 0x9c8   :  { %v3193_v56 = vpop.f32.mrf.mxu0  ;;  %v3234_v30 = vpop.f32.mrf.mxu1 }
 0x9c9   :  { %v3245_v48 = vadd.f32 %v3193_v56, %v7307_v33  ;;  %v3247_v32 = vadd.f32 %v3234_v30, %v7308_v5 }
 0x9ca   :  { %v3195_v49 = vpop.f32.mrf.mxu0  ;;  %v3236_v27 = vpop.f32.mrf.mxu1 }
 0x9cb   :  { %v3798_v13 = vmul.f32 -1.442695, %v3245_v48  ;;  %4140 = vtanh.f32 %v3247_v32  ;;  %v3246_v15 = vadd.f32 %v3195_v49, %v7309_v8  ;;  %v3248_v26 = vadd.f32 %v3236_v27, %v7310_v21  ;;  %v3519_v8 = vld [vmem:[%s6219_s1] sm:$0xff] }
 0x9cc   :  { %4142 = vrcp.f32 %v3270_v51  ;;  %v3197_v58 = vpop.f32.mrf.mxu0  ;;  %v3238_v62 = vpop.f32.mrf.mxu1 }
 0x9cd   :  { %4144 = vpow2.f32 %v3798_v13  ;;  %v3799_v29 = vmul.f32 -1.442695, %v3246_v15 }
 0x9ce   :  { %4146 = vtanh.f32 %v3248_v26  ;;  %v3198_v17 = vpop.f32.mrf.mxu0  ;;  %v3239_v28 = vpop.f32.mrf.mxu1 }
 0x9cf   :  { %4148 = vpow2.f32 %v3799_v29 }
 0x9d8   :  { %v4141_v38 = vpop.eup %4140 }
 0x9d9   :  { %v4143_v6 = vpop.eup %4142  ;;  %v3289_v44 = vmul.f32 %v4141_v38, %v4135_v25 }
 0x9da   :  { %v4145_v45 = vpop.eup %4144  ;;  %v3288_v22 = vmul.f32 %v4143_v6, %v6052_v55  ;;  %v3400_v55 = vld [vmem:[%s6224_s6 + $0x8] sm:$0xff]  ;;  %s4304_s6 = smov 96  }
 0x9db   :  { %v4147_v57 = vpop.eup %4146  ;;  %v3271_v3 = vadd.f32 1.0, %v4145_v45  ;;  %v3291_v12 = vadd.f32 %v3289_v44, %v3287_v0  ;;  %3882 = vmatpush3.msra.mxu1 %v3400_v55 }
 0x9dc   :  { %v4149_v36 = vpop.eup %4148  ;;  %v3290_v61 = vmul.f32 %v4147_v57, %v4139_v31  ;;  %3883 = vmatprep.subr.mxu1 %v4302_v19 }
 0x9dd   :  { %4150 = vrcp.f32 %v3271_v3  ;;  %v3272_v63 = vadd.f32 1.0, %v4149_v36  ;;  %3884 = vmatpush3.msra.mxu1 %v3399_v52 }
 0x9de   :  { %4152 = vtanh.f32 %v3291_v12  ;;  %v3292_v54 = vadd.f32 %v3290_v61, %v3288_v22 }
 0x9df   :  { %4154 = vrcp.f32 %v3272_v63 }
 0x9e0   :  { %4156 = vtanh.f32 %v3292_v54 }
 0x9ea   :  { %v4151_v37 = vpop.eup %4150 }
 0x9eb   :  { %v4153_v53 = vpop.eup %4152 }
 0x9ec   :  { %v4155_v1 = vpop.eup %4154  ;;  %v3295_v59 = vmul.f32 %v4153_v53, %v4151_v37 }
 0x9ed   :  { %v4157_v7 = vpop.eup %4156 }
 0x9ee   :  { %v3296_v9 = vmul.f32 %v4157_v7, %v4155_v1 }
 0x9f0   :  { %3393 = vmatprep.mubr.f32.mxu0 %v3296_v9 }
 0x9f1   :  { %3394 = vmatmul.mubr.f32.vlgmr.msra.gmra.mxu0 %v3295_v59 }
 0xab1   :  { %v3833_v4 = vpop.f32.mrf.mxu0 }
 0xab3   :  { %v3834_v23 = vpop.f32.mrf.mxu0 }
 0xab4   :  { %v3835_v20 = vadd.f32 %v3834_v23, %v3833_v4 }
 0xab6   :  { %3886 = vmatmul.mubr.f32.vlgmr.msra.gmra.mxu1 %v3835_v20 }
 0xb76   :  { %v3488_v60 = vpop.f32.mrf.mxu1 }
 0xb77   :  { %v3489_v2 = vadd.f32 %v3800_v46, %v3488_v60 }
 0xb78   :  { %v3887_v47 = vpop.f32.mrf.mxu1 }
 0xb79   :  { %v3508_v10 = vand.u32 2147483647, %v3489_v2  ;;  %v3493_v18 = vsel %vm3492_vm2, %v3489_v2, 0.0  ;;  %v3507_v50 = vmax.f32 %v3489_v2, 0.0 }
 0xb7a   :  { %3494 = vadd.xlane.f32.xlu0 %v3493_v18 }
 0xb7b   :  { %v3509_v41 = vsub.f32 0.0, %v3508_v10 }
 0xb7d   :  { %v3510_v34 = vmul.f32 1.442695, %v3509_v41 }
 0xb7f   :  { %4158 = vpow2.f32 %v3510_v34 }
 0xb8c   :  { %v4159_v19 = vpop.eup %4158 }
 0xb8d   :  { %v3512_v42 = vadd.f32 1.0, %v4159_v19 }
 0xb8f   :  { %4160 = vlog2.f32 %v3512_v42 }
 0xb9c   :  { %v4161_v43 = vpop.eup %4160 }
 0xb9d   :  { %v3514_v24 = vmul.f32 0.6931472, %v4161_v43 }
 0xb9f   :  { %v3515_v16 = vadd.f32 %v3514_v24, %v3507_v50 }
 0xba1   :  { %v3516_v14 = vmul.f32 2.0, %v3515_v16 }
 0xba3   :  { %v3517_v40 = vmul.f32 1.442695, %v3516_v14 }
 0xba5   :  { %4162 = vpow2.f32 %v3517_v40 }
 0xbb2   :  { %v4163_v35 = vpop.eup %4162 }
 0xbb3   :  { %3521 = vrot.lane.b32.xlu1 %v4163_v35, %s4304_s6 }
 0xbb7   :  { %3529 = vrot.lane.b32.xlu1 %v3515_v16, %s4304_s6 }
 0xc03   :  { %v3495_v51 = vpop.xlane.xlu0 %3494 }
 0xc04   :  { %v3497_v56 = vmul.f32 0.03125, %v3495_v51 }
 0xc06   :  { %v3498_v30 = vsub.f32 %v3489_v2, %v3497_v56 }
 0xc08   :  { %v3499_v33 = vmul.f32 %v3498_v30, %v3498_v30 }
 0xc0a   :  { %v3500_v48 = vsel %vm3492_vm2, %v3499_v33, 0.0 }
 0xc0b   :  { %3501 = vadd.xlane.f32.xlu0 %v3500_v48 }
 0xc25   :  { %v3522_v5 = vpop.permute.xlu1 %3521 }
 0xc26   :  { %v3524_v21 = vmul.f32 %v3522_v5, %v3519_v8 }
 0xc29   :  { %v3530_v32 = vpop.permute.xlu1 %3529 }
 0xc2a   :  { %3532 = vst.msk [vmem:[#allocation12] sm:$0xff] %vm3492_vm2, %v3530_v32 }
 0xc94   :  { %v3502_v49 = vpop.xlane.xlu0 %3501 }
 0xc95   :  { %v3503_v27 = vmul.f32 0.03125, %v3502_v49 }
 0xc97   :  { %v3504_v13 = vadd.f32 1e-05, %v3503_v27 }
 0xc99   :  { %4164 = vrsqrt.f32 %v3504_v13 }
 0xca6   :  { %v4165_v15 = vpop.eup %4164 }
 0xca7   :  { %v3506_v26 = vmul.f32 %v4165_v15, %v3498_v30 }
 0xca9   :  { %3527 = vst.msk [vmem:[#allocation10] sm:$0xff] %vm3492_vm2, %v3506_v26  ;;  %v3525_v58 = vadd.f32 %v3524_v21, %v3506_v26 }
 0xcaa   :  { %4237 = shalt.err (!%p4234_p5)
}
 0xcab   :  { %3552 = dma.vmem_to_hbm [thread:$0]  %s3550_s13, 128, %s6227_s9, [#allocation11]   ;;  %3526 = vst.msk [vmem:[#allocation9] sm:$0xff] %vm3492_vm2, %v3525_v58 }
 0xcac   :  { %s4246_s20 = scalar_lea.vmem %s3560_s15, 128  ;;  %p4251_p7 = scmp.lt.s32.totalorder %s3560_s15, %s3560_s15 }
 0xcad   :  { %p4247_p6 = scmp.ne.s32.totalorder %s3560_s15, %s4246_s20  ;;  %p4252_p8 = scmp.lt.s32.totalorder %s4246_s20, %s4246_s20 }
 0xcaf   :  { %p4253_p9 = por %p4252_p8, %p4251_p7 }
 0xcb1   :  { %p4254_p10 = pnand %p4253_p9, %p4247_p6 }
 0xcb3   :  { %4257 = shalt.err (!%p4254_p10)
}
 0xcb4   :  { %3562 = dma.vmem_to_hbm [thread:$0]  %s3560_s15, 128, %s6228_s10, [#allocation11]  }
 0xcb5   :  { %s4266_s23 = scalar_lea.vmem %s3540_s17, 128  ;;  %p4271_p12 = scmp.lt.s32.totalorder %s3540_s17, %s3540_s17 }
 0xcb6   :  { %p4267_p11 = scmp.ne.s32.totalorder %s3540_s17, %s4266_s23  ;;  %p4272_p13 = scmp.lt.s32.totalorder %s4266_s23, %s4266_s23 }
 0xcb8   :  { %p4273_p0 = por %p4272_p13, %p4271_p12 }
 0xcba   :  { %p4274_p1 = pnand %p4273_p0, %p4267_p11 }
 0xcbc   :  { %4277 = shalt.err (!%p4274_p1)
}
 0xcbd   :  { %3542 = dma.vmem_to_hbm [thread:$0]  %s3540_s17, 128, %s6226_s8, [#allocation5]  }
 0xcbe   :  { %4290 = dma.done.wait [#allocation5], 128  }
 0xcbf   :  { %4291 = vsyncadd [#allocation5], 4294967168 }
 0xcc0   :  { %4292 = dma.done.wait [#allocation11], 256  }
 0xcc1   :  { %4293 = vsyncadd [#allocation11], 4294967040 }
 0xcc2   :  { %3572 = vsyncpa [#allocation4], 1 }
 0xcc3   :  { %3573 = vsyncpa [#allocation7], 1 }
 0xcc4   :  { %3574 = vsyncpa [#allocation5], 1 }
 0xcc5   :  { %3575 = vsyncpa [#allocation11], 1 }

</bundles_post_ra>
